<compile_context>
chip_gen: v7x
topology: tpu7x:2x2x1
jax: 0.10.0
libtpu: 0.0.40
codegen_flags: <defaults>
</compile_context>

<pallas_src>
import functools

import jax
import jax.numpy as jnp
from jax.experimental import pallas as pl
from jax.experimental.pallas import tpu as pltpu

_TM_MAX = 512                       # rows per M tile (multiple of 8)
_LANE = 128                         # pad Cout up to a multiple of this
_VMEM_LIMIT = 48 * 1024 * 1024      # explicit scoped-VMEM budget (v7x-safe)
_BN_EPS = 1e-5


def _round_up(x, m):
    return (x + m - 1) // m * m


def _check_vmem(tm, k, cp):
    # double-buffered bf16 patches + f32 out + resident bf16 weight (x2 bufs)
    est = 2 * (tm * k * 2 + tm * cp * 4) + 2 * k * cp * 2
    assert est < _VMEM_LIMIT, f"VMEM estimate {est} exceeds limit {_VMEM_LIMIT}"


# ---------------------------------------------------------------------------
# Pallas kernels
# ---------------------------------------------------------------------------
def _apply_act(x, act):
    if act == "leaky":
        return jnp.where(x > 0, x, 0.2 * x)
    if act == "sigmoid":
        # stable sigmoid: only exponentiate non-positive values; reciprocal on EUP
        z = jnp.exp(-jnp.abs(x))
        pos = pl.reciprocal(1.0 + z, approx=True)
        return jnp.clip(jnp.where(x >= 0, pos, 1.0 - pos), 0.0, 1.0)
    return x


def _matmul_act_kernel(p_ref, w_ref, o_ref, *, act):
    # p_ref: [TM, K] bf16, w_ref: [K, Cp] bf16 (resident), o_ref: [TM, Cp]
    acc = jnp.dot(p_ref[...], w_ref[...], preferred_element_type=jnp.float32)
    o_ref[...] = _apply_act(acc, act).astype(o_ref.dtype)


def _matmul_stats_kernel(p_ref, w_ref, o_ref, sum_ref, sq_ref):
    # Pass 1 of BN layers: conv matmul + accumulate per-channel sum / sum-sq.
    # sum_ref / sq_ref use constant block indices -> resident accumulators
    # across the (arbitrary) M-tile grid axis.
    acc = jnp.dot(p_ref[...], w_ref[...], preferred_element_type=jnp.float32)
    o_ref[...] = acc

    @pl.when(pl.program_id(0) == 0)
    def _init():
        sum_ref[...] = jnp.zeros_like(sum_ref)
        sq_ref[...] = jnp.zeros_like(sq_ref)

    # Sublane reductions hit the XLU, which is otherwise idle in this kernel
    # (no transposes), so they overlap with the MXU work.
    sum_ref[...] += jnp.sum(acc, axis=0, keepdims=True)
    sq_ref[...] += jnp.sum(acc * acc, axis=0, keepdims=True)


def _bn_act_kernel(x_ref, scale_ref, shift_ref, o_ref):
    # Pass 2 of BN layers: y = x * scale + shift, then LeakyReLU(0.2).
    y = x_ref[...] * scale_ref[...] + shift_ref[...]
    o_ref[...] = jnp.where(y > 0, y, 0.2 * y).astype(o_ref.dtype)


# ---------------------------------------------------------------------------
# Glue: NHWC im2col (pure slicing/reshape, bf16, no hot compute)
# ---------------------------------------------------------------------------
def _im2col_nhwc(x, kh, kw, stride, pad):
    # x: [N, H, W, C]  ->  patches [N*OH*OW, KH*KW*C], row order (n, oh, ow)
    n, h, w, c = x.shape
    xp = jnp.pad(x, ((0, 0), (pad, pad), (pad, pad), (0, 0)))
    oh = (h + 2 * pad - kh) // stride + 1
    ow = (w + 2 * pad - kw) // stride + 1
    cols = []
    for i in range(kh):
        for j in range(kw):
            cols.append(xp[:, i:i + stride * oh:stride,
                           j:j + stride * ow:stride, :])
    p = jnp.stack(cols, axis=3)                    # [N, OH, OW, KH*KW, C]
    p = p.reshape(n * oh * ow, kh * kw * c)        # column order (ki, kj, cin)
    return p, oh, ow


def _tile_m(m):
    tm = min(_TM_MAX, _round_up(m, 8))
    m_pad = _round_up(m, tm)
    return tm, m_pad


def _pad_rows(a, m_pad):
    m = a.shape[0]
    return a if m_pad == m else jnp.pad(a, ((0, m_pad - m), (0, 0)))


# ---------------------------------------------------------------------------
# Layer drivers
# ---------------------------------------------------------------------------
def _conv_matmul_act(patches, wmat, *, act, out_dtype):
    m, k = patches.shape
    cp = wmat.shape[1]
    tm, m_pad = _tile_m(m)
    _check_vmem(tm, k, cp)
    patches_p = _pad_rows(patches, m_pad)

    out = pl.pallas_call(
        functools.partial(_matmul_act_kernel, act=act),
        out_shape=jax.ShapeDtypeStruct((m_pad, cp), out_dtype),
        grid=(m_pad // tm,),
        in_specs=[
            pl.BlockSpec((tm, k), lambda i: (i, 0)),    # streamed patches
            pl.BlockSpec((k, cp), lambda i: (0, 0)),    # resident weight
        ],
        out_specs=pl.BlockSpec((tm, cp), lambda i: (i, 0)),
        compiler_params=pltpu.CompilerParams(
            dimension_semantics=("parallel",),
            vmem_limit_bytes=_VMEM_LIMIT),
    )(patches_p, wmat)
    return out, m


def _conv_bn_act(patches, wmat, gamma_p, beta_p):
    m, k = patches.shape
    cp = wmat.shape[1]
    tm, m_pad = _tile_m(m)
    _check_vmem(tm, k, cp)
    patches_p = _pad_rows(patches, m_pad)
    grid = (m_pad // tm,)

    # Pass 1: conv matmul + per-channel sum / sum-of-squares accumulation.
    conv, csum, csq = pl.pallas_call(
        _matmul_stats_kernel,
        out_shape=(
            jax.ShapeDtypeStruct((m_pad, cp), jnp.float32),   # pre-BN conv
            jax.ShapeDtypeStruct((1, cp), jnp.float32),       # sum
            jax.ShapeDtypeStruct((1, cp), jnp.float32),       # sum of squares
        ),
        grid=grid,
        in_specs=[
            pl.BlockSpec((tm, k), lambda i: (i, 0)),
            pl.BlockSpec((k, cp), lambda i: (0, 0)),
        ],
        out_specs=(
            pl.BlockSpec((tm, cp), lambda i: (i, 0)),
            pl.BlockSpec((1, cp), lambda i: (0, 0)),          # resident acc
            pl.BlockSpec((1, cp), lambda i: (0, 0)),          # resident acc
        ),
        compiler_params=pltpu.CompilerParams(
            dimension_semantics=("arbitrary",),               # accumulators
            vmem_limit_bytes=_VMEM_LIMIT),
    )(patches_p, wmat)

    # Fold full-batch stats + gamma/beta into per-channel scale/shift (tiny XLA).
    # Padded-M rows are zero and contribute 0 to both sums; divide by true m.
    inv_m = 1.0 / float(m)
    mean = csum * inv_m                                       # (1, Cp)
    var = jnp.maximum(csq * inv_m - mean * mean, 0.0)
    rstd = jax.lax.rsqrt(var + _BN_EPS)
    scale = gamma_p.reshape(1, cp) * rstd
    shift = beta_p.reshape(1, cp) - mean * scale

    # Pass 2: normalize + LeakyReLU, tiled over M, fully parallel.
    out = pl.pallas_call(
        _bn_act_kernel,
        out_shape=jax.ShapeDtypeStruct((m_pad, cp), jnp.bfloat16),
        grid=grid,
        in_specs=[
            pl.BlockSpec((tm, cp), lambda i: (i, 0)),
            pl.BlockSpec((1, cp), lambda i: (0, 0)),
            pl.BlockSpec((1, cp), lambda i: (0, 0)),
        ],
        out_specs=pl.BlockSpec((tm, cp), lambda i: (i, 0)),
        compiler_params=pltpu.CompilerParams(
            dimension_semantics=("parallel",),
            vmem_limit_bytes=_VMEM_LIMIT),
    )(conv, scale, shift)
    return out, m


# ---------------------------------------------------------------------------
# Discriminator: architecture, init, forward
# ---------------------------------------------------------------------------
def make_arch(num_image_channels, num_features):
    nc, nf = num_image_channels, num_features
    return (
        dict(name="c1", cin=nc,     cout=nf,     stride=2, pad=1, bn=False, act="leaky"),
        dict(name="c2", cin=nf,     cout=nf * 2, stride=2, pad=1, bn=True,  act="leaky"),
        dict(name="c3", cin=nf * 2, cout=nf * 4, stride=2, pad=1, bn=True,  act="leaky"),
        dict(name="c4", cin=nf * 4, cout=nf * 8, stride=2, pad=1, bn=True,  act="leaky"),
        dict(name="c5", cin=nf * 8, cout=1,      stride=1, pad=0, bn=False, act="sigmoid"),
    )


def _prep_weight(w_pt):
    # PyTorch layout [Cout, Cin, KH, KW] -> [KH*KW*Cin, Cp] bf16, Cout padded
    # to a 128 multiple (lane-dense kernel outputs).  Done once at init.
    cout, cin, kh, kw = w_pt.shape
    wmat = jnp.transpose(w_pt, (2, 3, 1, 0)).reshape(kh * kw * cin, cout)
    cp = _round_up(cout, _LANE)
    return jnp.pad(wmat, ((0, 0), (0, cp - cout))).astype(jnp.bfloat16)


def init_discriminator_params(key, arch):
    # DCGAN "normal" init: conv ~ N(0, 0.02); BN gamma ~ N(1, 0.02), beta = 0.
    params = {}
    keys = jax.random.split(key, 2 * len(arch))
    for idx, layer in enumerate(arch):
        cout, cin = layer["cout"], layer["cin"]
        w = 0.02 * jax.random.normal(keys[2 * idx], (cout, cin, 4, 4), jnp.float32)
        params[layer["name"] + "_w"] = _prep_weight(w)
        if layer["bn"]:
            cp = _round_up(cout, _LANE)
            g = 1.0 + 0.02 * jax.random.normal(keys[2 * idx + 1], (cout,), jnp.float32)
            b = jnp.zeros((cout,), jnp.float32)
            params[layer["name"] + "_g"] = jnp.pad(g, (0, cp - cout))
            params[layer["name"] + "_b"] = jnp.pad(b, (0, cp - cout))
    return params


def discriminator_forward(arch, params, x_nchw):
    # NCHW (public interface) -> NHWC bf16 once at the boundary.
    h = jnp.transpose(x_nchw, (0, 2, 3, 1)).astype(jnp.bfloat16)
    n = h.shape[0]
    for li, layer in enumerate(arch):
        is_last = li == len(arch) - 1
        patches, oh, ow = _im2col_nhwc(h, 4, 4, layer["stride"], layer["pad"])
        wmat = params[layer["name"] + "_w"]
        if layer["bn"]:
            flat, m = _conv_bn_act(patches, wmat,
                                   params[layer["name"] + "_g"],
                                   params[layer["name"] + "_b"])
        else:
            out_dtype = jnp.float32 if is_last else jnp.bfloat16
            flat, m = _conv_matmul_act(patches, wmat, act=layer["act"],
                                       out_dtype=out_dtype)
        # drop M/Cout padding, keep NHWC for the next layer
        h = flat[:m, :layer["cout"]].reshape(n, oh, ow, layer["cout"])
    # back to NCHW at the model boundary: [N, 1, 1, 1]
    return jnp.transpose(h, (0, 3, 1, 2)).astype(jnp.float32)


if __name__ == "__main__":
    # Small config: 3 image channels, num_features = 8, batch 2.
    # DCGAN discriminator requires 64x64 spatial input so the final 4x4 /
    # stride-1 valid conv produces a 1x1 map.
    nc, nf = 3, 8
    arch = make_arch(nc, nf)

    key = jax.random.PRNGKey(0)
    k_param, k_input = jax.random.split(key)
    params = init_discriminator_params(k_param, arch)
    x = jax.random.normal(k_input, (2, nc, 64, 64), jnp.float32)

    fwd = jax.jit(functools.partial(discriminator_forward, arch))
    y = jax.block_until_ready(fwd(params, x))

    assert y.shape == (2, 1, 1, 1), y.shape
    assert bool(jnp.all(jnp.isfinite(y)))
    assert bool(jnp.all((y >= 0.0) & (y <= 1.0)))
    print("KERNEL_OK")
</pallas_src>

<mosaic_0001>
module attributes {stable_mosaic.version = 11 : i64} {
  func.func @_matmul_act_kernel(%arg0: i32, %arg1: memref<512x48xbf16, #tpu.memory_space<vmem>>, %arg2: memref<48x128xbf16, #tpu.memory_space<vmem>>, %arg3: memref<512x128xbf16, #tpu.memory_space<vmem>>) attributes {dimension_semantics = [#tpu.dimension_semantics<parallel>], iteration_bounds = array<i64: 4>, scalar_prefetch = 0 : i64, scratch_operands = 0 : i64, tpu.core_type = #tpu.core_type<tc>, window_params = [{transform_indices = @transform_0, window_bounds = array<i64: 512, 48>}, {pipeline_mode = #tpu.pipeline_mode<synchronous>, transform_indices = @transform_1, window_bounds = array<i64: 48, 128>}, {transform_indices = @transform_2, window_bounds = array<i64: 512, 128>}]} {
    %c0 = arith.constant 0 : index
    %c0_0 = arith.constant 0 : index
    %0 = vector.load %arg1[%c0, %c0_0] : memref<512x48xbf16, #tpu.memory_space<vmem>>, vector<512x48xbf16>
    %c0_1 = arith.constant 0 : index
    %c0_2 = arith.constant 0 : index
    %1 = vector.load %arg2[%c0_1, %c0_2] : memref<48x128xbf16, #tpu.memory_space<vmem>>, vector<48x128xbf16>
    %cst = arith.constant dense<0.000000e+00> : vector<512x128xf32>
    %2 = tpu.matmul %0, %1, %cst {dimension_numbers = #tpu.dot_dimension_numbers<[1], [0], [0], [1], [0, 0, 1, 1], [], []>} : vector<512x48xbf16>, vector<48x128xbf16>, vector<512x128xf32> -> vector<512x128xf32>
    %cst_3 = arith.constant 0.000000e+00 : f32
    %3 = vector.broadcast %cst_3 : f32 to vector<512x128xf32>
    %4 = arith.cmpf ogt, %2, %3 : vector<512x128xf32>
    %cst_4 = arith.constant 2.000000e-01 : f32
    %5 = vector.broadcast %cst_4 : f32 to vector<512x128xf32>
    %6 = arith.mulf %5, %2 : vector<512x128xf32>
    %7 = arith.select %4, %2, %6 : vector<512x128xi1>, vector<512x128xf32>
    %8 = arith.truncf %7 : vector<512x128xf32> to vector<512x128xbf16>
    %c0_5 = arith.constant 0 : index
    %c0_6 = arith.constant 0 : index
    %9 = vector.load %arg3[%c0_5, %c0_6] : memref<512x128xbf16, #tpu.memory_space<vmem>>, vector<512x128xbf16>
    tpu.vector_store %arg3[%c0_5, %c0_6], %8 {strides = array<i32>} : memref<512x128xbf16, #tpu.memory_space<vmem>>, vector<512x128xbf16>,
    return
  }
  func.func @transform_0(%arg0: i32) -> (i32, i32) {
    %c0_i32 = arith.constant 0 : i32
    %c0_i32_0 = arith.constant 0 : i32
    return %arg0, %c0_i32 : i32, i32
  }
  func.func @transform_1(%arg0: i32) -> (i32, i32) {
    %c0_i32 = arith.constant 0 : i32
    %c0_i32_0 = arith.constant 0 : i32
    %c0_i32_1 = arith.constant 0 : i32
    return %c0_i32, %c0_i32_0 : i32, i32
  }
  func.func @transform_2(%arg0: i32) -> (i32, i32) {
    %c0_i32 = arith.constant 0 : i32
    %c0_i32_0 = arith.constant 0 : i32
    return %arg0, %c0_i32 : i32, i32
  }
}

module attributes {stable_mosaic.version = 11 : i64} {
  func.func @_matmul_stats_kernel(%arg0: i32, %arg1: memref<512x128xbf16, #tpu.memory_space<vmem>>, %arg2: memref<128x128xbf16, #tpu.memory_space<vmem>>, %arg3: memref<512x128xf32, #tpu.memory_space<vmem>>, %arg4: memref<1x128xf32, #tpu.memory_space<vmem>>, %arg5: memref<1x128xf32, #tpu.memory_space<vmem>>) attributes {dimension_semantics = [#tpu.dimension_semantics<arbitrary>], iteration_bounds = array<i64: 1>, scalar_prefetch = 0 : i64, scratch_operands = 0 : i64, tpu.core_type = #tpu.core_type<tc>, window_params = [{transform_indices = @transform_0, window_bounds = array<i64: 512, 128>}, {pipeline_mode = #tpu.pipeline_mode<synchronous>, transform_indices = @transform_1, window_bounds = array<i64: 128, 128>}, {transform_indices = @transform_2, window_bounds = array<i64: 512, 128>}, {pipeline_mode = #tpu.pipeline_mode<synchronous>, transform_indices = @transform_3, window_bounds = array<i64: 1, 128>}, {pipeline_mode = #tpu.pipeline_mode<synchronous>, transform_indices = @transform_4, window_bounds = array<i64: 1, 128>}]} {
    %c0 = arith.constant 0 : index
    %c0_0 = arith.constant 0 : index
    %0 = vector.load %arg1[%c0, %c0_0] : memref<512x128xbf16, #tpu.memory_space<vmem>>, vector<512x128xbf16>
    %c0_1 = arith.constant 0 : index
    %c0_2 = arith.constant 0 : index
    %1 = vector.load %arg2[%c0_1, %c0_2] : memref<128x128xbf16, #tpu.memory_space<vmem>>, vector<128x128xbf16>
    %cst = arith.constant dense<0.000000e+00> : vector<512x128xf32>
    %2 = tpu.matmul %0, %1, %cst {dimension_numbers = #tpu.dot_dimension_numbers<[1], [0], [0], [1], [0, 0, 1, 1], [], []>} : vector<512x128xbf16>, vector<128x128xbf16>, vector<512x128xf32> -> vector<512x128xf32>
    %c0_3 = arith.constant 0 : index
    %c0_4 = arith.constant 0 : index
    %3 = vector.load %arg3[%c0_3, %c0_4] : memref<512x128xf32, #tpu.memory_space<vmem>>, vector<512x128xf32>
    tpu.vector_store %arg3[%c0_3, %c0_4], %2 {strides = array<i32>} : memref<512x128xf32, #tpu.memory_space<vmem>>, vector<512x128xf32>,
    %c0_i32 = arith.constant 0 : i32
    %4 = arith.cmpi eq, %arg0, %c0_i32 : i32
    %5 = arith.extui %4 : i1 to i32
    %c0_i32_5 = arith.constant 0 : i32
    %6 = arith.cmpi ne, %5, %c0_i32_5 : i32
    scf.if %6 {
      %cst_16 = arith.constant 0.000000e+00 : f32
      %18 = vector.broadcast %cst_16 : f32 to vector<1x128xf32>
      %c0_17 = arith.constant 0 : index
      %c0_18 = arith.constant 0 : index
      %19 = vector.load %arg4[%c0_17, %c0_18] : memref<1x128xf32, #tpu.memory_space<vmem>>, vector<1x128xf32>
      tpu.vector_store %arg4[%c0_17, %c0_18], %18 {strides = array<i32>} : memref<1x128xf32, #tpu.memory_space<vmem>>, vector<1x128xf32>,
      %cst_19 = arith.constant 0.000000e+00 : f32
      %20 = vector.broadcast %cst_19 : f32 to vector<1x128xf32>
      %c0_20 = arith.constant 0 : index
      %c0_21 = arith.constant 0 : index
      %21 = vector.load %arg5[%c0_20, %c0_21] : memref<1x128xf32, #tpu.memory_space<vmem>>, vector<1x128xf32>
      tpu.vector_store %arg5[%c0_20, %c0_21], %20 {strides = array<i32>} : memref<1x128xf32, #tpu.memory_space<vmem>>, vector<1x128xf32>,
    } else {
    }
    %c0_6 = arith.constant 0 : index
    %c0_7 = arith.constant 0 : index
    %7 = vector.load %arg4[%c0_6, %c0_7] : memref<1x128xf32, #tpu.memory_space<vmem>>, vector<1x128xf32>
    %cst_8 = arith.constant dense<0.000000e+00> : vector<128xf32>
    %8 = vector.multi_reduction <add>, %2, %cst_8 [0] : vector<512x128xf32> to vector<128xf32>
    %9 = vector.shape_cast %8 : vector<128xf32> to vector<1x128xf32>
    %10 = arith.addf %7, %9 : vector<1x128xf32>
    %c0_9 = arith.constant 0 : index
    %c0_10 = arith.constant 0 : index
    %11 = vector.load %arg4[%c0_9, %c0_10] : memref<1x128xf32, #tpu.memory_space<vmem>>, vector<1x128xf32>
    tpu.vector_store %arg4[%c0_9, %c0_10], %10 {strides = array<i32>} : memref<1x128xf32, #tpu.memory_space<vmem>>, vector<1x128xf32>,
    %c0_11 = arith.constant 0 : index
    %c0_12 = arith.constant 0 : index
    %12 = vector.load %arg5[%c0_11, %c0_12] : memref<1x128xf32, #tpu.memory_space<vmem>>, vector<1x128xf32>
    %13 = arith.mulf %2, %2 : vector<512x128xf32>
    %cst_13 = arith.constant dense<0.000000e+00> : vector<128xf32>
    %14 = vector.multi_reduction <add>, %13, %cst_13 [0] : vector<512x128xf32> to vector<128xf32>
    %15 = vector.shape_cast %14 : vector<128xf32> to vector<1x128xf32>
    %16 = arith.addf %12, %15 : vector<1x128xf32>
    %c0_14 = arith.constant 0 : index
    %c0_15 = arith.constant 0 : index
    %17 = vector.load %arg5[%c0_14, %c0_15] : memref<1x128xf32, #tpu.memory_space<vmem>>, vector<1x128xf32>
    tpu.vector_store %arg5[%c0_14, %c0_15], %16 {strides = array<i32>} : memref<1x128xf32, #tpu.memory_space<vmem>>, vector<1x128xf32>,
    return
  }
  func.func @transform_0(%arg0: i32) -> (i32, i32) {
    %c0_i32 = arith.constant 0 : i32
    %c0_i32_0 = arith.constant 0 : i32
    return %arg0, %c0_i32 : i32, i32
  }
  func.func @transform_1(%arg0: i32) -> (i32, i32) {
    %c0_i32 = arith.constant 0 : i32
    %c0_i32_0 = arith.constant 0 : i32
    %c0_i32_1 = arith.constant 0 : i32
    return %c0_i32, %c0_i32_0 : i32, i32
  }
  func.func @transform_2(%arg0: i32) -> (i32, i32) {
    %c0_i32 = arith.constant 0 : i32
    %c0_i32_0 = arith.constant 0 : i32
    return %arg0, %c0_i32 : i32, i32
  }
  func.func @transform_3(%arg0: i32) -> (i32, i32) {
    %c0_i32 = arith.constant 0 : i32
    %c0_i32_0 = arith.constant 0 : i32
    %c0_i32_1 = arith.constant 0 : i32
    return %c0_i32, %c0_i32_0 : i32, i32
  }
  func.func @transform_4(%arg0: i32) -> (i32, i32) {
    %c0_i32 = arith.constant 0 : i32
    %c0_i32_0 = arith.constant 0 : i32
    %c0_i32_1 = arith.constant 0 : i32
    return %c0_i32, %c0_i32_0 : i32, i32
  }
}

module attributes {stable_mosaic.version = 11 : i64} {
  func.func @_bn_act_kernel(%arg0: i32, %arg1: memref<512x128xf32, #tpu.memory_space<vmem>>, %arg2: memref<1x128xf32, #tpu.memory_space<vmem>>, %arg3: memref<1x128xf32, #tpu.memory_space<vmem>>, %arg4: memref<512x128xbf16, #tpu.memory_space<vmem>>) attributes {dimension_semantics = [#tpu.dimension_semantics<parallel>], iteration_bounds = array<i64: 1>, scalar_prefetch = 0 : i64, scratch_operands = 0 : i64, tpu.core_type = #tpu.core_type<tc>, window_params = [{transform_indices = @transform_0, window_bounds = array<i64: 512, 128>}, {pipeline_mode = #tpu.pipeline_mode<synchronous>, transform_indices = @transform_1, window_bounds = array<i64: 1, 128>}, {pipeline_mode = #tpu.pipeline_mode<synchronous>, transform_indices = @transform_2, window_bounds = array<i64: 1, 128>}, {transform_indices = @transform_3, window_bounds = array<i64: 512, 128>}]} {
    %c0 = arith.constant 0 : index
    %c0_0 = arith.constant 0 : index
    %0 = vector.load %arg1[%c0, %c0_0] : memref<512x128xf32, #tpu.memory_space<vmem>>, vector<512x128xf32>
    %c0_1 = arith.constant 0 : index
    %c0_2 = arith.constant 0 : index
    %1 = vector.load %arg2[%c0_1, %c0_2] : memref<1x128xf32, #tpu.memory_space<vmem>>, vector<1x128xf32>
    %2 = vector.broadcast %1 : vector<1x128xf32> to vector<512x128xf32>
    %3 = arith.mulf %0, %2 : vector<512x128xf32>
    %c0_3 = arith.constant 0 : index
    %c0_4 = arith.constant 0 : index
    %4 = vector.load %arg3[%c0_3, %c0_4] : memref<1x128xf32, #tpu.memory_space<vmem>>, vector<1x128xf32>
    %5 = vector.broadcast %4 : vector<1x128xf32> to vector<512x128xf32>
    %6 = arith.addf %3, %5 : vector<512x128xf32>
    %cst = arith.constant 0.000000e+00 : f32
    %7 = vector.broadcast %cst : f32 to vector<512x128xf32>
    %8 = arith.cmpf ogt, %6, %7 : vector<512x128xf32>
    %cst_5 = arith.constant 2.000000e-01 : f32
    %9 = vector.broadcast %cst_5 : f32 to vector<512x128xf32>
    %10 = arith.mulf %9, %6 : vector<512x128xf32>
    %11 = arith.select %8, %6, %10 : vector<512x128xi1>, vector<512x128xf32>
    %12 = arith.truncf %11 : vector<512x128xf32> to vector<512x128xbf16>
    %c0_6 = arith.constant 0 : index
    %c0_7 = arith.constant 0 : index
    %13 = vector.load %arg4[%c0_6, %c0_7] : memref<512x128xbf16, #tpu.memory_space<vmem>>, vector<512x128xbf16>
    tpu.vector_store %arg4[%c0_6, %c0_7], %12 {strides = array<i32>} : memref<512x128xbf16, #tpu.memory_space<vmem>>, vector<512x128xbf16>,
    return
  }
  func.func @transform_0(%arg0: i32) -> (i32, i32) {
    %c0_i32 = arith.constant 0 : i32
    %c0_i32_0 = arith.constant 0 : i32
    return %arg0, %c0_i32 : i32, i32
  }
  func.func @transform_1(%arg0: i32) -> (i32, i32) {
    %c0_i32 = arith.constant 0 : i32
    %c0_i32_0 = arith.constant 0 : i32
    %c0_i32_1 = arith.constant 0 : i32
    return %c0_i32, %c0_i32_0 : i32, i32
  }
  func.func @transform_2(%arg0: i32) -> (i32, i32) {
    %c0_i32 = arith.constant 0 : i32
    %c0_i32_0 = arith.constant 0 : i32
    %c0_i32_1 = arith.constant 0 : i32
    return %c0_i32, %c0_i32_0 : i32, i32
  }
  func.func @transform_3(%arg0: i32) -> (i32, i32) {
    %c0_i32 = arith.constant 0 : i32
    %c0_i32_0 = arith.constant 0 : i32
    return %arg0, %c0_i32 : i32, i32
  }
}

module attributes {stable_mosaic.version = 11 : i64} {
  func.func @_matmul_stats_kernel(%arg0: i32, %arg1: memref<128x256xbf16, #tpu.memory_space<vmem>>, %arg2: memref<256x128xbf16, #tpu.memory_space<vmem>>, %arg3: memref<128x128xf32, #tpu.memory_space<vmem>>, %arg4: memref<1x128xf32, #tpu.memory_space<vmem>>, %arg5: memref<1x128xf32, #tpu.memory_space<vmem>>) attributes {dimension_semantics = [#tpu.dimension_semantics<arbitrary>], iteration_bounds = array<i64: 1>, scalar_prefetch = 0 : i64, scratch_operands = 0 : i64, tpu.core_type = #tpu.core_type<tc>, window_params = [{transform_indices = @transform_0, window_bounds = array<i64: 128, 256>}, {pipeline_mode = #tpu.pipeline_mode<synchronous>, transform_indices = @transform_1, window_bounds = array<i64: 256, 128>}, {transform_indices = @transform_2, window_bounds = array<i64: 128, 128>}, {pipeline_mode = #tpu.pipeline_mode<synchronous>, transform_indices = @transform_3, window_bounds = array<i64: 1, 128>}, {pipeline_mode = #tpu.pipeline_mode<synchronous>, transform_indices = @transform_4, window_bounds = array<i64: 1, 128>}]} {
    %c0 = arith.constant 0 : index
    %c0_0 = arith.constant 0 : index
    %0 = vector.load %arg1[%c0, %c0_0] : memref<128x256xbf16, #tpu.memory_space<vmem>>, vector<128x256xbf16>
    %c0_1 = arith.constant 0 : index
    %c0_2 = arith.constant 0 : index
    %1 = vector.load %arg2[%c0_1, %c0_2] : memref<256x128xbf16, #tpu.memory_space<vmem>>, vector<256x128xbf16>
    %cst = arith.constant dense<0.000000e+00> : vector<128x128xf32>
    %2 = tpu.matmul %0, %1, %cst {dimension_numbers = #tpu.dot_dimension_numbers<[1], [0], [0], [1], [0, 0, 1, 1], [], []>} : vector<128x256xbf16>, vector<256x128xbf16>, vector<128x128xf32> -> vector<128x128xf32>
    %c0_3 = arith.constant 0 : index
    %c0_4 = arith.constant 0 : index
    %3 = vector.load %arg3[%c0_3, %c0_4] : memref<128x128xf32, #tpu.memory_space<vmem>>, vector<128x128xf32>
    tpu.vector_store %arg3[%c0_3, %c0_4], %2 {strides = array<i32>} : memref<128x128xf32, #tpu.memory_space<vmem>>, vector<128x128xf32>,
    %c0_i32 = arith.constant 0 : i32
    %4 = arith.cmpi eq, %arg0, %c0_i32 : i32
    %5 = arith.extui %4 : i1 to i32
    %c0_i32_5 = arith.constant 0 : i32
    %6 = arith.cmpi ne, %5, %c0_i32_5 : i32
    scf.if %6 {
      %cst_16 = arith.constant 0.000000e+00 : f32
      %18 = vector.broadcast %cst_16 : f32 to vector<1x128xf32>
      %c0_17 = arith.constant 0 : index
      %c0_18 = arith.constant 0 : index
      %19 = vector.load %arg4[%c0_17, %c0_18] : memref<1x128xf32, #tpu.memory_space<vmem>>, vector<1x128xf32>
      tpu.vector_store %arg4[%c0_17, %c0_18], %18 {strides = array<i32>} : memref<1x128xf32, #tpu.memory_space<vmem>>, vector<1x128xf32>,
      %cst_19 = arith.constant 0.000000e+00 : f32
      %20 = vector.broadcast %cst_19 : f32 to vector<1x128xf32>
      %c0_20 = arith.constant 0 : index
      %c0_21 = arith.constant 0 : index
      %21 = vector.load %arg5[%c0_20, %c0_21] : memref<1x128xf32, #tpu.memory_space<vmem>>, vector<1x128xf32>
      tpu.vector_store %arg5[%c0_20, %c0_21], %20 {strides = array<i32>} : memref<1x128xf32, #tpu.memory_space<vmem>>, vector<1x128xf32>,
    } else {
    }
    %c0_6 = arith.constant 0 : index
    %c0_7 = arith.constant 0 : index
    %7 = vector.load %arg4[%c0_6, %c0_7] : memref<1x128xf32, #tpu.memory_space<vmem>>, vector<1x128xf32>
    %cst_8 = arith.constant dense<0.000000e+00> : vector<128xf32>
    %8 = vector.multi_reduction <add>, %2, %cst_8 [0] : vector<128x128xf32> to vector<128xf32>
    %9 = vector.shape_cast %8 : vector<128xf32> to vector<1x128xf32>
    %10 = arith.addf %7, %9 : vector<1x128xf32>
    %c0_9 = arith.constant 0 : index
    %c0_10 = arith.constant 0 : index
    %11 = vector.load %arg4[%c0_9, %c0_10] : memref<1x128xf32, #tpu.memory_space<vmem>>, vector<1x128xf32>
    tpu.vector_store %arg4[%c0_9, %c0_10], %10 {strides = array<i32>} : memref<1x128xf32, #tpu.memory_space<vmem>>, vector<1x128xf32>,
    %c0_11 = arith.constant 0 : index
    %c0_12 = arith.constant 0 : index
    %12 = vector.load %arg5[%c0_11, %c0_12] : memref<1x128xf32, #tpu.memory_space<vmem>>, vector<1x128xf32>
    %13 = arith.mulf %2, %2 : vector<128x128xf32>
    %cst_13 = arith.constant dense<0.000000e+00> : vector<128xf32>
    %14 = vector.multi_reduction <add>, %13, %cst_13 [0] : vector<128x128xf32> to vector<128xf32>
    %15 = vector.shape_cast %14 : vector<128xf32> to vector<1x128xf32>
    %16 = arith.addf %12, %15 : vector<1x128xf32>
    %c0_14 = arith.constant 0 : index
    %c0_15 = arith.constant 0 : index
    %17 = vector.load %arg5[%c0_14, %c0_15] : memref<1x128xf32, #tpu.memory_space<vmem>>, vector<1x128xf32>
    tpu.vector_store %arg5[%c0_14, %c0_15], %16 {strides = array<i32>} : memref<1x128xf32, #tpu.memory_space<vmem>>, vector<1x128xf32>,
    return
  }
  func.func @transform_0(%arg0: i32) -> (i32, i32) {
    %c0_i32 = arith.constant 0 : i32
    %c0_i32_0 = arith.constant 0 : i32
    return %arg0, %c0_i32 : i32, i32
  }
  func.func @transform_1(%arg0: i32) -> (i32, i32) {
    %c0_i32 = arith.constant 0 : i32
    %c0_i32_0 = arith.constant 0 : i32
    %c0_i32_1 = arith.constant 0 : i32
    return %c0_i32, %c0_i32_0 : i32, i32
  }
  func.func @transform_2(%arg0: i32) -> (i32, i32) {
    %c0_i32 = arith.constant 0 : i32
    %c0_i32_0 = arith.constant 0 : i32
    return %arg0, %c0_i32 : i32, i32
  }
  func.func @transform_3(%arg0: i32) -> (i32, i32) {
    %c0_i32 = arith.constant 0 : i32
    %c0_i32_0 = arith.constant 0 : i32
    %c0_i32_1 = arith.constant 0 : i32
    return %c0_i32, %c0_i32_0 : i32, i32
  }
  func.func @transform_4(%arg0: i32) -> (i32, i32) {
    %c0_i32 = arith.constant 0 : i32
    %c0_i32_0 = arith.constant 0 : i32
    %c0_i32_1 = arith.constant 0 : i32
    return %c0_i32, %c0_i32_0 : i32, i32
  }
}

module attributes {stable_mosaic.version = 11 : i64} {
  func.func @_bn_act_kernel(%arg0: i32, %arg1: memref<128x128xf32, #tpu.memory_space<vmem>>, %arg2: memref<1x128xf32, #tpu.memory_space<vmem>>, %arg3: memref<1x128xf32, #tpu.memory_space<vmem>>, %arg4: memref<128x128xbf16, #tpu.memory_space<vmem>>) attributes {dimension_semantics = [#tpu.dimension_semantics<parallel>], iteration_bounds = array<i64: 1>, scalar_prefetch = 0 : i64, scratch_operands = 0 : i64, tpu.core_type = #tpu.core_type<tc>, window_params = [{transform_indices = @transform_0, window_bounds = array<i64: 128, 128>}, {pipeline_mode = #tpu.pipeline_mode<synchronous>, transform_indices = @transform_1, window_bounds = array<i64: 1, 128>}, {pipeline_mode = #tpu.pipeline_mode<synchronous>, transform_indices = @transform_2, window_bounds = array<i64: 1, 128>}, {transform_indices = @transform_3, window_bounds = array<i64: 128, 128>}]} {
    %c0 = arith.constant 0 : index
    %c0_0 = arith.constant 0 : index
    %0 = vector.load %arg1[%c0, %c0_0] : memref<128x128xf32, #tpu.memory_space<vmem>>, vector<128x128xf32>
    %c0_1 = arith.constant 0 : index
    %c0_2 = arith.constant 0 : index
    %1 = vector.load %arg2[%c0_1, %c0_2] : memref<1x128xf32, #tpu.memory_space<vmem>>, vector<1x128xf32>
    %2 = vector.broadcast %1 : vector<1x128xf32> to vector<128x128xf32>
    %3 = arith.mulf %0, %2 : vector<128x128xf32>
    %c0_3 = arith.constant 0 : index
    %c0_4 = arith.constant 0 : index
    %4 = vector.load %arg3[%c0_3, %c0_4] : memref<1x128xf32, #tpu.memory_space<vmem>>, vector<1x128xf32>
    %5 = vector.broadcast %4 : vector<1x128xf32> to vector<128x128xf32>
    %6 = arith.addf %3, %5 : vector<128x128xf32>
    %cst = arith.constant 0.000000e+00 : f32
    %7 = vector.broadcast %cst : f32 to vector<128x128xf32>
    %8 = arith.cmpf ogt, %6, %7 : vector<128x128xf32>
    %cst_5 = arith.constant 2.000000e-01 : f32
    %9 = vector.broadcast %cst_5 : f32 to vector<128x128xf32>
    %10 = arith.mulf %9, %6 : vector<128x128xf32>
    %11 = arith.select %8, %6, %10 : vector<128x128xi1>, vector<128x128xf32>
    %12 = arith.truncf %11 : vector<128x128xf32> to vector<128x128xbf16>
    %c0_6 = arith.constant 0 : index
    %c0_7 = arith.constant 0 : index
    %13 = vector.load %arg4[%c0_6, %c0_7] : memref<128x128xbf16, #tpu.memory_space<vmem>>, vector<128x128xbf16>
    tpu.vector_store %arg4[%c0_6, %c0_7], %12 {strides = array<i32>} : memref<128x128xbf16, #tpu.memory_space<vmem>>, vector<128x128xbf16>,
    return
  }
  func.func @transform_0(%arg0: i32) -> (i32, i32) {
    %c0_i32 = arith.constant 0 : i32
    %c0_i32_0 = arith.constant 0 : i32
    return %arg0, %c0_i32 : i32, i32
  }
  func.func @transform_1(%arg0: i32) -> (i32, i32) {
    %c0_i32 = arith.constant 0 : i32
    %c0_i32_0 = arith.constant 0 : i32
    %c0_i32_1 = arith.constant 0 : i32
    return %c0_i32, %c0_i32_0 : i32, i32
  }
  func.func @transform_2(%arg0: i32) -> (i32, i32) {
    %c0_i32 = arith.constant 0 : i32
    %c0_i32_0 = arith.constant 0 : i32
    %c0_i32_1 = arith.constant 0 : i32
    return %c0_i32, %c0_i32_0 : i32, i32
  }
  func.func @transform_3(%arg0: i32) -> (i32, i32) {
    %c0_i32 = arith.constant 0 : i32
    %c0_i32_0 = arith.constant 0 : i32
    return %arg0, %c0_i32 : i32, i32
  }
}

module attributes {stable_mosaic.version = 11 : i64} {
  func.func @_matmul_stats_kernel(%arg0: i32, %arg1: memref<32x512xbf16, #tpu.memory_space<vmem>>, %arg2: memref<512x128xbf16, #tpu.memory_space<vmem>>, %arg3: memref<32x128xf32, #tpu.memory_space<vmem>>, %arg4: memref<1x128xf32, #tpu.memory_space<vmem>>, %arg5: memref<1x128xf32, #tpu.memory_space<vmem>>) attributes {dimension_semantics = [#tpu.dimension_semantics<arbitrary>], iteration_bounds = array<i64: 1>, scalar_prefetch = 0 : i64, scratch_operands = 0 : i64, tpu.core_type = #tpu.core_type<tc>, window_params = [{transform_indices = @transform_0, window_bounds = array<i64: 32, 512>}, {pipeline_mode = #tpu.pipeline_mode<synchronous>, transform_indices = @transform_1, window_bounds = array<i64: 512, 128>}, {transform_indices = @transform_2, window_bounds = array<i64: 32, 128>}, {pipeline_mode = #tpu.pipeline_mode<synchronous>, transform_indices = @transform_3, window_bounds = array<i64: 1, 128>}, {pipeline_mode = #tpu.pipeline_mode<synchronous>, transform_indices = @transform_4, window_bounds = array<i64: 1, 128>}]} {
    %c0 = arith.constant 0 : index
    %c0_0 = arith.constant 0 : index
    %0 = vector.load %arg1[%c0, %c0_0] : memref<32x512xbf16, #tpu.memory_space<vmem>>, vector<32x512xbf16>
    %c0_1 = arith.constant 0 : index
    %c0_2 = arith.constant 0 : index
    %1 = vector.load %arg2[%c0_1, %c0_2] : memref<512x128xbf16, #tpu.memory_space<vmem>>, vector<512x128xbf16>
    %cst = arith.constant dense<0.000000e+00> : vector<32x128xf32>
    %2 = tpu.matmul %0, %1, %cst {dimension_numbers = #tpu.dot_dimension_numbers<[1], [0], [0], [1], [0, 0, 1, 1], [], []>} : vector<32x512xbf16>, vector<512x128xbf16>, vector<32x128xf32> -> vector<32x128xf32>
    %c0_3 = arith.constant 0 : index
    %c0_4 = arith.constant 0 : index
    %3 = vector.load %arg3[%c0_3, %c0_4] : memref<32x128xf32, #tpu.memory_space<vmem>>, vector<32x128xf32>
    tpu.vector_store %arg3[%c0_3, %c0_4], %2 {strides = array<i32>} : memref<32x128xf32, #tpu.memory_space<vmem>>, vector<32x128xf32>,
    %c0_i32 = arith.constant 0 : i32
    %4 = arith.cmpi eq, %arg0, %c0_i32 : i32
    %5 = arith.extui %4 : i1 to i32
    %c0_i32_5 = arith.constant 0 : i32
    %6 = arith.cmpi ne, %5, %c0_i32_5 : i32
    scf.if %6 {
      %cst_16 = arith.constant 0.000000e+00 : f32
      %18 = vector.broadcast %cst_16 : f32 to vector<1x128xf32>
      %c0_17 = arith.constant 0 : index
      %c0_18 = arith.constant 0 : index
      %19 = vector.load %arg4[%c0_17, %c0_18] : memref<1x128xf32, #tpu.memory_space<vmem>>, vector<1x128xf32>
      tpu.vector_store %arg4[%c0_17, %c0_18], %18 {strides = array<i32>} : memref<1x128xf32, #tpu.memory_space<vmem>>, vector<1x128xf32>,
      %cst_19 = arith.constant 0.000000e+00 : f32
      %20 = vector.broadcast %cst_19 : f32 to vector<1x128xf32>
      %c0_20 = arith.constant 0 : index
      %c0_21 = arith.constant 0 : index
      %21 = vector.load %arg5[%c0_20, %c0_21] : memref<1x128xf32, #tpu.memory_space<vmem>>, vector<1x128xf32>
      tpu.vector_store %arg5[%c0_20, %c0_21], %20 {strides = array<i32>} : memref<1x128xf32, #tpu.memory_space<vmem>>, vector<1x128xf32>,
    } else {
    }
    %c0_6 = arith.constant 0 : index
    %c0_7 = arith.constant 0 : index
    %7 = vector.load %arg4[%c0_6, %c0_7] : memref<1x128xf32, #tpu.memory_space<vmem>>, vector<1x128xf32>
    %cst_8 = arith.constant dense<0.000000e+00> : vector<128xf32>
    %8 = vector.multi_reduction <add>, %2, %cst_8 [0] : vector<32x128xf32> to vector<128xf32>
    %9 = vector.shape_cast %8 : vector<128xf32> to vector<1x128xf32>
    %10 = arith.addf %7, %9 : vector<1x128xf32>
    %c0_9 = arith.constant 0 : index
    %c0_10 = arith.constant 0 : index
    %11 = vector.load %arg4[%c0_9, %c0_10] : memref<1x128xf32, #tpu.memory_space<vmem>>, vector<1x128xf32>
    tpu.vector_store %arg4[%c0_9, %c0_10], %10 {strides = array<i32>} : memref<1x128xf32, #tpu.memory_space<vmem>>, vector<1x128xf32>,
    %c0_11 = arith.constant 0 : index
    %c0_12 = arith.constant 0 : index
    %12 = vector.load %arg5[%c0_11, %c0_12] : memref<1x128xf32, #tpu.memory_space<vmem>>, vector<1x128xf32>
    %13 = arith.mulf %2, %2 : vector<32x128xf32>
    %cst_13 = arith.constant dense<0.000000e+00> : vector<128xf32>
    %14 = vector.multi_reduction <add>, %13, %cst_13 [0] : vector<32x128xf32> to vector<128xf32>
    %15 = vector.shape_cast %14 : vector<128xf32> to vector<1x128xf32>
    %16 = arith.addf %12, %15 : vector<1x128xf32>
    %c0_14 = arith.constant 0 : index
    %c0_15 = arith.constant 0 : index
    %17 = vector.load %arg5[%c0_14, %c0_15] : memref<1x128xf32, #tpu.memory_space<vmem>>, vector<1x128xf32>
    tpu.vector_store %arg5[%c0_14, %c0_15], %16 {strides = array<i32>} : memref<1x128xf32, #tpu.memory_space<vmem>>, vector<1x128xf32>,
    return
  }
  func.func @transform_0(%arg0: i32) -> (i32, i32) {
    %c0_i32 = arith.constant 0 : i32
    %c0_i32_0 = arith.constant 0 : i32
    return %arg0, %c0_i32 : i32, i32
  }
  func.func @transform_1(%arg0: i32) -> (i32, i32) {
    %c0_i32 = arith.constant 0 : i32
    %c0_i32_0 = arith.constant 0 : i32
    %c0_i32_1 = arith.constant 0 : i32
    return %c0_i32, %c0_i32_0 : i32, i32
  }
  func.func @transform_2(%arg0: i32) -> (i32, i32) {
    %c0_i32 = arith.constant 0 : i32
    %c0_i32_0 = arith.constant 0 : i32
    return %arg0, %c0_i32 : i32, i32
  }
  func.func @transform_3(%arg0: i32) -> (i32, i32) {
    %c0_i32 = arith.constant 0 : i32
    %c0_i32_0 = arith.constant 0 : i32
    %c0_i32_1 = arith.constant 0 : i32
    return %c0_i32, %c0_i32_0 : i32, i32
  }
  func.func @transform_4(%arg0: i32) -> (i32, i32) {
    %c0_i32 = arith.constant 0 : i32
    %c0_i32_0 = arith.constant 0 : i32
    %c0_i32_1 = arith.constant 0 : i32
    return %c0_i32, %c0_i32_0 : i32, i32
  }
}

module attributes {stable_mosaic.version = 11 : i64} {
  func.func @_bn_act_kernel(%arg0: i32, %arg1: memref<32x128xf32, #tpu.memory_space<vmem>>, %arg2: memref<1x128xf32, #tpu.memory_space<vmem>>, %arg3: memref<1x128xf32, #tpu.memory_space<vmem>>, %arg4: memref<32x128xbf16, #tpu.memory_space<vmem>>) attributes {dimension_semantics = [#tpu.dimension_semantics<parallel>], iteration_bounds = array<i64: 1>, scalar_prefetch = 0 : i64, scratch_operands = 0 : i64, tpu.core_type = #tpu.core_type<tc>, window_params = [{transform_indices = @transform_0, window_bounds = array<i64: 32, 128>}, {pipeline_mode = #tpu.pipeline_mode<synchronous>, transform_indices = @transform_1, window_bounds = array<i64: 1, 128>}, {pipeline_mode = #tpu.pipeline_mode<synchronous>, transform_indices = @transform_2, window_bounds = array<i64: 1, 128>}, {transform_indices = @transform_3, window_bounds = array<i64: 32, 128>}]} {
    %c0 = arith.constant 0 : index
    %c0_0 = arith.constant 0 : index
    %0 = vector.load %arg1[%c0, %c0_0] : memref<32x128xf32, #tpu.memory_space<vmem>>, vector<32x128xf32>
    %c0_1 = arith.constant 0 : index
    %c0_2 = arith.constant 0 : index
    %1 = vector.load %arg2[%c0_1, %c0_2] : memref<1x128xf32, #tpu.memory_space<vmem>>, vector<1x128xf32>
    %2 = vector.broadcast %1 : vector<1x128xf32> to vector<32x128xf32>
    %3 = arith.mulf %0, %2 : vector<32x128xf32>
    %c0_3 = arith.constant 0 : index
    %c0_4 = arith.constant 0 : index
    %4 = vector.load %arg3[%c0_3, %c0_4] : memref<1x128xf32, #tpu.memory_space<vmem>>, vector<1x128xf32>
    %5 = vector.broadcast %4 : vector<1x128xf32> to vector<32x128xf32>
    %6 = arith.addf %3, %5 : vector<32x128xf32>
    %cst = arith.constant 0.000000e+00 : f32
    %7 = vector.broadcast %cst : f32 to vector<32x128xf32>
    %8 = arith.cmpf ogt, %6, %7 : vector<32x128xf32>
    %cst_5 = arith.constant 2.000000e-01 : f32
    %9 = vector.broadcast %cst_5 : f32 to vector<32x128xf32>
    %10 = arith.mulf %9, %6 : vector<32x128xf32>
    %11 = arith.select %8, %6, %10 : vector<32x128xi1>, vector<32x128xf32>
    %12 = arith.truncf %11 : vector<32x128xf32> to vector<32x128xbf16>
    %c0_6 = arith.constant 0 : index
    %c0_7 = arith.constant 0 : index
    %13 = vector.load %arg4[%c0_6, %c0_7] : memref<32x128xbf16, #tpu.memory_space<vmem>>, vector<32x128xbf16>
    tpu.vector_store %arg4[%c0_6, %c0_7], %12 {strides = array<i32>} : memref<32x128xbf16, #tpu.memory_space<vmem>>, vector<32x128xbf16>,
    return
  }
  func.func @transform_0(%arg0: i32) -> (i32, i32) {
    %c0_i32 = arith.constant 0 : i32
    %c0_i32_0 = arith.constant 0 : i32
    return %arg0, %c0_i32 : i32, i32
  }
  func.func @transform_1(%arg0: i32) -> (i32, i32) {
    %c0_i32 = arith.constant 0 : i32
    %c0_i32_0 = arith.constant 0 : i32
    %c0_i32_1 = arith.constant 0 : i32
    return %c0_i32, %c0_i32_0 : i32, i32
  }
  func.func @transform_2(%arg0: i32) -> (i32, i32) {
    %c0_i32 = arith.constant 0 : i32
    %c0_i32_0 = arith.constant 0 : i32
    %c0_i32_1 = arith.constant 0 : i32
    return %c0_i32, %c0_i32_0 : i32, i32
  }
  func.func @transform_3(%arg0: i32) -> (i32, i32) {
    %c0_i32 = arith.constant 0 : i32
    %c0_i32_0 = arith.constant 0 : i32
    return %arg0, %c0_i32 : i32, i32
  }
}

module attributes {stable_mosaic.version = 11 : i64} {
  func.func @_matmul_act_kernel(%arg0: i32, %arg1: memref<8x1024xbf16, #tpu.memory_space<vmem>>, %arg2: memref<1024x128xbf16, #tpu.memory_space<vmem>>, %arg3: memref<8x128xf32, #tpu.memory_space<vmem>>) attributes {dimension_semantics = [#tpu.dimension_semantics<parallel>], iteration_bounds = array<i64: 1>, scalar_prefetch = 0 : i64, scratch_operands = 0 : i64, tpu.core_type = #tpu.core_type<tc>, window_params = [{transform_indices = @transform_0, window_bounds = array<i64: 8, 1024>}, {pipeline_mode = #tpu.pipeline_mode<synchronous>, transform_indices = @transform_1, window_bounds = array<i64: 1024, 128>}, {transform_indices = @transform_2, window_bounds = array<i64: 8, 128>}]} {
    %c0 = arith.constant 0 : index
    %c0_0 = arith.constant 0 : index
    %0 = vector.load %arg1[%c0, %c0_0] : memref<8x1024xbf16, #tpu.memory_space<vmem>>, vector<8x1024xbf16>
    %c0_1 = arith.constant 0 : index
    %c0_2 = arith.constant 0 : index
    %1 = vector.load %arg2[%c0_1, %c0_2] : memref<1024x128xbf16, #tpu.memory_space<vmem>>, vector<1024x128xbf16>
    %cst = arith.constant dense<0.000000e+00> : vector<8x128xf32>
    %2 = tpu.matmul %0, %1, %cst {dimension_numbers = #tpu.dot_dimension_numbers<[1], [0], [0], [1], [0, 0, 1, 1], [], []>} : vector<8x1024xbf16>, vector<1024x128xbf16>, vector<8x128xf32> -> vector<8x128xf32>
    %3 = math.absf %2 : vector<8x128xf32>
    %cst_3 = arith.constant 0.000000e+00 : f32
    %4 = vector.broadcast %cst_3 : f32 to vector<8x128xf32>
    %5 = arith.subf %4, %3 : vector<8x128xf32>
    %6 = math.exp %5 : vector<8x128xf32>
    %cst_4 = arith.constant 1.000000e+00 : f32
    %7 = vector.broadcast %cst_4 : f32 to vector<8x128xf32>
    %8 = arith.addf %7, %6 : vector<8x128xf32>
    %9 = tpu.reciprocal %8 {approx = true} : vector<8x128xf32> -> vector<8x128xf32>
    %cst_5 = arith.constant 0.000000e+00 : f32
    %10 = vector.broadcast %cst_5 : f32 to vector<8x128xf32>
    %11 = arith.cmpf oge, %2, %10 : vector<8x128xf32>
    %cst_6 = arith.constant 1.000000e+00 : f32
    %12 = vector.broadcast %cst_6 : f32 to vector<8x128xf32>
    %13 = arith.subf %12, %9 : vector<8x128xf32>
    %14 = arith.select %11, %9, %13 : vector<8x128xi1>, vector<8x128xf32>
    %cst_7 = arith.constant 0.000000e+00 : f32
    %cst_8 = arith.constant 1.000000e+00 : f32
    %15 = vector.broadcast %cst_7 : f32 to vector<8x128xf32>
    %16 = arith.maximumf %15, %14 : vector<8x128xf32>
    %17 = vector.broadcast %cst_8 : f32 to vector<8x128xf32>
    %18 = arith.minimumf %17, %16 : vector<8x128xf32>
    %c0_9 = arith.constant 0 : index
    %c0_10 = arith.constant 0 : index
    %19 = vector.load %arg3[%c0_9, %c0_10] : memref<8x128xf32, #tpu.memory_space<vmem>>, vector<8x128xf32>
    tpu.vector_store %arg3[%c0_9, %c0_10], %18 {strides = array<i32>} : memref<8x128xf32, #tpu.memory_space<vmem>>, vector<8x128xf32>,
    return
  }
  func.func @transform_0(%arg0: i32) -> (i32, i32) {
    %c0_i32 = arith.constant 0 : i32
    %c0_i32_0 = arith.constant 0 : i32
    return %arg0, %c0_i32 : i32, i32
  }
  func.func @transform_1(%arg0: i32) -> (i32, i32) {
    %c0_i32 = arith.constant 0 : i32
    %c0_i32_0 = arith.constant 0 : i32
    %c0_i32_1 = arith.constant 0 : i32
    return %c0_i32, %c0_i32_0 : i32, i32
  }
  func.func @transform_2(%arg0: i32) -> (i32, i32) {
    %c0_i32 = arith.constant 0 : i32
    %c0_i32_0 = arith.constant 0 : i32
    return %arg0, %c0_i32 : i32, i32
  }
}

</mosaic_0001>

<bundles_post_ra>
// kernel: discriminator_forward.8
= control target key start
LH: loop header
LB: loop body
LE: loop exit
PB: predicated region body
PF: predicated region fallthrough
CT: control target
= control target key end

     0   :  { %s1924_s9 = smov 0   ;;  %s2064_s0 = inlined_call_operand.vmem [shape: bf16[2048,48], index: 0, kind: input, shape index: {}]   ;;  %s2065_s1 = inlined_call_operand.vmem [shape: bf16[48,128], index: 1, kind: input, shape index: {}]   ;;  %s2066_s2 = inlined_call_operand.vmem [shape: bf16[2048,128], index: 2, kind: output, shape index: {}]  }
   0x1 LB: > { %s1350_s10 = sadd.s32 4294967295, %s1907_s9   ;;  %p1354_p0 = scmp.ge.s32.totalorder %s1907_s9, 1  ;;  %s1907_s9 = sphi %s1924_s9, %s12_s9  }
   0x2   : > { %p113_p1 = scmp.lt.s32.totalorder %s1907_s9, 5 }
   0x4   : > { %p114_p2 = pnand %p1354_p0, %p113_p1 }
   0x5   : > { %v1866_v0 = vld [vmem:[%s2065_s1] sm:$0xff] (!%p114_p2)   ;;  %s1355_s13 = sshll.u32 (!%p114_p2), %s1350_s10, 6  ;;  %v1867_v1 = vld [vmem:[%s2065_s1 + $0x8] sm:$0xff] (!%p114_p2)   ;;  %v1868_v2 = vld [vmem:[%s2065_s1 + $0x10] sm:$0xff] (!%p114_p2)   ;;  %vm396_vm0 = vcmask (!%p114_p2), 392192  }
   0x6   : > { %117 = sbr.rel (%p114_p2) target bundleno = 297 (0x129), region = 28  ;;  %p136_p3 = scmp.lt.s32.totalorder (!%p114_p2), %s1355_s13, 255  ;;  %1782 = vmatprep.subr.bf16.mxu0 (!%p114_p2), %v1866_v0  ;;  %1852 = vmatprep.subr.bf16.mxu1 (!%p114_p2), %v1866_v0 }
   0x7   : > { %1783 = vmatpush3.bf16.msra.mxu0 (!%p114_p2), %v1866_v0  ;;  %1855 = vmatpush3.bf16.msra.mxu1 (!%p114_p2), %v1866_v0 }
   0x8   : > { %1784 = vmatprep.subr.bf16.mxu0 (!%p114_p2), %v1867_v1  ;;  %1853 = vmatprep.subr.bf16.mxu1 (!%p114_p2), %v1867_v1 }
   0xb   : > { %1785 = vmatpush3.bf16.msra.mxu0 (!%p114_p2), %v1867_v1  ;;  %1856 = vmatpush3.bf16.msra.mxu1 (!%p114_p2), %v1867_v1 }
   0xc   : > { %1786 = vmatprep.subr.bf16.mxu0 (!%p114_p2), %v1868_v2  ;;  %1854 = vmatprep.subr.bf16.mxu1 (!%p114_p2), %v1868_v2 }
   0xd   : > { %s2068_s13 = smov (!%p136_p3, %s1355_s13), 255 }
   0xe   : > { %s1356_s18 = sshll.u32 %s2068_s13, 2 }
   0xf   : > { %s1949_s21 = scalar_lea.vmem %s2064_s0, %s1356_s18  ;;  %1787 = vmatpush3.bf16.msra.mxu0 %v1868_v2  ;;  %1857 = vmatpush3.bf16.msra.mxu1 %v1868_v2  ;;  %s2020_s24 = scalar_lea.vmem %s2066_s2, %s1356_s18 }
  0x10   : > { %v1869_v3 = vld [vmem:[%s1949_s21] sm:$0xff]   ;;  %v1871_v5 = vld [vmem:[%s1949_s21 + $0x8] sm:$0xff]   ;;  %v1873_v7 = vld [vmem:[%s1949_s21 + $0x10] sm:$0xff]  }
  0x11   : > { %v1870_v4 = vld [vmem:[%s1949_s21 + $0x80] sm:$0xff]   ;;  %1788 = vmatprep.mubr.msk.bf16.mxu0 %vm396_vm0, %v1869_v3  ;;  %v1872_v6 = vld [vmem:[%s1949_s21 + $0x88] sm:$0xff]   ;;  %v1874_v8 = vld [vmem:[%s1949_s21 + $0x90] sm:$0xff]  }
  0x12   : > { %1820 = vmatprep.mubr.msk.bf16.mxu1 %vm396_vm0, %v1870_v4  ;;  %1789 = vmatmul.mubr.msk.bf16.vlgmr.msra.gmra.mrb[0].mxu0 %vm396_vm0, %v1871_v5  ;;  %v1875_v9 = vld [vmem:[%s1949_s21 + $0x18] sm:$0xff]   ;;  %v1877_v11 = vld [vmem:[%s1949_s21 + $0x20] sm:$0xff]   ;;  %v1879_v13 = vld [vmem:[%s1949_s21 + $0x28] sm:$0xff]  }
  0x13   : > { %1821 = vmatmul.mubr.msk.bf16.vlgmr.msra.gmra.mrb[0].mxu1 %vm396_vm0, %v1872_v6  ;;  %1792 = vmatprep.mubr.msk.bf16.mxu0 %vm396_vm0, %v1873_v7  ;;  %v1876_v10 = vld [vmem:[%s1949_s21 + $0x98] sm:$0xff]   ;;  %v1878_v12 = vld [vmem:[%s1949_s21 + $0xa0] sm:$0xff]   ;;  %v1880_v14 = vld [vmem:[%s1949_s21 + $0xa8] sm:$0xff]  }
  0x14   : > { %1824 = vmatprep.mubr.msk.bf16.mxu1 %vm396_vm0, %v1874_v8  ;;  %v1881_v15 = vld [vmem:[%s1949_s21 + $0x30] sm:$0xff]   ;;  %v1883_v17 = vld [vmem:[%s1949_s21 + $0x38] sm:$0xff]   ;;  %v1885_v19 = vld [vmem:[%s1949_s21 + $0x40] sm:$0xff]  }
  0x15   : > { %v1882_v16 = vld [vmem:[%s1949_s21 + $0xb0] sm:$0xff]   ;;  %v1884_v18 = vld [vmem:[%s1949_s21 + $0xb8] sm:$0xff]   ;;  %v1886_v20 = vld [vmem:[%s1949_s21 + $0xc0] sm:$0xff]  }
  0x16   : > { %v1887_v21 = vld [vmem:[%s1949_s21 + $0x48] sm:$0xff]   ;;  %v1889_v23 = vld [vmem:[%s1949_s21 + $0x50] sm:$0xff]   ;;  %v1891_v25 = vld [vmem:[%s1949_s21 + $0x58] sm:$0xff]  }
  0x17   : > { %v1888_v22 = vld [vmem:[%s1949_s21 + $0xc8] sm:$0xff]   ;;  %v1890_v24 = vld [vmem:[%s1949_s21 + $0xd0] sm:$0xff]   ;;  %v1892_v26 = vld [vmem:[%s1949_s21 + $0xd8] sm:$0xff]  }
  0x18   : > { %v1893_v27 = vld [vmem:[%s1949_s21 + $0x60] sm:$0xff]   ;;  %v1895_v29 = vld [vmem:[%s1949_s21 + $0x68] sm:$0xff]   ;;  %v1897_v31 = vld [vmem:[%s1949_s21 + $0x70] sm:$0xff]  }
  0x19   : > { %v1894_v28 = vld [vmem:[%s1949_s21 + $0xe0] sm:$0xff]   ;;  %v1896_v30 = vld [vmem:[%s1949_s21 + $0xe8] sm:$0xff]   ;;  %v1898_v32 = vld [vmem:[%s1949_s21 + $0xf0] sm:$0xff]  }
  0x1a   : > { %1793 = vmatmul.mubr.msk.bf16.gmra.mrb[4].mxu0 %vm396_vm0, %v1875_v9  ;;  %v1899_v33 = vld [vmem:[%s1949_s21 + $0x78] sm:$0xff]  }
  0x1b   : > { %1825 = vmatmul.mubr.msk.bf16.gmra.mrb[4].mxu1 %vm396_vm0, %v1876_v10  ;;  %1796 = vmatprep.mubr.msk.bf16.mxu0 %vm396_vm0, %v1877_v11  ;;  %v1900_v34 = vld [vmem:[%s1949_s21 + $0xf8] sm:$0xff]  }
  0x1c   : > { %1828 = vmatprep.mubr.msk.bf16.mxu1 %vm396_vm0, %v1878_v12 }
  0x22   : > { %1797 = vmatmul.mubr.msk.bf16.gmra.mrb[8].mxu0 %vm396_vm0, %v1879_v13 }
  0x23   : > { %1829 = vmatmul.mubr.msk.bf16.gmra.mrb[8].mxu1 %vm396_vm0, %v1880_v14  ;;  %1800 = vmatprep.mubr.msk.bf16.mxu0 %vm396_vm0, %v1881_v15 }
  0x24   : > { %1832 = vmatprep.mubr.msk.bf16.mxu1 %vm396_vm0, %v1882_v16 }
  0x2a   : > { %1801 = vmatmul.mubr.msk.bf16.gmra.mrb[12].mxu0 %vm396_vm0, %v1883_v17 }
  0x2b   : > { %1833 = vmatmul.mubr.msk.bf16.gmra.mrb[12].mxu1 %vm396_vm0, %v1884_v18  ;;  %1804 = vmatprep.mubr.msk.bf16.mxu0 %vm396_vm0, %v1885_v19 }
  0x2c   : > { %1836 = vmatprep.mubr.msk.bf16.mxu1 %vm396_vm0, %v1886_v20 }
  0x32   : > { %1805 = vmatmul.mubr.msk.bf16.gmra.mrb[16].mxu0 %vm396_vm0, %v1887_v21 }
  0x33   : > { %1837 = vmatmul.mubr.msk.bf16.gmra.mrb[16].mxu1 %vm396_vm0, %v1888_v22  ;;  %1808 = vmatprep.mubr.msk.bf16.mxu0 %vm396_vm0, %v1889_v23 }
  0x34   : > { %1840 = vmatprep.mubr.msk.bf16.mxu1 %vm396_vm0, %v1890_v24 }
  0x3a   : > { %1809 = vmatmul.mubr.msk.bf16.gmra.mrb[20].mxu0 %vm396_vm0, %v1891_v25 }
  0x3b   : > { %1841 = vmatmul.mubr.msk.bf16.gmra.mrb[20].mxu1 %vm396_vm0, %v1892_v26  ;;  %1812 = vmatprep.mubr.msk.bf16.mxu0 %vm396_vm0, %v1893_v27 }
  0x3c   : > { %1844 = vmatprep.mubr.msk.bf16.mxu1 %vm396_vm0, %v1894_v28 }
  0x42   : > { %1813 = vmatmul.mubr.msk.bf16.gmra.mrb[24].mxu0 %vm396_vm0, %v1895_v29 }
  0x43   : > { %1845 = vmatmul.mubr.msk.bf16.gmra.mrb[24].mxu1 %vm396_vm0, %v1896_v30  ;;  %1816 = vmatprep.mubr.msk.bf16.mxu0 %vm396_vm0, %v1897_v31 }
  0x44   : > { %1848 = vmatprep.mubr.msk.bf16.mxu1 %vm396_vm0, %v1898_v32 }
  0x4a   : > { %1817 = vmatmul.mubr.msk.bf16.gmra.mrb[28].mxu0 %vm396_vm0, %v1899_v33 }
  0x4b   : > { %1849 = vmatmul.mubr.msk.bf16.gmra.mrb[28].mxu1 %vm396_vm0, %v1900_v34 }
  0xe5   : > { %v1790_v35 = vpop.f32.mrb[0].mxu0 }
  0xe6   : > { %v1822_v36 = vpop.f32.mrb[0].mxu1  ;;  %vm784_vm1 = vcmp.gt.f32.partialorder %v1790_v35, 0.0  ;;  %v848_v37 = vmul.f32 0.2, %v1790_v35  ;;  %v527_v39 = vpop.f32.mrb[1].mxu0 }
  0xe7   : > { %v880_v38 = vmul.f32 0.2, %v1822_v36  ;;  %vm816_vm2 = vcmp.gt.f32.partialorder %v1822_v36, 0.0  ;;  %v655_v40 = vpop.f32.mrb[1].mxu1  ;;  %v846_v41 = vmul.f32 0.2, %v527_v39 }
  0xe8   : > { %v1791_v42 = vpop.f32.mrb[2].mxu0  ;;  %v1823_v43 = vpop.f32.mrb[2].mxu1  ;;  %v912_v44 = vsel %vm784_vm1, %v1790_v35, %v848_v37  ;;  %v878_v45 = vmul.f32 0.2, %v655_v40  ;;  %vm782_vm4 = vcmp.gt.f32.partialorder %v527_v39, 0.0  ;;  %vm814_vm6 = vcmp.gt.f32.partialorder %v655_v40, 0.0 }
  0xe9   : > { %vm785_vm3 = vcmp.gt.f32.partialorder %v1791_v42, 0.0  ;;  %v849_v46 = vmul.f32 0.2, %v1791_v42  ;;  %v944_v47 = vsel %vm816_vm2, %v1822_v36, %v880_v38  ;;  %vm817_vm5 = vcmp.gt.f32.partialorder %v1823_v43, 0.0  ;;  %v530_v49 = vpop.f32.mrb[3].mxu0  ;;  %v658_v50 = vpop.f32.mrb[3].mxu1 }
  0xea   : > { %v881_v48 = vmul.f32 0.2, %v1823_v43  ;;  %vm783_vm7 = vcmp.gt.f32.partialorder %v530_v49, 0.0  ;;  %v847_v52 = vmul.f32 0.2, %v530_v49  ;;  %vm815_vm8 = vcmp.gt.f32.partialorder %v658_v50, 0.0 }
  0xeb   : > { %v913_v51 = vsel %vm785_vm3, %v1791_v42, %v849_v46  ;;  %v879_v55 = vmul.f32 0.2, %v658_v50  ;;  %v910_v56 = vsel %vm782_vm4, %v527_v39, %v846_v41  ;;  %v942_v61 = vsel %vm814_vm6, %v655_v40, %v878_v45 }
  0xec   : > { %v1564_v53 = vpack.c.bf16 %v913_v51, %v912_v44  ;;  %v945_v54 = vsel %vm817_vm5, %v1823_v43, %v881_v48  ;;  %v911_v58 = vsel %vm783_vm7, %v530_v49, %v847_v52 }
  0xed   : > { %v1644_v57 = vpack.c.bf16 %v945_v54, %v944_v47  ;;  %v1794_v59 = vpop.f32.mrb[4].mxu0  ;;  %v1559_v62 = vpack.c.bf16 %v911_v58, %v910_v56  ;;  %v943_v63 = vsel %vm815_vm8, %v658_v50, %v879_v55 }
  0xee   : > { %v1826_v60 = vpop.f32.mrb[4].mxu1  ;;  %1716 = vst [vmem:[%s2020_s24 + $0x8] sm:$0xff] %v1564_v53   ;;  %v852_v0 = vmul.f32 0.2, %v1794_v59  ;;  %v543_v1 = vpop.f32.mrb[5].mxu0  ;;  %v1639_v3 = vpack.c.bf16 %v943_v63, %v942_v61  ;;  %vm788_vm9 = vcmp.gt.f32.partialorder %v1794_v59, 0.0 }
  0xef   : > { %v671_v2 = vpop.f32.mrb[5].mxu1  ;;  %1732 = vst [vmem:[%s2020_s24 + $0x88] sm:$0xff] %v1644_v57   ;;  %v884_v4 = vmul.f32 0.2, %v1826_v60  ;;  %v1795_v5 = vpop.f32.mrb[6].mxu0  ;;  %1560 = vst [vmem:[%s2020_s24] sm:$0xff] %v1559_v62   ;;  %vm820_vm10 = vcmp.gt.f32.partialorder %v1826_v60, 0.0 }
  0xf0   : > { %v1827_v6 = vpop.f32.mrb[6].mxu1  ;;  %v850_v7 = vmul.f32 0.2, %v543_v1  ;;  %v882_v8 = vmul.f32 0.2, %v671_v2  ;;  %v546_v9 = vpop.f32.mrb[7].mxu0  ;;  %v916_v12 = vsel %vm788_vm9, %v1794_v59, %v852_v0 }
  0xf1   : > { %1731 = vst [vmem:[%s2020_s24 + $0x80] sm:$0xff] %v1639_v3   ;;  %vm786_vm11 = vcmp.gt.f32.partialorder %v543_v1, 0.0  ;;  %vm789_vm12 = vcmp.gt.f32.partialorder %v1795_v5, 0.0  ;;  %v853_v10 = vmul.f32 0.2, %v1795_v5  ;;  %vm821_vm13 = vcmp.gt.f32.partialorder %v1827_v6, 0.0 }
  0xf2   : > { %v674_v11 = vpop.f32.mrb[7].mxu1  ;;  %vm818_vm14 = vcmp.gt.f32.partialorder %v671_v2, 0.0  ;;  %v885_v13 = vmul.f32 0.2, %v1827_v6  ;;  %vm787_vm15 = vcmp.gt.f32.partialorder %v546_v9, 0.0  ;;  %v948_v17 = vsel %vm820_vm10, %v1826_v60, %v884_v4 }
  0xf3   : > { %v917_v14 = vsel %vm789_vm12, %v1795_v5, %v853_v10  ;;  %v851_v15 = vmul.f32 0.2, %v546_v9  ;;  %vm819_vm0 = vcmp.gt.f32.partialorder %v674_v11, 0.0  ;;  %v883_v16 = vmul.f32 0.2, %v674_v11 }
  0xf4   : > { %v914_v18 = vsel %vm786_vm11, %v543_v1, %v850_v7  ;;  %v1574_v19 = vpack.c.bf16 %v917_v14, %v916_v12  ;;  %v949_v20 = vsel %vm821_vm13, %v1827_v6, %v885_v13  ;;  %v946_v21 = vsel %vm818_vm14, %v671_v2, %v882_v8 }
  0xf5   : > { %v1654_v22 = vpack.c.bf16 %v949_v20, %v948_v17  ;;  %v915_v23 = vsel %vm787_vm15, %v546_v9, %v851_v15  ;;  %v947_v24 = vsel %vm819_vm0, %v674_v11, %v883_v16  ;;  %v1798_v25 = vpop.f32.mrb[8].mxu0 }
  0xf6   : > { %v1830_v26 = vpop.f32.mrb[8].mxu1  ;;  %1718 = vst [vmem:[%s2020_s24 + $0x18] sm:$0xff] %v1574_v19   ;;  %v1569_v27 = vpack.c.bf16 %v915_v23, %v914_v18  ;;  %v1649_v28 = vpack.c.bf16 %v947_v24, %v946_v21  ;;  %vm792_vm1 = vcmp.gt.f32.partialorder %v1798_v25, 0.0  ;;  %v856_v29 = vmul.f32 0.2, %v1798_v25  ;;  %v559_v30 = vpop.f32.mrb[9].mxu0 }
  0xf7   : > { %v687_v31 = vpop.f32.mrb[9].mxu1  ;;  %1734 = vst [vmem:[%s2020_s24 + $0x98] sm:$0xff] %v1654_v22   ;;  %vm824_vm2 = vcmp.gt.f32.partialorder %v1830_v26, 0.0  ;;  %v888_v32 = vmul.f32 0.2, %v1830_v26  ;;  %v1799_v35 = vpop.f32.mrb[10].mxu0 }
  0xf8   : > { %1717 = vst [vmem:[%s2020_s24 + $0x10] sm:$0xff] %v1569_v27   ;;  %1733 = vst [vmem:[%s2020_s24 + $0x90] sm:$0xff] %v1649_v28   ;;  %v854_v33 = vmul.f32 0.2, %v559_v30  ;;  %v886_v34 = vmul.f32 0.2, %v687_v31  ;;  %v920_v37 = vsel %vm792_vm1, %v1798_v25, %v856_v29 }
  0xf9   : > { %v1831_v36 = vpop.f32.mrb[10].mxu1  ;;  %vm790_vm3 = vcmp.gt.f32.partialorder %v559_v30, 0.0  ;;  %vm793_vm4 = vcmp.gt.f32.partialorder %v1799_v35, 0.0  ;;  %v857_v38 = vmul.f32 0.2, %v1799_v35  ;;  %v562_v39 = vpop.f32.mrb[11].mxu0  ;;  %v952_v45 = vsel %vm824_vm2, %v1830_v26, %v888_v32 }
  0xfa   : > { %v690_v40 = vpop.f32.mrb[11].mxu1  ;;  %vm822_vm5 = vcmp.gt.f32.partialorder %v687_v31, 0.0  ;;  %vm825_vm6 = vcmp.gt.f32.partialorder %v1831_v36, 0.0  ;;  %v889_v41 = vmul.f32 0.2, %v1831_v36  ;;  %vm791_vm7 = vcmp.gt.f32.partialorder %v562_v39, 0.0 }
  0xfb   : > { %v921_v42 = vsel %vm793_vm4, %v1799_v35, %v857_v38  ;;  %v855_v43 = vmul.f32 0.2, %v562_v39  ;;  %vm823_vm8 = vcmp.gt.f32.partialorder %v690_v40, 0.0  ;;  %v887_v44 = vmul.f32 0.2, %v690_v40 }
  0xfc   : > { %v918_v46 = vsel %vm790_vm3, %v559_v30, %v854_v33  ;;  %v1584_v47 = vpack.c.bf16 %v921_v42, %v920_v37  ;;  %v953_v48 = vsel %vm825_vm6, %v1831_v36, %v889_v41  ;;  %v950_v49 = vsel %vm822_vm5, %v687_v31, %v886_v34 }
  0xfd   : > { %v1664_v50 = vpack.c.bf16 %v953_v48, %v952_v45  ;;  %v919_v51 = vsel %vm791_vm7, %v562_v39, %v855_v43  ;;  %v951_v52 = vsel %vm823_vm8, %v690_v40, %v887_v44  ;;  %v1802_v53 = vpop.f32.mrb[12].mxu0 }
  0xfe   : > { %v1834_v54 = vpop.f32.mrb[12].mxu1  ;;  %1720 = vst [vmem:[%s2020_s24 + $0x28] sm:$0xff] %v1584_v47   ;;  %v1579_v55 = vpack.c.bf16 %v919_v51, %v918_v46  ;;  %v1659_v56 = vpack.c.bf16 %v951_v52, %v950_v49  ;;  %vm796_vm9 = vcmp.gt.f32.partialorder %v1802_v53, 0.0  ;;  %v860_v57 = vmul.f32 0.2, %v1802_v53  ;;  %v575_v58 = vpop.f32.mrb[13].mxu0 }
  0xff   : > { %v703_v59 = vpop.f32.mrb[13].mxu1  ;;  %1736 = vst [vmem:[%s2020_s24 + $0xa8] sm:$0xff] %v1664_v50   ;;  %vm828_vm10 = vcmp.gt.f32.partialorder %v1834_v54, 0.0  ;;  %v892_v60 = vmul.f32 0.2, %v1834_v54  ;;  %v1803_v63 = vpop.f32.mrb[14].mxu0 }
 0x100   : > { %1719 = vst [vmem:[%s2020_s24 + $0x20] sm:$0xff] %v1579_v55   ;;  %1735 = vst [vmem:[%s2020_s24 + $0xa0] sm:$0xff] %v1659_v56   ;;  %v858_v61 = vmul.f32 0.2, %v575_v58  ;;  %v890_v62 = vmul.f32 0.2, %v703_v59  ;;  %v924_v1 = vsel %vm796_vm9, %v1802_v53, %v860_v57 }
 0x101   : > { %v1835_v0 = vpop.f32.mrb[14].mxu1  ;;  %vm794_vm11 = vcmp.gt.f32.partialorder %v575_v58, 0.0  ;;  %vm797_vm12 = vcmp.gt.f32.partialorder %v1803_v63, 0.0  ;;  %v861_v2 = vmul.f32 0.2, %v1803_v63  ;;  %v578_v3 = vpop.f32.mrb[15].mxu0  ;;  %v956_v9 = vsel %vm828_vm10, %v1834_v54, %v892_v60 }
 0x102   : > { %v706_v4 = vpop.f32.mrb[15].mxu1  ;;  %vm826_vm13 = vcmp.gt.f32.partialorder %v703_v59, 0.0  ;;  %vm829_vm14 = vcmp.gt.f32.partialorder %v1835_v0, 0.0  ;;  %v893_v5 = vmul.f32 0.2, %v1835_v0  ;;  %vm795_vm15 = vcmp.gt.f32.partialorder %v578_v3, 0.0 }
 0x103   : > { %v925_v6 = vsel %vm797_vm12, %v1803_v63, %v861_v2  ;;  %v859_v7 = vmul.f32 0.2, %v578_v3  ;;  %vm827_vm0 = vcmp.gt.f32.partialorder %v706_v4, 0.0  ;;  %v891_v8 = vmul.f32 0.2, %v706_v4 }
 0x104   : > { %v922_v10 = vsel %vm794_vm11, %v575_v58, %v858_v61  ;;  %v1594_v11 = vpack.c.bf16 %v925_v6, %v924_v1  ;;  %v957_v12 = vsel %vm829_vm14, %v1835_v0, %v893_v5  ;;  %v954_v13 = vsel %vm826_vm13, %v703_v59, %v890_v62 }
 0x105   : > { %v1674_v14 = vpack.c.bf16 %v957_v12, %v956_v9  ;;  %v923_v15 = vsel %vm795_vm15, %v578_v3, %v859_v7  ;;  %v955_v16 = vsel %vm827_vm0, %v706_v4, %v891_v8  ;;  %v1806_v17 = vpop.f32.mrb[16].mxu0 }
 0x106   : > { %v1838_v18 = vpop.f32.mrb[16].mxu1  ;;  %1722 = vst [vmem:[%s2020_s24 + $0x38] sm:$0xff] %v1594_v11   ;;  %v1589_v19 = vpack.c.bf16 %v923_v15, %v922_v10  ;;  %v1669_v20 = vpack.c.bf16 %v955_v16, %v954_v13  ;;  %vm800_vm1 = vcmp.gt.f32.partialorder %v1806_v17, 0.0  ;;  %v864_v21 = vmul.f32 0.2, %v1806_v17  ;;  %v591_v22 = vpop.f32.mrb[17].mxu0 }
 0x107   : > { %v719_v23 = vpop.f32.mrb[17].mxu1  ;;  %1738 = vst [vmem:[%s2020_s24 + $0xb8] sm:$0xff] %v1674_v14   ;;  %vm832_vm2 = vcmp.gt.f32.partialorder %v1838_v18, 0.0  ;;  %v896_v24 = vmul.f32 0.2, %v1838_v18  ;;  %v1807_v27 = vpop.f32.mrb[18].mxu0 }
 0x108   : > { %1721 = vst [vmem:[%s2020_s24 + $0x30] sm:$0xff] %v1589_v19   ;;  %1737 = vst [vmem:[%s2020_s24 + $0xb0] sm:$0xff] %v1669_v20   ;;  %v862_v25 = vmul.f32 0.2, %v591_v22  ;;  %v894_v26 = vmul.f32 0.2, %v719_v23  ;;  %v928_v29 = vsel %vm800_vm1, %v1806_v17, %v864_v21 }
 0x109   : > { %v1839_v28 = vpop.f32.mrb[18].mxu1  ;;  %vm798_vm3 = vcmp.gt.f32.partialorder %v591_v22, 0.0  ;;  %vm801_vm4 = vcmp.gt.f32.partialorder %v1807_v27, 0.0  ;;  %v865_v30 = vmul.f32 0.2, %v1807_v27  ;;  %v594_v31 = vpop.f32.mrb[19].mxu0  ;;  %v960_v37 = vsel %vm832_vm2, %v1838_v18, %v896_v24 }
 0x10a   : > { %v722_v32 = vpop.f32.mrb[19].mxu1  ;;  %vm830_vm5 = vcmp.gt.f32.partialorder %v719_v23, 0.0  ;;  %vm833_vm6 = vcmp.gt.f32.partialorder %v1839_v28, 0.0  ;;  %v897_v33 = vmul.f32 0.2, %v1839_v28  ;;  %vm799_vm7 = vcmp.gt.f32.partialorder %v594_v31, 0.0 }
 0x10b   : > { %v929_v34 = vsel %vm801_vm4, %v1807_v27, %v865_v30  ;;  %v863_v35 = vmul.f32 0.2, %v594_v31  ;;  %vm831_vm8 = vcmp.gt.f32.partialorder %v722_v32, 0.0  ;;  %v895_v36 = vmul.f32 0.2, %v722_v32 }
 0x10c   : > { %v926_v38 = vsel %vm798_vm3, %v591_v22, %v862_v25  ;;  %v1604_v39 = vpack.c.bf16 %v929_v34, %v928_v29  ;;  %v961_v40 = vsel %vm833_vm6, %v1839_v28, %v897_v33  ;;  %v958_v41 = vsel %vm830_vm5, %v719_v23, %v894_v26 }
 0x10d   : > { %v1684_v42 = vpack.c.bf16 %v961_v40, %v960_v37  ;;  %v927_v43 = vsel %vm799_vm7, %v594_v31, %v863_v35  ;;  %v959_v44 = vsel %vm831_vm8, %v722_v32, %v895_v36  ;;  %v1810_v45 = vpop.f32.mrb[20].mxu0 }
 0x10e   : > { %v1842_v46 = vpop.f32.mrb[20].mxu1  ;;  %1724 = vst [vmem:[%s2020_s24 + $0x48] sm:$0xff] %v1604_v39   ;;  %v1599_v47 = vpack.c.bf16 %v927_v43, %v926_v38  ;;  %v1679_v48 = vpack.c.bf16 %v959_v44, %v958_v41  ;;  %vm804_vm9 = vcmp.gt.f32.partialorder %v1810_v45, 0.0  ;;  %v868_v49 = vmul.f32 0.2, %v1810_v45  ;;  %v607_v50 = vpop.f32.mrb[21].mxu0 }
 0x10f   : > { %v735_v51 = vpop.f32.mrb[21].mxu1  ;;  %1740 = vst [vmem:[%s2020_s24 + $0xc8] sm:$0xff] %v1684_v42   ;;  %vm836_vm10 = vcmp.gt.f32.partialorder %v1842_v46, 0.0  ;;  %v900_v52 = vmul.f32 0.2, %v1842_v46  ;;  %v1811_v55 = vpop.f32.mrb[22].mxu0 }
 0x110   : > { %1723 = vst [vmem:[%s2020_s24 + $0x40] sm:$0xff] %v1599_v47   ;;  %1739 = vst [vmem:[%s2020_s24 + $0xc0] sm:$0xff] %v1679_v48   ;;  %v866_v53 = vmul.f32 0.2, %v607_v50  ;;  %v898_v54 = vmul.f32 0.2, %v735_v51  ;;  %v932_v57 = vsel %vm804_vm9, %v1810_v45, %v868_v49 }
 0x111   : > { %v1843_v56 = vpop.f32.mrb[22].mxu1  ;;  %vm802_vm11 = vcmp.gt.f32.partialorder %v607_v50, 0.0  ;;  %vm805_vm12 = vcmp.gt.f32.partialorder %v1811_v55, 0.0  ;;  %v869_v58 = vmul.f32 0.2, %v1811_v55  ;;  %v610_v59 = vpop.f32.mrb[23].mxu0  ;;  %v964_v1 = vsel %vm836_vm10, %v1842_v46, %v900_v52 }
 0x112   : > { %v738_v60 = vpop.f32.mrb[23].mxu1  ;;  %vm834_vm13 = vcmp.gt.f32.partialorder %v735_v51, 0.0  ;;  %vm837_vm14 = vcmp.gt.f32.partialorder %v1843_v56, 0.0  ;;  %v901_v61 = vmul.f32 0.2, %v1843_v56  ;;  %vm803_vm15 = vcmp.gt.f32.partialorder %v610_v59, 0.0 }
 0x113   : > { %v933_v62 = vsel %vm805_vm12, %v1811_v55, %v869_v58  ;;  %v867_v63 = vmul.f32 0.2, %v610_v59  ;;  %vm835_vm0 = vcmp.gt.f32.partialorder %v738_v60, 0.0  ;;  %v899_v0 = vmul.f32 0.2, %v738_v60 }
 0x114   : > { %v930_v2 = vsel %vm802_vm11, %v607_v50, %v866_v53  ;;  %v1614_v3 = vpack.c.bf16 %v933_v62, %v932_v57  ;;  %v965_v4 = vsel %vm837_vm14, %v1843_v56, %v901_v61  ;;  %v962_v5 = vsel %vm834_vm13, %v735_v51, %v898_v54 }
 0x115   : > { %v1694_v6 = vpack.c.bf16 %v965_v4, %v964_v1  ;;  %v931_v7 = vsel %vm803_vm15, %v610_v59, %v867_v63  ;;  %v963_v8 = vsel %vm835_vm0, %v738_v60, %v899_v0  ;;  %v1814_v9 = vpop.f32.mrb[24].mxu0 }
 0x116   : > { %v1846_v10 = vpop.f32.mrb[24].mxu1  ;;  %1726 = vst [vmem:[%s2020_s24 + $0x58] sm:$0xff] %v1614_v3   ;;  %v1609_v11 = vpack.c.bf16 %v931_v7, %v930_v2  ;;  %v1689_v12 = vpack.c.bf16 %v963_v8, %v962_v5  ;;  %vm808_vm1 = vcmp.gt.f32.partialorder %v1814_v9, 0.0  ;;  %v872_v13 = vmul.f32 0.2, %v1814_v9  ;;  %v623_v14 = vpop.f32.mrb[25].mxu0 }
 0x117   : > { %v751_v15 = vpop.f32.mrb[25].mxu1  ;;  %1742 = vst [vmem:[%s2020_s24 + $0xd8] sm:$0xff] %v1694_v6   ;;  %vm840_vm2 = vcmp.gt.f32.partialorder %v1846_v10, 0.0  ;;  %v904_v16 = vmul.f32 0.2, %v1846_v10  ;;  %v1815_v19 = vpop.f32.mrb[26].mxu0 }
 0x118   : > { %1725 = vst [vmem:[%s2020_s24 + $0x50] sm:$0xff] %v1609_v11   ;;  %1741 = vst [vmem:[%s2020_s24 + $0xd0] sm:$0xff] %v1689_v12   ;;  %v870_v17 = vmul.f32 0.2, %v623_v14  ;;  %v902_v18 = vmul.f32 0.2, %v751_v15  ;;  %v936_v21 = vsel %vm808_vm1, %v1814_v9, %v872_v13 }
 0x119   : > { %v1847_v20 = vpop.f32.mrb[26].mxu1  ;;  %vm806_vm3 = vcmp.gt.f32.partialorder %v623_v14, 0.0  ;;  %vm809_vm4 = vcmp.gt.f32.partialorder %v1815_v19, 0.0  ;;  %v873_v22 = vmul.f32 0.2, %v1815_v19  ;;  %v626_v23 = vpop.f32.mrb[27].mxu0  ;;  %v968_v29 = vsel %vm840_vm2, %v1846_v10, %v904_v16 }
 0x11a   : > { %v754_v24 = vpop.f32.mrb[27].mxu1  ;;  %vm838_vm5 = vcmp.gt.f32.partialorder %v751_v15, 0.0  ;;  %vm841_vm6 = vcmp.gt.f32.partialorder %v1847_v20, 0.0  ;;  %v905_v25 = vmul.f32 0.2, %v1847_v20  ;;  %vm807_vm7 = vcmp.gt.f32.partialorder %v626_v23, 0.0 }
 0x11b   : > { %v937_v26 = vsel %vm809_vm4, %v1815_v19, %v873_v22  ;;  %v871_v27 = vmul.f32 0.2, %v626_v23  ;;  %vm839_vm8 = vcmp.gt.f32.partialorder %v754_v24, 0.0  ;;  %v903_v28 = vmul.f32 0.2, %v754_v24 }
 0x11c   : > { %v934_v30 = vsel %vm806_vm3, %v623_v14, %v870_v17  ;;  %v1624_v31 = vpack.c.bf16 %v937_v26, %v936_v21  ;;  %v969_v32 = vsel %vm841_vm6, %v1847_v20, %v905_v25  ;;  %v966_v33 = vsel %vm838_vm5, %v751_v15, %v902_v18 }
 0x11d   : > { %v1704_v34 = vpack.c.bf16 %v969_v32, %v968_v29  ;;  %v935_v35 = vsel %vm807_vm7, %v626_v23, %v871_v27  ;;  %v967_v36 = vsel %vm839_vm8, %v754_v24, %v903_v28  ;;  %v1818_v37 = vpop.f32.mrb[28].mxu0 }
 0x11e   : > { %v1850_v38 = vpop.f32.mrb[28].mxu1  ;;  %1728 = vst [vmem:[%s2020_s24 + $0x68] sm:$0xff] %v1624_v31   ;;  %v1619_v39 = vpack.c.bf16 %v935_v35, %v934_v30  ;;  %v1699_v40 = vpack.c.bf16 %v967_v36, %v966_v33  ;;  %vm812_vm9 = vcmp.gt.f32.partialorder %v1818_v37, 0.0  ;;  %v876_v41 = vmul.f32 0.2, %v1818_v37  ;;  %v639_v42 = vpop.f32.mrb[29].mxu0 }
 0x11f   : > { %v767_v43 = vpop.f32.mrb[29].mxu1  ;;  %1744 = vst [vmem:[%s2020_s24 + $0xe8] sm:$0xff] %v1704_v34   ;;  %vm844_vm10 = vcmp.gt.f32.partialorder %v1850_v38, 0.0  ;;  %v908_v44 = vmul.f32 0.2, %v1850_v38  ;;  %v1819_v47 = vpop.f32.mrb[30].mxu0 }
 0x120   : > { %1727 = vst [vmem:[%s2020_s24 + $0x60] sm:$0xff] %v1619_v39   ;;  %1743 = vst [vmem:[%s2020_s24 + $0xe0] sm:$0xff] %v1699_v40   ;;  %v874_v45 = vmul.f32 0.2, %v639_v42  ;;  %v906_v46 = vmul.f32 0.2, %v767_v43  ;;  %v940_v49 = vsel %vm812_vm9, %v1818_v37, %v876_v41 }
 0x121   : > { %v1851_v48 = vpop.f32.mrb[30].mxu1  ;;  %vm810_vm11 = vcmp.gt.f32.partialorder %v639_v42, 0.0  ;;  %vm813_vm12 = vcmp.gt.f32.partialorder %v1819_v47, 0.0  ;;  %v877_v50 = vmul.f32 0.2, %v1819_v47  ;;  %v642_v51 = vpop.f32.mrb[31].mxu0  ;;  %v972_v57 = vsel %vm844_vm10, %v1850_v38, %v908_v44 }
 0x122   : > { %v770_v52 = vpop.f32.mrb[31].mxu1  ;;  %vm842_vm13 = vcmp.gt.f32.partialorder %v767_v43, 0.0  ;;  %vm845_vm14 = vcmp.gt.f32.partialorder %v1851_v48, 0.0  ;;  %v909_v53 = vmul.f32 0.2, %v1851_v48  ;;  %vm811_vm15 = vcmp.gt.f32.partialorder %v642_v51, 0.0 }
 0x123   : > { %v941_v54 = vsel %vm813_vm12, %v1819_v47, %v877_v50  ;;  %v875_v55 = vmul.f32 0.2, %v642_v51  ;;  %vm843_vm0 = vcmp.gt.f32.partialorder %v770_v52, 0.0  ;;  %v907_v56 = vmul.f32 0.2, %v770_v52 }
 0x124   : > { %v938_v58 = vsel %vm810_vm11, %v639_v42, %v874_v45  ;;  %v1634_v59 = vpack.c.bf16 %v941_v54, %v940_v49  ;;  %v973_v60 = vsel %vm845_vm14, %v1851_v48, %v909_v53  ;;  %v970_v61 = vsel %vm842_vm13, %v767_v43, %v906_v46 }
 0x125   : > { %v1714_v62 = vpack.c.bf16 %v973_v60, %v972_v57  ;;  %v939_v63 = vsel %vm811_vm15, %v642_v51, %v875_v55  ;;  %v971_v0 = vsel %vm843_vm0, %v770_v52, %v907_v56 }
 0x126   : > { %1730 = vst [vmem:[%s2020_s24 + $0x78] sm:$0xff] %v1634_v59   ;;  %v1629_v1 = vpack.c.bf16 %v939_v63, %v938_v58  ;;  %v1709_v2 = vpack.c.bf16 %v971_v0, %v970_v61 }
 0x127   : > { %1746 = vst [vmem:[%s2020_s24 + $0xf8] sm:$0xff] %v1714_v62  }
 0x128   : > { %1729 = vst [vmem:[%s2020_s24 + $0x70] sm:$0xff] %v1629_v1   ;;  %1745 = vst [vmem:[%s2020_s24 + $0xf0] sm:$0xff] %v1709_v2  }
 0x129 PF: > { %s12_s9 = sadd.s32 1, %s1907_s9  }
 0x12a   : > { %p9_p4 = scmp.ge.s32.totalorder %s12_s9, 6  }
 0x12c   :  { %11 = sbr.rel (!%p9_p4) target bundleno = 1 (0x1), region = 58 }

// kernel: discriminator_forward.9
= control target key start
LH: loop header
LB: loop body
LE: loop exit
PB: predicated region body
PF: predicated region fallthrough
CT: control target
= control target key end

     0   :  { %v1131_v40 = vmov 0.0   ;;  %s1679_s1 = inlined_call_operand.vmem [shape: bf16[128,128], index: 1, kind: input, shape index: {}]   ;;  %s1680_s0 = inlined_call_operand.vmem [shape: bf16[512,128], index: 0, kind: input, shape index: {}]   ;;  %s1681_s3 = inlined_call_operand.vmem [shape: f32[1,128], index: 3, kind: output, shape index: {1}]   ;;  %s1682_s4 = inlined_call_operand.vmem [shape: f32[1,128], index: 4, kind: output, shape index: {2}]   ;;  %s1683_s2 = inlined_call_operand.vmem [shape: f32[512,128], index: 2, kind: output, shape index: {0}]  }
   0x1   :  { %v1091_v0 = vld [vmem:[%s1679_s1] sm:$0xff]   ;;  %v1092_v1 = vld [vmem:[%s1679_s1 + $0x8] sm:$0xff]   ;;  %v1093_v2 = vld [vmem:[%s1679_s1 + $0x10] sm:$0xff]   ;;  %692 = vst [vmem:[%s1681_s3] sm:$0x1] %v1131_v40 }
   0x2   :  { %994 = vmatprep.subr.bf16.mxu0 %v1091_v0  ;;  %1074 = vmatprep.subr.bf16.mxu1 %v1091_v0  ;;  %v1094_v3 = vld [vmem:[%s1679_s1 + $0x18] sm:$0xff]   ;;  %v1099_v4 = vld [vmem:[%s1680_s0] sm:$0xff]   ;;  %v1096_v6 = vld [vmem:[%s1679_s1 + $0x28] sm:$0xff]   ;;  %693 = vst [vmem:[%s1682_s4] sm:$0x1] %v1131_v40 }
   0x3   :  { %995 = vmatpush3.bf16.msra.mxu0 %v1091_v0  ;;  %1082 = vmatpush3.bf16.msra.mxu1 %v1091_v0  ;;  %v1095_v5 = vld [vmem:[%s1679_s1 + $0x20] sm:$0xff]   ;;  %v1097_v7 = vld [vmem:[%s1679_s1 + $0x30] sm:$0xff]   ;;  %v1098_v8 = vld [vmem:[%s1679_s1 + $0x38] sm:$0xff]  }
   0x4   :  { %996 = vmatprep.subr.bf16.mxu0 %v1092_v1  ;;  %1075 = vmatprep.subr.bf16.mxu1 %v1092_v1  ;;  %v1115_v9 = vld [vmem:[%s1680_s0 + $0x80] sm:$0xff]   ;;  %v1100_v10 = vld [vmem:[%s1680_s0 + $0x8] sm:$0xff]   ;;  %v1101_v11 = vld [vmem:[%s1680_s0 + $0x10] sm:$0xff]  }
   0x5   :  { %1010 = vmatprep.mubr.bf16.mxu0 %v1099_v4  ;;  %1042 = vmatprep.mubr.bf16.mxu1 %v1115_v9  ;;  %v1116_v12 = vld [vmem:[%s1680_s0 + $0x88] sm:$0xff]   ;;  %v1117_v13 = vld [vmem:[%s1680_s0 + $0x90] sm:$0xff]   ;;  %v1102_v14 = vld [vmem:[%s1680_s0 + $0x18] sm:$0xff]  }
   0x6   :  { %v1103_v15 = vld [vmem:[%s1680_s0 + $0x20] sm:$0xff]   ;;  %v1118_v16 = vld [vmem:[%s1680_s0 + $0x98] sm:$0xff]   ;;  %v1104_v18 = vld [vmem:[%s1680_s0 + $0x28] sm:$0xff]  }
   0x7   :  { %997 = vmatpush3.bf16.msra.mxu0 %v1092_v1  ;;  %1083 = vmatpush3.bf16.msra.mxu1 %v1092_v1  ;;  %v1119_v17 = vld [vmem:[%s1680_s0 + $0xa0] sm:$0xff]   ;;  %v1120_v19 = vld [vmem:[%s1680_s0 + $0xa8] sm:$0xff]   ;;  %v1105_v20 = vld [vmem:[%s1680_s0 + $0x30] sm:$0xff]  }
   0x8   :  { %998 = vmatprep.subr.bf16.mxu0 %v1093_v2  ;;  %1076 = vmatprep.subr.bf16.mxu1 %v1093_v2  ;;  %v1121_v21 = vld [vmem:[%s1680_s0 + $0xb0] sm:$0xff]   ;;  %v1106_v22 = vld [vmem:[%s1680_s0 + $0x38] sm:$0xff]   ;;  %v1107_v24 = vld [vmem:[%s1680_s0 + $0x40] sm:$0xff]  }
   0x9   :  { %v1122_v23 = vld [vmem:[%s1680_s0 + $0xb8] sm:$0xff]   ;;  %v1123_v25 = vld [vmem:[%s1680_s0 + $0xc0] sm:$0xff]   ;;  %v1108_v26 = vld [vmem:[%s1680_s0 + $0x48] sm:$0xff]  }
   0xa   :  { %v1124_v27 = vld [vmem:[%s1680_s0 + $0xc8] sm:$0xff]   ;;  %v1109_v28 = vld [vmem:[%s1680_s0 + $0x50] sm:$0xff]   ;;  %v1110_v30 = vld [vmem:[%s1680_s0 + $0x58] sm:$0xff]  }
   0xb   :  { %999 = vmatpush3.bf16.msra.mxu0 %v1093_v2  ;;  %1084 = vmatpush3.bf16.msra.mxu1 %v1093_v2  ;;  %v1125_v29 = vld [vmem:[%s1680_s0 + $0xd0] sm:$0xff]   ;;  %v1126_v31 = vld [vmem:[%s1680_s0 + $0xd8] sm:$0xff]   ;;  %v1111_v32 = vld [vmem:[%s1680_s0 + $0x60] sm:$0xff]  }
   0xc   :  { %1000 = vmatprep.subr.bf16.mxu0 %v1094_v3  ;;  %1077 = vmatprep.subr.bf16.mxu1 %v1094_v3  ;;  %v1127_v33 = vld [vmem:[%s1680_s0 + $0xe0] sm:$0xff]   ;;  %v1112_v34 = vld [vmem:[%s1680_s0 + $0x68] sm:$0xff]   ;;  %v1113_v36 = vld [vmem:[%s1680_s0 + $0x70] sm:$0xff]  }
   0xd   :  { %v1128_v35 = vld [vmem:[%s1680_s0 + $0xe8] sm:$0xff]   ;;  %v1129_v37 = vld [vmem:[%s1680_s0 + $0xf0] sm:$0xff]   ;;  %v1114_v38 = vld [vmem:[%s1680_s0 + $0x78] sm:$0xff]  }
   0xe   :  { %v1130_v39 = vld [vmem:[%s1680_s0 + $0xf8] sm:$0xff]  }
   0xf   :  { %1001 = vmatpush3.bf16.msra.mxu0 %v1094_v3  ;;  %1085 = vmatpush3.bf16.msra.mxu1 %v1094_v3 }
  0x10   :  { %1002 = vmatprep.subr.bf16.mxu0 %v1095_v5  ;;  %1078 = vmatprep.subr.bf16.mxu1 %v1095_v5 }
  0x13   :  { %1003 = vmatpush3.bf16.msra.mxu0 %v1095_v5  ;;  %1086 = vmatpush3.bf16.msra.mxu1 %v1095_v5 }
  0x14   :  { %1004 = vmatprep.subr.bf16.mxu0 %v1096_v6  ;;  %1079 = vmatprep.subr.bf16.mxu1 %v1096_v6 }
  0x17   :  { %1005 = vmatpush3.bf16.msra.mxu0 %v1096_v6  ;;  %1087 = vmatpush3.bf16.msra.mxu1 %v1096_v6 }
  0x18   :  { %1006 = vmatprep.subr.bf16.mxu0 %v1097_v7  ;;  %1080 = vmatprep.subr.bf16.mxu1 %v1097_v7 }
  0x1b   :  { %1007 = vmatpush3.bf16.msra.mxu0 %v1097_v7  ;;  %1088 = vmatpush3.bf16.msra.mxu1 %v1097_v7 }
  0x1c   :  { %1008 = vmatprep.subr.bf16.mxu0 %v1098_v8  ;;  %1081 = vmatprep.subr.bf16.mxu1 %v1098_v8 }
  0x1f   :  { %1009 = vmatpush3.bf16.msra.mxu0 %v1098_v8  ;;  %1089 = vmatpush3.bf16.msra.mxu1 %v1098_v8 }
  0x22   :  { %1011 = vmatmul.mubr.bf16.vlgmr.msra.gmra.mrb[0].mxu0 %v1100_v10  ;;  %1043 = vmatmul.mubr.bf16.vlgmr.msra.gmra.mrb[0].mxu1 %v1116_v12 }
  0x23   :  { %1014 = vmatprep.mubr.bf16.mxu0 %v1101_v11  ;;  %1046 = vmatprep.mubr.bf16.mxu1 %v1117_v13 }
  0x2a   :  { %1015 = vmatmul.mubr.bf16.gmra.mrb[4].mxu0 %v1102_v14  ;;  %1047 = vmatmul.mubr.bf16.gmra.mrb[4].mxu1 %v1118_v16 }
  0x2b   :  { %1018 = vmatprep.mubr.bf16.mxu0 %v1103_v15  ;;  %1050 = vmatprep.mubr.bf16.mxu1 %v1119_v17 }
  0x32   :  { %1019 = vmatmul.mubr.bf16.gmra.mrb[8].mxu0 %v1104_v18  ;;  %1051 = vmatmul.mubr.bf16.gmra.mrb[8].mxu1 %v1120_v19 }
  0x33   :  { %1022 = vmatprep.mubr.bf16.mxu0 %v1105_v20  ;;  %1054 = vmatprep.mubr.bf16.mxu1 %v1121_v21 }
  0x3a   :  { %1023 = vmatmul.mubr.bf16.gmra.mrb[12].mxu0 %v1106_v22  ;;  %1055 = vmatmul.mubr.bf16.gmra.mrb[12].mxu1 %v1122_v23 }
  0x3b   :  { %1026 = vmatprep.mubr.bf16.mxu0 %v1107_v24  ;;  %1058 = vmatprep.mubr.bf16.mxu1 %v1123_v25 }
  0x42   :  { %1027 = vmatmul.mubr.bf16.gmra.mrb[16].mxu0 %v1108_v26  ;;  %1059 = vmatmul.mubr.bf16.gmra.mrb[16].mxu1 %v1124_v27 }
  0x43   :  { %1030 = vmatprep.mubr.bf16.mxu0 %v1109_v28  ;;  %1062 = vmatprep.mubr.bf16.mxu1 %v1125_v29 }
  0x4a   :  { %1031 = vmatmul.mubr.bf16.gmra.mrb[20].mxu0 %v1110_v30  ;;  %1063 = vmatmul.mubr.bf16.gmra.mrb[20].mxu1 %v1126_v31 }
  0x4b   :  { %1034 = vmatprep.mubr.bf16.mxu0 %v1111_v32  ;;  %1066 = vmatprep.mubr.bf16.mxu1 %v1127_v33 }
  0x52   :  { %1035 = vmatmul.mubr.bf16.gmra.mrb[24].mxu0 %v1112_v34  ;;  %1067 = vmatmul.mubr.bf16.gmra.mrb[24].mxu1 %v1128_v35 }
  0x53   :  { %1038 = vmatprep.mubr.bf16.mxu0 %v1113_v36  ;;  %1070 = vmatprep.mubr.bf16.mxu1 %v1129_v37 }
  0x5a   :  { %1039 = vmatmul.mubr.bf16.gmra.mrb[28].mxu0 %v1114_v38  ;;  %1071 = vmatmul.mubr.bf16.gmra.mrb[28].mxu1 %v1130_v39 }
  0xf5   :  { %v1012_v41 = vpop.f32.mrb[0].mxu0  ;;  %v1283_v42 = vpop.f32.mrb[0].mxu1 }
  0xf6   :  { %626 = vst [vmem:[%s1683_s2 + $0x10] sm:$0xff] %v1012_v41  ;;  %v369_v43 = vpop.f32.mrb[1].mxu0  ;;  %658 = vst [vmem:[%s1683_s2 + $0x110] sm:$0xff] %v1283_v42  ;;  %v1292_v44 = vpop.f32.mrb[1].mxu1  ;;  %v769_v52 = vmul.f32 %v1012_v41, %v1012_v41 }
  0xf7   :  { %624 = vst [vmem:[%s1683_s2] sm:$0xff] %v369_v43  ;;  %v1013_v45 = vpop.f32.mrb[2].mxu0  ;;  %656 = vst [vmem:[%s1683_s2 + $0x100] sm:$0xff] %v1292_v44  ;;  %v1301_v46 = vpop.f32.mrb[2].mxu1  ;;  %v767_v49 = vmul.f32 %v369_v43, %v369_v43 }
  0xf8   :  { %627 = vst [vmem:[%s1683_s2 + $0x18] sm:$0xff] %v1013_v45  ;;  %v372_v47 = vpop.f32.mrb[3].mxu0  ;;  %659 = vst [vmem:[%s1683_s2 + $0x118] sm:$0xff] %v1301_v46  ;;  %v1310_v48 = vpop.f32.mrb[3].mxu1  ;;  %v770_v55 = vmul.f32 %v1013_v45, %v1013_v45 }
  0xf9   :  { %625 = vst [vmem:[%s1683_s2 + $0x8] sm:$0xff] %v372_v47  ;;  %v695_v50 = vadd.f32 %v372_v47, %v369_v43  ;;  %v768_v51 = vmul.f32 %v372_v47, %v372_v47  ;;  %657 = vst [vmem:[%s1683_s2 + $0x108] sm:$0xff] %v1310_v48 }
  0xfb   :  { %v696_v53 = vadd.f32 %v1012_v41, %v695_v50  ;;  %v831_v54 = vadd.f32 %v768_v51, %v767_v49 }
  0xfd   :  { %v832_v56 = vadd.f32 %v831_v54, %v769_v52  ;;  %v1016_v57 = vpop.f32.mrb[4].mxu0  ;;  %v697_v58 = vadd.f32 %v1013_v45, %v696_v53  ;;  %v1319_v59 = vpop.f32.mrb[4].mxu1 }
  0xfe   :  { %630 = vst [vmem:[%s1683_s2 + $0x30] sm:$0xff] %v1016_v57  ;;  %v385_v60 = vpop.f32.mrb[5].mxu0  ;;  %662 = vst [vmem:[%s1683_s2 + $0x130] sm:$0xff] %v1319_v59  ;;  %v1328_v61 = vpop.f32.mrb[5].mxu1  ;;  %v773_v8 = vmul.f32 %v1016_v57, %v1016_v57 }
  0xff   :  { %628 = vst [vmem:[%s1683_s2 + $0x20] sm:$0xff] %v385_v60  ;;  %v698_v62 = vadd.f32 %v697_v58, %v385_v60  ;;  %v771_v63 = vmul.f32 %v385_v60, %v385_v60  ;;  %v833_v0 = vadd.f32 %v832_v56, %v770_v55  ;;  %v1017_v1 = vpop.f32.mrb[6].mxu0  ;;  %660 = vst [vmem:[%s1683_s2 + $0x120] sm:$0xff] %v1328_v61  ;;  %v1337_v2 = vpop.f32.mrb[6].mxu1 }
 0x100   :  { %631 = vst [vmem:[%s1683_s2 + $0x38] sm:$0xff] %v1017_v1  ;;  %v388_v3 = vpop.f32.mrb[7].mxu0  ;;  %663 = vst [vmem:[%s1683_s2 + $0x138] sm:$0xff] %v1337_v2  ;;  %v1346_v4 = vpop.f32.mrb[7].mxu1  ;;  %v774_v11 = vmul.f32 %v1017_v1, %v1017_v1 }
 0x101   :  { %v834_v5 = vadd.f32 %v833_v0, %v771_v63  ;;  %629 = vst [vmem:[%s1683_s2 + $0x28] sm:$0xff] %v388_v3  ;;  %v699_v6 = vadd.f32 %v698_v62, %v388_v3  ;;  %v772_v7 = vmul.f32 %v388_v3, %v388_v3  ;;  %661 = vst [vmem:[%s1683_s2 + $0x128] sm:$0xff] %v1346_v4 }
 0x103   :  { %v700_v9 = vadd.f32 %v1016_v57, %v699_v6  ;;  %v835_v10 = vadd.f32 %v834_v5, %v772_v7 }
 0x105   :  { %v836_v12 = vadd.f32 %v835_v10, %v773_v8  ;;  %v1020_v13 = vpop.f32.mrb[8].mxu0  ;;  %v701_v14 = vadd.f32 %v1017_v1, %v700_v9  ;;  %v1355_v15 = vpop.f32.mrb[8].mxu1 }
 0x106   :  { %634 = vst [vmem:[%s1683_s2 + $0x50] sm:$0xff] %v1020_v13  ;;  %v401_v16 = vpop.f32.mrb[9].mxu0  ;;  %666 = vst [vmem:[%s1683_s2 + $0x150] sm:$0xff] %v1355_v15  ;;  %v1364_v17 = vpop.f32.mrb[9].mxu1  ;;  %v777_v28 = vmul.f32 %v1020_v13, %v1020_v13 }
 0x107   :  { %632 = vst [vmem:[%s1683_s2 + $0x40] sm:$0xff] %v401_v16  ;;  %v702_v18 = vadd.f32 %v701_v14, %v401_v16  ;;  %v775_v19 = vmul.f32 %v401_v16, %v401_v16  ;;  %v837_v20 = vadd.f32 %v836_v12, %v774_v11  ;;  %v1021_v21 = vpop.f32.mrb[10].mxu0  ;;  %664 = vst [vmem:[%s1683_s2 + $0x140] sm:$0xff] %v1364_v17  ;;  %v1373_v22 = vpop.f32.mrb[10].mxu1 }
 0x108   :  { %635 = vst [vmem:[%s1683_s2 + $0x58] sm:$0xff] %v1021_v21  ;;  %v404_v23 = vpop.f32.mrb[11].mxu0  ;;  %667 = vst [vmem:[%s1683_s2 + $0x158] sm:$0xff] %v1373_v22  ;;  %v1382_v24 = vpop.f32.mrb[11].mxu1  ;;  %v778_v31 = vmul.f32 %v1021_v21, %v1021_v21 }
 0x109   :  { %v838_v25 = vadd.f32 %v837_v20, %v775_v19  ;;  %633 = vst [vmem:[%s1683_s2 + $0x48] sm:$0xff] %v404_v23  ;;  %v703_v26 = vadd.f32 %v702_v18, %v404_v23  ;;  %v776_v27 = vmul.f32 %v404_v23, %v404_v23  ;;  %665 = vst [vmem:[%s1683_s2 + $0x148] sm:$0xff] %v1382_v24 }
 0x10b   :  { %v704_v29 = vadd.f32 %v1020_v13, %v703_v26  ;;  %v839_v30 = vadd.f32 %v838_v25, %v776_v27 }
 0x10d   :  { %v840_v32 = vadd.f32 %v839_v30, %v777_v28  ;;  %v1024_v33 = vpop.f32.mrb[12].mxu0  ;;  %v705_v34 = vadd.f32 %v1021_v21, %v704_v29  ;;  %v1391_v35 = vpop.f32.mrb[12].mxu1 }
 0x10e   :  { %638 = vst [vmem:[%s1683_s2 + $0x70] sm:$0xff] %v1024_v33  ;;  %v417_v36 = vpop.f32.mrb[13].mxu0  ;;  %670 = vst [vmem:[%s1683_s2 + $0x170] sm:$0xff] %v1391_v35  ;;  %v1400_v37 = vpop.f32.mrb[13].mxu1  ;;  %v781_v52 = vmul.f32 %v1024_v33, %v1024_v33 }
 0x10f   :  { %636 = vst [vmem:[%s1683_s2 + $0x60] sm:$0xff] %v417_v36  ;;  %v706_v38 = vadd.f32 %v705_v34, %v417_v36  ;;  %v779_v39 = vmul.f32 %v417_v36, %v417_v36  ;;  %v841_v40 = vadd.f32 %v840_v32, %v778_v31  ;;  %v1025_v41 = vpop.f32.mrb[14].mxu0  ;;  %668 = vst [vmem:[%s1683_s2 + $0x160] sm:$0xff] %v1400_v37  ;;  %v1409_v43 = vpop.f32.mrb[14].mxu1 }
 0x110   :  { %639 = vst [vmem:[%s1683_s2 + $0x78] sm:$0xff] %v1025_v41  ;;  %v420_v45 = vpop.f32.mrb[15].mxu0  ;;  %671 = vst [vmem:[%s1683_s2 + $0x178] sm:$0xff] %v1409_v43  ;;  %v1418_v47 = vpop.f32.mrb[15].mxu1  ;;  %v782_v55 = vmul.f32 %v1025_v41, %v1025_v41 }
 0x111   :  { %v842_v49 = vadd.f32 %v841_v40, %v779_v39  ;;  %637 = vst [vmem:[%s1683_s2 + $0x68] sm:$0xff] %v420_v45  ;;  %v707_v50 = vadd.f32 %v706_v38, %v420_v45  ;;  %v780_v51 = vmul.f32 %v420_v45, %v420_v45  ;;  %669 = vst [vmem:[%s1683_s2 + $0x168] sm:$0xff] %v1418_v47 }
 0x113   :  { %v708_v53 = vadd.f32 %v1024_v33, %v707_v50  ;;  %v843_v54 = vadd.f32 %v842_v49, %v780_v51 }
 0x115   :  { %v844_v56 = vadd.f32 %v843_v54, %v781_v52  ;;  %v1028_v57 = vpop.f32.mrb[16].mxu0  ;;  %v709_v58 = vadd.f32 %v1025_v41, %v708_v53  ;;  %v1427_v60 = vpop.f32.mrb[16].mxu1 }
 0x116   :  { %642 = vst [vmem:[%s1683_s2 + $0x90] sm:$0xff] %v1028_v57  ;;  %v433_v62 = vpop.f32.mrb[17].mxu0  ;;  %674 = vst [vmem:[%s1683_s2 + $0x190] sm:$0xff] %v1427_v60  ;;  %v1436_v63 = vpop.f32.mrb[17].mxu1  ;;  %v785_v12 = vmul.f32 %v1028_v57, %v1028_v57 }
 0x117   :  { %640 = vst [vmem:[%s1683_s2 + $0x80] sm:$0xff] %v433_v62  ;;  %v710_v0 = vadd.f32 %v709_v58, %v433_v62  ;;  %v783_v1 = vmul.f32 %v433_v62, %v433_v62  ;;  %v845_v3 = vadd.f32 %v844_v56, %v782_v55  ;;  %v1029_v5 = vpop.f32.mrb[18].mxu0  ;;  %672 = vst [vmem:[%s1683_s2 + $0x180] sm:$0xff] %v1436_v63  ;;  %v1445_v6 = vpop.f32.mrb[18].mxu1 }
 0x118   :  { %643 = vst [vmem:[%s1683_s2 + $0x98] sm:$0xff] %v1029_v5  ;;  %v436_v7 = vpop.f32.mrb[19].mxu0  ;;  %675 = vst [vmem:[%s1683_s2 + $0x198] sm:$0xff] %v1445_v6  ;;  %v1454_v8 = vpop.f32.mrb[19].mxu1  ;;  %v786_v16 = vmul.f32 %v1029_v5, %v1029_v5 }
 0x119   :  { %v846_v9 = vadd.f32 %v845_v3, %v783_v1  ;;  %641 = vst [vmem:[%s1683_s2 + $0x88] sm:$0xff] %v436_v7  ;;  %v711_v10 = vadd.f32 %v710_v0, %v436_v7  ;;  %v784_v11 = vmul.f32 %v436_v7, %v436_v7  ;;  %673 = vst [vmem:[%s1683_s2 + $0x188] sm:$0xff] %v1454_v8 }
 0x11b   :  { %v712_v13 = vadd.f32 %v1028_v57, %v711_v10  ;;  %v847_v14 = vadd.f32 %v846_v9, %v784_v11 }
 0x11d   :  { %v848_v18 = vadd.f32 %v847_v14, %v785_v12  ;;  %v1032_v19 = vpop.f32.mrb[20].mxu0  ;;  %v713_v20 = vadd.f32 %v1029_v5, %v712_v13  ;;  %v1463_v21 = vpop.f32.mrb[20].mxu1 }
 0x11e   :  { %646 = vst [vmem:[%s1683_s2 + $0xb0] sm:$0xff] %v1032_v19  ;;  %v449_v23 = vpop.f32.mrb[21].mxu0  ;;  %678 = vst [vmem:[%s1683_s2 + $0x1b0] sm:$0xff] %v1463_v21  ;;  %v1472_v25 = vpop.f32.mrb[21].mxu1  ;;  %v789_v38 = vmul.f32 %v1032_v19, %v1032_v19 }
 0x11f   :  { %644 = vst [vmem:[%s1683_s2 + $0xa0] sm:$0xff] %v449_v23  ;;  %v714_v26 = vadd.f32 %v713_v20, %v449_v23  ;;  %v787_v27 = vmul.f32 %v449_v23, %v449_v23  ;;  %v849_v28 = vadd.f32 %v848_v18, %v786_v16  ;;  %v1033_v29 = vpop.f32.mrb[22].mxu0  ;;  %676 = vst [vmem:[%s1683_s2 + $0x1a0] sm:$0xff] %v1472_v25  ;;  %v1481_v30 = vpop.f32.mrb[22].mxu1 }
 0x120   :  { %647 = vst [vmem:[%s1683_s2 + $0xb8] sm:$0xff] %v1033_v29  ;;  %v452_v31 = vpop.f32.mrb[23].mxu0  ;;  %679 = vst [vmem:[%s1683_s2 + $0x1b8] sm:$0xff] %v1481_v30  ;;  %v1490_v32 = vpop.f32.mrb[23].mxu1  ;;  %v790_v41 = vmul.f32 %v1033_v29, %v1033_v29 }
 0x121   :  { %v850_v33 = vadd.f32 %v849_v28, %v787_v27  ;;  %645 = vst [vmem:[%s1683_s2 + $0xa8] sm:$0xff] %v452_v31  ;;  %v715_v34 = vadd.f32 %v714_v26, %v452_v31  ;;  %v788_v36 = vmul.f32 %v452_v31, %v452_v31  ;;  %677 = vst [vmem:[%s1683_s2 + $0x1a8] sm:$0xff] %v1490_v32 }
 0x123   :  { %v716_v39 = vadd.f32 %v1032_v19, %v715_v34  ;;  %v851_v40 = vadd.f32 %v850_v33, %v788_v36 }
 0x125   :  { %v852_v45 = vadd.f32 %v851_v40, %v789_v38  ;;  %v1036_v49 = vpop.f32.mrb[24].mxu0  ;;  %v717_v50 = vadd.f32 %v1033_v29, %v716_v39  ;;  %v1499_v51 = vpop.f32.mrb[24].mxu1 }
 0x126   :  { %650 = vst [vmem:[%s1683_s2 + $0xd0] sm:$0xff] %v1036_v49  ;;  %v465_v52 = vpop.f32.mrb[25].mxu0  ;;  %682 = vst [vmem:[%s1683_s2 + $0x1d0] sm:$0xff] %v1499_v51  ;;  %v1508_v53 = vpop.f32.mrb[25].mxu1  ;;  %v793_v7 = vmul.f32 %v1036_v49, %v1036_v49 }
 0x127   :  { %648 = vst [vmem:[%s1683_s2 + $0xc0] sm:$0xff] %v465_v52  ;;  %v718_v54 = vadd.f32 %v717_v50, %v465_v52  ;;  %v791_v55 = vmul.f32 %v465_v52, %v465_v52  ;;  %v853_v56 = vadd.f32 %v852_v45, %v790_v41  ;;  %v1037_v57 = vpop.f32.mrb[26].mxu0  ;;  %680 = vst [vmem:[%s1683_s2 + $0x1c0] sm:$0xff] %v1508_v53  ;;  %v1517_v58 = vpop.f32.mrb[26].mxu1 }
 0x128   :  { %651 = vst [vmem:[%s1683_s2 + $0xd8] sm:$0xff] %v1037_v57  ;;  %v468_v62 = vpop.f32.mrb[27].mxu0  ;;  %683 = vst [vmem:[%s1683_s2 + $0x1d8] sm:$0xff] %v1517_v58  ;;  %v1526_v0 = vpop.f32.mrb[27].mxu1  ;;  %v794_v11 = vmul.f32 %v1037_v57, %v1037_v57  ;;  %v799_v50 = vmul.f32 %v1292_v44, %v1292_v44 }
 0x129   :  { %v854_v1 = vadd.f32 %v853_v56, %v791_v55  ;;  %649 = vst [vmem:[%s1683_s2 + $0xc8] sm:$0xff] %v468_v62  ;;  %v719_v3 = vadd.f32 %v718_v54, %v468_v62  ;;  %v792_v5 = vmul.f32 %v468_v62, %v468_v62  ;;  %681 = vst [vmem:[%s1683_s2 + $0x1c8] sm:$0xff] %v1526_v0 }
 0x12a   :  { %v801_v62 = vmul.f32 %v1283_v42, %v1283_v42 }
 0x12b   :  { %v720_v9 = vadd.f32 %v1036_v49, %v719_v3  ;;  %v855_v10 = vadd.f32 %v854_v1, %v792_v5  ;;  %v802_v5 = vmul.f32 %v1301_v46, %v1301_v46 }
 0x12d   :  { %v856_v12 = vadd.f32 %v855_v10, %v793_v7  ;;  %v1040_v13 = vpop.f32.mrb[28].mxu0  ;;  %v721_v14 = vadd.f32 %v1037_v57, %v720_v9  ;;  %v1535_v16 = vpop.f32.mrb[28].mxu1  ;;  %v800_v57 = vmul.f32 %v1310_v48, %v1310_v48 }
 0x12e   :  { %654 = vst [vmem:[%s1683_s2 + $0xf0] sm:$0xff] %v1040_v13  ;;  %v481_v18 = vpop.f32.mrb[29].mxu0  ;;  %686 = vst [vmem:[%s1683_s2 + $0x1f0] sm:$0xff] %v1535_v16  ;;  %v1544_v19 = vpop.f32.mrb[29].mxu1  ;;  %v797_v38 = vmul.f32 %v1040_v13, %v1040_v13 }
 0x12f   :  { %652 = vst [vmem:[%s1683_s2 + $0xe0] sm:$0xff] %v481_v18  ;;  %v722_v20 = vadd.f32 %v721_v14, %v481_v18  ;;  %v795_v23 = vmul.f32 %v481_v18, %v481_v18  ;;  %v857_v26 = vadd.f32 %v856_v12, %v794_v11  ;;  %v1041_v27 = vpop.f32.mrb[30].mxu0  ;;  %684 = vst [vmem:[%s1683_s2 + $0x1e0] sm:$0xff] %v1544_v19  ;;  %v1553_v28 = vpop.f32.mrb[30].mxu1 }
 0x130   :  { %655 = vst [vmem:[%s1683_s2 + $0xf8] sm:$0xff] %v1041_v27  ;;  %v484_v29 = vpop.f32.mrb[31].mxu0  ;;  %687 = vst [vmem:[%s1683_s2 + $0x1f8] sm:$0xff] %v1553_v28  ;;  %v1562_v31 = vpop.f32.mrb[31].mxu1  ;;  %v798_v41 = vmul.f32 %v1041_v27, %v1041_v27 }
 0x131   :  { %v858_v33 = vadd.f32 %v857_v26, %v795_v23  ;;  %653 = vst [vmem:[%s1683_s2 + $0xe8] sm:$0xff] %v484_v29  ;;  %v723_v34 = vadd.f32 %v722_v20, %v484_v29  ;;  %v796_v36 = vmul.f32 %v484_v29, %v484_v29  ;;  %685 = vst [vmem:[%s1683_s2 + $0x1e8] sm:$0xff] %v1562_v31 }
 0x133   :  { %v724_v39 = vadd.f32 %v1040_v13, %v723_v34  ;;  %v859_v40 = vadd.f32 %v858_v33, %v796_v36  ;;  %v804_v13 = vmul.f32 %v1346_v4, %v1346_v4  ;;  %v808_v33 = vmul.f32 %v1382_v24, %v1382_v24 }
 0x135   :  { %v860_v45 = vadd.f32 %v859_v40, %v797_v38  ;;  %v725_v49 = vadd.f32 %v1041_v27, %v724_v39 }
 0x137   :  { %v726_v52 = vadd.f32 %v725_v49, %v1292_v44  ;;  %v861_v54 = vadd.f32 %v860_v45, %v798_v41  ;;  %v803_v44 = vmul.f32 %v1328_v61, %v1328_v61  ;;  %v812_v49 = vmul.f32 %v1418_v47, %v1418_v47 }
 0x139   :  { %v862_v55 = vadd.f32 %v861_v54, %v799_v50  ;;  %v727_v56 = vadd.f32 %v726_v52, %v1310_v48 }
 0x13b   :  { %v728_v1 = vadd.f32 %v1283_v42, %v727_v56  ;;  %v863_v3 = vadd.f32 %v862_v55, %v800_v57  ;;  %v805_v42 = vmul.f32 %v1319_v59, %v1319_v59 }
 0x13d   :  { %v864_v7 = vadd.f32 %v863_v3, %v801_v62  ;;  %v729_v9 = vadd.f32 %v1301_v46, %v728_v1  ;;  %v806_v46 = vmul.f32 %v1337_v2, %v1337_v2  ;;  %v816_v1 = vmul.f32 %v1454_v8, %v1454_v8 }
 0x13f   :  { %v730_v10 = vadd.f32 %v729_v9, %v1328_v61  ;;  %v865_v11 = vadd.f32 %v864_v7, %v802_v5  ;;  %v807_v61 = vmul.f32 %v1364_v17, %v1364_v17 }
 0x141   :  { %v866_v12 = vadd.f32 %v865_v11, %v803_v44  ;;  %v731_v48 = vadd.f32 %v730_v10, %v1346_v4 }
 0x143   :  { %v732_v14 = vadd.f32 %v1319_v59, %v731_v48  ;;  %v867_v18 = vadd.f32 %v866_v12, %v804_v13  ;;  %v809_v59 = vmul.f32 %v1355_v15, %v1355_v15  ;;  %v820_v12 = vmul.f32 %v1490_v32, %v1490_v32 }
 0x145   :  { %v868_v20 = vadd.f32 %v867_v18, %v805_v42  ;;  %v733_v23 = vadd.f32 %v1337_v2, %v732_v14  ;;  %v810_v2 = vmul.f32 %v1373_v22, %v1373_v22 }
 0x147   :  { %v734_v26 = vadd.f32 %v733_v23, %v1364_v17  ;;  %v869_v27 = vadd.f32 %v868_v20, %v806_v46  ;;  %v811_v17 = vmul.f32 %v1400_v37, %v1400_v37  ;;  %v824_v23 = vmul.f32 %v1526_v0, %v1526_v0 }
 0x149   :  { %v870_v29 = vadd.f32 %v869_v27, %v807_v61  ;;  %v735_v4 = vadd.f32 %v734_v26, %v1382_v24 }
 0x14b   :  { %v736_v34 = vadd.f32 %v1355_v15, %v735_v4  ;;  %v871_v36 = vadd.f32 %v870_v29, %v808_v33  ;;  %v813_v15 = vmul.f32 %v1391_v35, %v1391_v35 }
 0x14d   :  { %v872_v38 = vadd.f32 %v871_v36, %v809_v59  ;;  %v737_v39 = vadd.f32 %v1373_v22, %v736_v34  ;;  %v814_v22 = vmul.f32 %v1409_v43, %v1409_v43  ;;  %v828_v34 = vmul.f32 %v1562_v31, %v1562_v31 }
 0x14f   :  { %v738_v40 = vadd.f32 %v737_v39, %v1400_v37  ;;  %v873_v41 = vadd.f32 %v872_v38, %v810_v2  ;;  %v815_v37 = vmul.f32 %v1436_v63, %v1436_v63 }
 0x151   :  { %v874_v45 = vadd.f32 %v873_v41, %v811_v17  ;;  %v739_v24 = vadd.f32 %v738_v40, %v1418_v47 }
 0x153   :  { %v740_v50 = vadd.f32 %v1391_v35, %v739_v24  ;;  %v875_v52 = vadd.f32 %v874_v45, %v812_v49  ;;  %v817_v35 = vmul.f32 %v1427_v60, %v1427_v60 }
 0x155   :  { %v876_v54 = vadd.f32 %v875_v52, %v813_v15  ;;  %v741_v55 = vadd.f32 %v1409_v43, %v740_v50  ;;  %v818_v43 = vmul.f32 %v1445_v6, %v1445_v6 }
 0x157   :  { %v742_v56 = vadd.f32 %v741_v55, %v1436_v63  ;;  %v877_v57 = vadd.f32 %v876_v54, %v814_v22  ;;  %v819_v63 = vmul.f32 %v1472_v25, %v1472_v25 }
 0x159   :  { %v878_v62 = vadd.f32 %v877_v57, %v815_v37  ;;  %v743_v47 = vadd.f32 %v742_v56, %v1454_v8 }
 0x15b   :  { %v744_v3 = vadd.f32 %v1427_v60, %v743_v47  ;;  %v879_v5 = vadd.f32 %v878_v62, %v816_v1  ;;  %v821_v60 = vmul.f32 %v1463_v21, %v1463_v21 }
 0x15d   :  { %v880_v7 = vadd.f32 %v879_v5, %v817_v35  ;;  %v745_v9 = vadd.f32 %v1445_v6, %v744_v3  ;;  %v822_v6 = vmul.f32 %v1481_v30, %v1481_v30 }
 0x15f   :  { %v746_v44 = vadd.f32 %v745_v9, %v1472_v25  ;;  %v881_v10 = vadd.f32 %v880_v7, %v818_v43  ;;  %v823_v25 = vmul.f32 %v1508_v53, %v1508_v53 }
 0x161   :  { %v882_v11 = vadd.f32 %v881_v10, %v819_v63  ;;  %v747_v8 = vadd.f32 %v746_v44, %v1490_v32 }
 0x163   :  { %v748_v48 = vadd.f32 %v1463_v21, %v747_v8  ;;  %v883_v13 = vadd.f32 %v882_v11, %v820_v12  ;;  %v825_v21 = vmul.f32 %v1499_v51, %v1499_v51 }
 0x165   :  { %v884_v42 = vadd.f32 %v883_v13, %v821_v60  ;;  %v749_v14 = vadd.f32 %v1481_v30, %v748_v48  ;;  %v826_v30 = vmul.f32 %v1517_v58, %v1517_v58 }
 0x167   :  { %v750_v18 = vadd.f32 %v749_v14, %v1508_v53  ;;  %v885_v46 = vadd.f32 %v884_v42, %v822_v6  ;;  %v827_v53 = vmul.f32 %v1544_v19, %v1544_v19 }
 0x169   :  { %v886_v20 = vadd.f32 %v885_v46, %v823_v25  ;;  %v751_v32 = vadd.f32 %v750_v18, %v1526_v0 }
 0x16b   :  { %v752_v61 = vadd.f32 %v1499_v51, %v751_v32  ;;  %v887_v26 = vadd.f32 %v886_v20, %v824_v23  ;;  %v829_v51 = vmul.f32 %v1535_v16, %v1535_v16 }
 0x16d   :  { %v888_v27 = vadd.f32 %v887_v26, %v825_v21  ;;  %v753_v29 = vadd.f32 %v1517_v58, %v752_v61  ;;  %v830_v58 = vmul.f32 %v1553_v28, %v1553_v28 }
 0x16f   :  { %v754_v4 = vadd.f32 %v753_v29, %v1544_v19  ;;  %v889_v33 = vadd.f32 %v888_v27, %v826_v30 }
 0x171   :  { %v890_v59 = vadd.f32 %v889_v33, %v827_v53  ;;  %v755_v0 = vadd.f32 %v754_v4, %v1562_v31 }
 0x173   :  { %v756_v36 = vadd.f32 %v1535_v16, %v755_v0  ;;  %v891_v2 = vadd.f32 %v890_v59, %v828_v34  ;;  %v694_v16 = vld [vmem:[%s1681_s3] sm:$0x1] }
 0x175   :  { %v757_v38 = vadd.f32 %v1553_v28, %v756_v36  ;;  %v892_v39 = vadd.f32 %v891_v2, %v829_v51  ;;  %v766_v28 = vld [vmem:[%s1682_s4] sm:$0x1] }
 0x177   :  { %v758_v19 = vrot.slane %v757_v38, 4  ;;  %v893_v17 = vadd.f32 %v892_v39, %v830_v58 }
 0x179   :  { %v759_v40 = vadd.f32 %v758_v19, %v757_v38  ;;  %v894_v41 = vrot.slane %v893_v17, 4 }
 0x17b   :  { %v760_v45 = vrot.slane %v759_v40, 2  ;;  %v895_v24 = vadd.f32 %v894_v41, %v893_v17 }
 0x17d   :  { %v761_v49 = vadd.f32 %v760_v45, %v759_v40  ;;  %v896_v31 = vrot.slane %v895_v24, 2 }
 0x17f   :  { %v762_v15 = vrot.slane %v761_v49, 1  ;;  %v897_v50 = vadd.f32 %v896_v31, %v895_v24 }
 0x181   :  { %v763_v52 = vadd.f32 %v762_v15, %v761_v49  ;;  %v898_v22 = vrot.slane %v897_v50, 1 }
 0x183   :  { %v764_v54 = vadd.f32 %v763_v52, %v694_v16  ;;  %v899_v55 = vadd.f32 %v898_v22, %v897_v50 }
 0x185   :  { %765 = vst [vmem:[%s1681_s3] sm:$0x1] %v764_v54  ;;  %v900_v37 = vadd.f32 %v899_v55, %v766_v28 }
 0x187   :  { %901 = vst [vmem:[%s1682_s4] sm:$0x1] %v900_v37 }

// kernel: discriminator_forward.10
= control target key start
LH: loop header
LB: loop body
LE: loop exit
PB: predicated region body
PF: predicated region fallthrough
CT: control target
= control target key end

     0   :  { %s1503_s0 = inlined_call_operand.vmem [shape: f32[512,128], index: 0, kind: input, shape index: {}]   ;;  %s1504_s1 = inlined_call_operand.vmem [shape: f32[1,128], index: 1, kind: input, shape index: {}]   ;;  %s1505_s2 = inlined_call_operand.vmem [shape: f32[1,128], index: 2, kind: input, shape index: {}]   ;;  %s1506_s3 = inlined_call_operand.vmem [shape: bf16[512,128], index: 3, kind: output, shape index: {}]  }
   0x1   :  { %v14_v0 = vld [vmem:[%s1503_s0] sm:$0xff]  ;;  %v15_v1 = vld [vmem:[%s1503_s0 + $0x8] sm:$0xff]  ;;  %v16_v6 = vld [vmem:[%s1503_s0 + $0x10] sm:$0xff] }
   0x2   :  { %v1086_v2 = vld [vmem:[%s1504_s1] ss:$0 sm:$0xff]  ;;  %v17_v7 = vld [vmem:[%s1503_s0 + $0x18] sm:$0xff]  ;;  %v19_v11 = vld [vmem:[%s1503_s0 + $0x28] sm:$0xff] }
   0x3   :  { %v85_v3 = vmul.f32 %v1086_v2, %v14_v0  ;;  %v86_v4 = vmul.f32 %v1086_v2, %v15_v1  ;;  %v1093_v5 = vld [vmem:[%s1505_s2] ss:$0 sm:$0xff]  ;;  %v87_v8 = vmul.f32 %v1086_v2, %v16_v6  ;;  %v88_v9 = vmul.f32 %v1086_v2, %v17_v7  ;;  %v20_v12 = vld [vmem:[%s1503_s0 + $0x30] sm:$0xff]  ;;  %v21_v17 = vld [vmem:[%s1503_s0 + $0x38] sm:$0xff] }
   0x4   :  { %v18_v10 = vld [vmem:[%s1503_s0 + $0x20] sm:$0xff]  ;;  %v90_v16 = vmul.f32 %v1086_v2, %v19_v11  ;;  %v91_v20 = vmul.f32 %v1086_v2, %v20_v12  ;;  %v92_v21 = vmul.f32 %v1086_v2, %v21_v17  ;;  %v23_v35 = vld [vmem:[%s1503_s0 + $0x48] sm:$0xff]  ;;  %v24_v36 = vld [vmem:[%s1503_s0 + $0x50] sm:$0xff] }
   0x5   :  { %v156_v13 = vadd.f32 %v1093_v5, %v85_v3  ;;  %v157_v14 = vadd.f32 %v1093_v5, %v86_v4  ;;  %v89_v15 = vmul.f32 %v1086_v2, %v18_v10  ;;  %v158_v18 = vadd.f32 %v1093_v5, %v87_v8  ;;  %v22_v34 = vld [vmem:[%s1503_s0 + $0x40] sm:$0xff]  ;;  %v25_v42 = vld [vmem:[%s1503_s0 + $0x58] sm:$0xff]  ;;  %v27_v48 = vld [vmem:[%s1503_s0 + $0x68] sm:$0xff] }
   0x6   :  { %v159_v19 = vadd.f32 %v1093_v5, %v88_v9  ;;  %v161_v29 = vadd.f32 %v1093_v5, %v90_v16  ;;  %v162_v33 = vadd.f32 %v1093_v5, %v91_v20  ;;  %v163_v40 = vadd.f32 %v1093_v5, %v92_v21  ;;  %v26_v47 = vld [vmem:[%s1503_s0 + $0x60] sm:$0xff]  ;;  %v28_v60 = vld [vmem:[%s1503_s0 + $0x70] sm:$0xff]  ;;  %v29_v7 = vld [vmem:[%s1503_s0 + $0x78] sm:$0xff] }
   0x7   :  { %vm220_vm0 = vcmp.gt.f32.partialorder %v156_v13, 0.0  ;;  %vm221_vm1 = vcmp.gt.f32.partialorder %v157_v14, 0.0  ;;  %v284_v22 = vmul.f32 0.2, %v156_v13  ;;  %v285_v23 = vmul.f32 0.2, %v157_v14 }
   0x8   :  { %vm222_vm2 = vcmp.gt.f32.partialorder %v158_v18, 0.0  ;;  %vm223_vm3 = vcmp.gt.f32.partialorder %v159_v19, 0.0  ;;  %v286_v24 = vmul.f32 0.2, %v158_v18  ;;  %v287_v25 = vmul.f32 0.2, %v159_v19 }
   0x9   :  { %v348_v26 = vsel %vm220_vm0, %v156_v13, %v284_v22  ;;  %v349_v27 = vsel %vm221_vm1, %v157_v14, %v285_v23  ;;  %v160_v28 = vadd.f32 %v1093_v5, %v89_v15  ;;  %vm225_vm5 = vcmp.gt.f32.partialorder %v161_v29, 0.0  ;;  %v30_v12 = vld [vmem:[%s1503_s0 + $0x80] sm:$0xff]  ;;  %v31_v13 = vld [vmem:[%s1503_s0 + $0x88] sm:$0xff]  ;;  %v32_v20 = vld [vmem:[%s1503_s0 + $0x90] sm:$0xff] }
   0xa   :  { %v869_v30 = vpack.c.bf16 %v349_v27, %v348_v26  ;;  %v350_v31 = vsel %vm222_vm2, %v158_v18, %v286_v24  ;;  %v351_v32 = vsel %vm223_vm3, %v159_v19, %v287_v25  ;;  %v289_v39 = vmul.f32 0.2, %v161_v29  ;;  %v33_v25 = vld [vmem:[%s1503_s0 + $0x98] sm:$0xff] }
   0xb   :  { %v874_v37 = vpack.c.bf16 %v351_v32, %v350_v31  ;;  %vm224_vm4 = vcmp.gt.f32.partialorder %v160_v28, 0.0  ;;  %v288_v38 = vmul.f32 0.2, %v160_v28  ;;  %vm226_vm6 = vcmp.gt.f32.partialorder %v162_v33, 0.0 }
   0xc   :  { %870 = vst [vmem:[%s1506_s3] sm:$0xff] %v869_v30   ;;  %v290_v41 = vmul.f32 0.2, %v162_v33  ;;  %v93_v44 = vmul.f32 %v1086_v2, %v22_v34  ;;  %v94_v45 = vmul.f32 %v1086_v2, %v23_v35  ;;  %v95_v46 = vmul.f32 %v1086_v2, %v24_v36 }
   0xd   :  { %1026 = vst [vmem:[%s1506_s3 + $0x8] sm:$0xff] %v874_v37   ;;  %v352_v43 = vsel %vm224_vm4, %v160_v28, %v288_v38  ;;  %v353_v49 = vsel %vm225_vm5, %v161_v29, %v289_v39  ;;  %vm227_vm7 = vcmp.gt.f32.partialorder %v163_v40, 0.0  ;;  %v291_v50 = vmul.f32 0.2, %v163_v40  ;;  %v35_v37 = vld [vmem:[%s1503_s0 + $0xa8] sm:$0xff] }
   0xe   :  { %v354_v51 = vsel %vm226_vm6, %v162_v33, %v290_v41  ;;  %v879_v52 = vpack.c.bf16 %v353_v49, %v352_v43  ;;  %v164_v53 = vadd.f32 %v1093_v5, %v93_v44  ;;  %v165_v54 = vadd.f32 %v1093_v5, %v94_v45  ;;  %v34_v33 = vld [vmem:[%s1503_s0 + $0xa0] sm:$0xff]  ;;  %v36_v44 = vld [vmem:[%s1503_s0 + $0xb0] sm:$0xff]  ;;  %v37_v49 = vld [vmem:[%s1503_s0 + $0xb8] sm:$0xff] }
   0xf   :  { %v96_v55 = vmul.f32 %v1086_v2, %v25_v42  ;;  %v355_v56 = vsel %vm227_vm7, %v163_v40, %v291_v50  ;;  %v166_v57 = vadd.f32 %v1093_v5, %v95_v46  ;;  %v97_v58 = vmul.f32 %v1086_v2, %v26_v47  ;;  %v38_v50 = vld [vmem:[%s1503_s0 + $0xc0] sm:$0xff] }
  0x10   :  { %v98_v59 = vmul.f32 %v1086_v2, %v27_v48  ;;  %1027 = vst [vmem:[%s1506_s3 + $0x10] sm:$0xff] %v879_v52   ;;  %v884_v61 = vpack.c.bf16 %v355_v56, %v354_v51  ;;  %vm228_vm8 = vcmp.gt.f32.partialorder %v164_v53, 0.0  ;;  %vm229_vm9 = vcmp.gt.f32.partialorder %v165_v54, 0.0  ;;  %v39_v51 = vld [vmem:[%s1503_s0 + $0xc8] sm:$0xff] }
  0x11   :  { %v292_v62 = vmul.f32 0.2, %v164_v53  ;;  %v293_v63 = vmul.f32 0.2, %v165_v54  ;;  %v167_v0 = vadd.f32 %v1093_v5, %v96_v55  ;;  %vm230_vm10 = vcmp.gt.f32.partialorder %v166_v57, 0.0 }
  0x12   :  { %v294_v1 = vmul.f32 0.2, %v166_v57  ;;  %1028 = vst [vmem:[%s1506_s3 + $0x18] sm:$0xff] %v884_v61   ;;  %v168_v4 = vadd.f32 %v1093_v5, %v97_v58  ;;  %v169_v6 = vadd.f32 %v1093_v5, %v98_v59  ;;  %v99_v8 = vmul.f32 %v1086_v2, %v28_v60 }
  0x13   :  { %v356_v3 = vsel %vm228_vm8, %v164_v53, %v292_v62  ;;  %v357_v9 = vsel %vm229_vm9, %v165_v54, %v293_v63  ;;  %vm231_vm11 = vcmp.gt.f32.partialorder %v167_v0, 0.0  ;;  %v295_v10 = vmul.f32 0.2, %v167_v0  ;;  %v40_v62 = vld [vmem:[%s1503_s0 + $0xd0] sm:$0xff] }
  0x14   :  { %v358_v11 = vsel %vm230_vm10, %v166_v57, %v294_v1  ;;  %v889_v14 = vpack.c.bf16 %v357_v9, %v356_v3  ;;  %vm232_vm12 = vcmp.gt.f32.partialorder %v168_v4, 0.0  ;;  %vm233_vm13 = vcmp.gt.f32.partialorder %v169_v6, 0.0 }
  0x15   :  { %v296_v15 = vmul.f32 0.2, %v168_v4  ;;  %v359_v16 = vsel %vm231_vm11, %v167_v0, %v295_v10  ;;  %v297_v17 = vmul.f32 0.2, %v169_v6  ;;  %v100_v18 = vmul.f32 %v1086_v2, %v29_v7  ;;  %v41_v10 = vld [vmem:[%s1503_s0 + $0xd8] sm:$0xff] }
  0x16   :  { %v170_v19 = vadd.f32 %v1093_v5, %v99_v8  ;;  %1029 = vst [vmem:[%s1506_s3 + $0x20] sm:$0xff] %v889_v14   ;;  %v894_v21 = vpack.c.bf16 %v359_v16, %v358_v11  ;;  %v101_v23 = vmul.f32 %v1086_v2, %v30_v12  ;;  %v102_v24 = vmul.f32 %v1086_v2, %v31_v13  ;;  %v42_v14 = vld [vmem:[%s1503_s0 + $0xe0] sm:$0xff] }
  0x17   :  { %v360_v22 = vsel %vm232_vm12, %v168_v4, %v296_v15  ;;  %v361_v26 = vsel %vm233_vm13, %v169_v6, %v297_v17  ;;  %v171_v27 = vadd.f32 %v1093_v5, %v100_v18  ;;  %v103_v32 = vmul.f32 %v1086_v2, %v32_v20  ;;  %v43_v15 = vld [vmem:[%s1503_s0 + $0xe8] sm:$0xff] }
  0x18   :  { %vm234_vm14 = vcmp.gt.f32.partialorder %v170_v19, 0.0  ;;  %v298_v28 = vmul.f32 0.2, %v170_v19  ;;  %1030 = vst [vmem:[%s1506_s3 + $0x28] sm:$0xff] %v894_v21   ;;  %v899_v29 = vpack.c.bf16 %v361_v26, %v360_v22  ;;  %v172_v30 = vadd.f32 %v1093_v5, %v101_v23  ;;  %v44_v26 = vld [vmem:[%s1503_s0 + $0xf0] sm:$0xff] }
  0x19   :  { %v173_v31 = vadd.f32 %v1093_v5, %v102_v24  ;;  %vm235_vm15 = vcmp.gt.f32.partialorder %v171_v27, 0.0  ;;  %v299_v34 = vmul.f32 0.2, %v171_v27  ;;  %v104_v36 = vmul.f32 %v1086_v2, %v33_v25 }
  0x1a   :  { %v362_v35 = vsel %vm234_vm14, %v170_v19, %v298_v28  ;;  %1031 = vst [vmem:[%s1506_s3 + $0x30] sm:$0xff] %v899_v29   ;;  %vm236_vm0 = vcmp.gt.f32.partialorder %v172_v30, 0.0  ;;  %v300_v38 = vmul.f32 0.2, %v172_v30  ;;  %v174_v41 = vadd.f32 %v1093_v5, %v103_v32 }
  0x1b   :  { %vm237_vm1 = vcmp.gt.f32.partialorder %v173_v31, 0.0  ;;  %v301_v39 = vmul.f32 0.2, %v173_v31  ;;  %v363_v40 = vsel %vm235_vm15, %v171_v27, %v299_v34  ;;  %v175_v42 = vadd.f32 %v1093_v5, %v104_v36 }
  0x1c   :  { %v105_v43 = vmul.f32 %v1086_v2, %v34_v33  ;;  %v904_v45 = vpack.c.bf16 %v363_v40, %v362_v35  ;;  %v364_v46 = vsel %vm236_vm0, %v172_v30, %v300_v38  ;;  %v106_v48 = vmul.f32 %v1086_v2, %v35_v37  ;;  %v46_v38 = vld [vmem:[%s1503_s0 + $0x100] sm:$0xff] }
  0x1d   :  { %v365_v47 = vsel %vm237_vm1, %v173_v31, %v301_v39  ;;  %vm238_vm2 = vcmp.gt.f32.partialorder %v174_v41, 0.0  ;;  %vm239_vm3 = vcmp.gt.f32.partialorder %v175_v42, 0.0  ;;  %v302_v53 = vmul.f32 0.2, %v174_v41  ;;  %v45_v31 = vld [vmem:[%s1503_s0 + $0xf8] sm:$0xff] }
  0x1e   :  { %v909_v52 = vpack.c.bf16 %v365_v47, %v364_v46  ;;  %1032 = vst [vmem:[%s1506_s3 + $0x38] sm:$0xff] %v904_v45   ;;  %v303_v54 = vmul.f32 0.2, %v175_v42  ;;  %v176_v55 = vadd.f32 %v1093_v5, %v105_v43  ;;  %v177_v56 = vadd.f32 %v1093_v5, %v106_v48 }
  0x1f   :  { %v107_v57 = vmul.f32 %v1086_v2, %v36_v44  ;;  %v366_v58 = vsel %vm238_vm2, %v174_v41, %v302_v53  ;;  %v108_v59 = vmul.f32 %v1086_v2, %v37_v49  ;;  %v109_v60 = vmul.f32 %v1086_v2, %v38_v50  ;;  %v48_v50 = vld [vmem:[%s1503_s0 + $0x110] sm:$0xff] }
  0x20   :  { %1033 = vst [vmem:[%s1506_s3 + $0x40] sm:$0xff] %v909_v52   ;;  %v110_v61 = vmul.f32 %v1086_v2, %v39_v51  ;;  %v367_v63 = vsel %vm239_vm3, %v175_v42, %v303_v54  ;;  %vm240_vm4 = vcmp.gt.f32.partialorder %v176_v55, 0.0  ;;  %vm241_vm5 = vcmp.gt.f32.partialorder %v177_v56, 0.0  ;;  %v47_v42 = vld [vmem:[%s1503_s0 + $0x108] sm:$0xff]  ;;  %v49_v51 = vld [vmem:[%s1503_s0 + $0x118] sm:$0xff] }
  0x21   :  { %v304_v0 = vmul.f32 0.2, %v176_v55  ;;  %v914_v1 = vpack.c.bf16 %v367_v63, %v366_v58  ;;  %v305_v3 = vmul.f32 0.2, %v177_v56  ;;  %v178_v4 = vadd.f32 %v1093_v5, %v107_v57  ;;  %v51_v63 = vld [vmem:[%s1503_s0 + $0x128] sm:$0xff] }
  0x22   :  { %v179_v6 = vadd.f32 %v1093_v5, %v108_v59  ;;  %v180_v8 = vadd.f32 %v1093_v5, %v109_v60  ;;  %v181_v9 = vadd.f32 %v1093_v5, %v110_v61  ;;  %v111_v11 = vmul.f32 %v1086_v2, %v40_v62 }
  0x23   :  { %v368_v7 = vsel %vm240_vm4, %v176_v55, %v304_v0  ;;  %1034 = vst [vmem:[%s1506_s3 + $0x48] sm:$0xff] %v914_v1   ;;  %v369_v12 = vsel %vm241_vm5, %v177_v56, %v305_v3  ;;  %vm242_vm6 = vcmp.gt.f32.partialorder %v178_v4, 0.0  ;;  %v306_v13 = vmul.f32 0.2, %v178_v4  ;;  %v50_v55 = vld [vmem:[%s1503_s0 + $0x120] sm:$0xff] }
  0x24   :  { %vm243_vm7 = vcmp.gt.f32.partialorder %v179_v6, 0.0  ;;  %v919_v16 = vpack.c.bf16 %v369_v12, %v368_v7  ;;  %v307_v17 = vmul.f32 0.2, %v179_v6  ;;  %vm244_vm8 = vcmp.gt.f32.partialorder %v180_v8, 0.0 }
  0x25   :  { %vm245_vm9 = vcmp.gt.f32.partialorder %v181_v9, 0.0  ;;  %v370_v18 = vsel %vm242_vm6, %v178_v4, %v306_v13  ;;  %v308_v19 = vmul.f32 0.2, %v180_v8  ;;  %v309_v20 = vmul.f32 0.2, %v181_v9  ;;  %v52_v4 = vld [vmem:[%s1503_s0 + $0x130] sm:$0xff] }
  0x26   :  { %v112_v21 = vmul.f32 %v1086_v2, %v41_v10  ;;  %1035 = vst [vmem:[%s1506_s3 + $0x50] sm:$0xff] %v919_v16   ;;  %v371_v22 = vsel %vm243_vm7, %v179_v6, %v307_v17  ;;  %v182_v23 = vadd.f32 %v1093_v5, %v111_v11  ;;  %v113_v24 = vmul.f32 %v1086_v2, %v42_v14  ;;  %v53_v13 = vld [vmem:[%s1503_s0 + $0x138] sm:$0xff] }
  0x27   :  { %v114_v25 = vmul.f32 %v1086_v2, %v43_v15  ;;  %v924_v27 = vpack.c.bf16 %v371_v22, %v370_v18  ;;  %v372_v28 = vsel %vm244_vm8, %v180_v8, %v308_v19  ;;  %v373_v29 = vsel %vm245_vm9, %v181_v9, %v309_v20  ;;  %v54_v20 = vld [vmem:[%s1503_s0 + $0x140] sm:$0xff] }
  0x28   :  { %v183_v30 = vadd.f32 %v1093_v5, %v112_v21  ;;  %v929_v32 = vpack.c.bf16 %v373_v29, %v372_v28  ;;  %vm246_vm10 = vcmp.gt.f32.partialorder %v182_v23, 0.0  ;;  %v310_v33 = vmul.f32 0.2, %v182_v23 }
  0x29   :  { %v184_v34 = vadd.f32 %v1093_v5, %v113_v24  ;;  %1036 = vst [vmem:[%s1506_s3 + $0x58] sm:$0xff] %v924_v27   ;;  %v185_v36 = vadd.f32 %v1093_v5, %v114_v25  ;;  %v115_v37 = vmul.f32 %v1086_v2, %v44_v26  ;;  %v116_v41 = vmul.f32 %v1086_v2, %v45_v31  ;;  %v55_v24 = vld [vmem:[%s1503_s0 + $0x148] sm:$0xff] }
  0x2a   :  { %vm247_vm11 = vcmp.gt.f32.partialorder %v183_v30, 0.0  ;;  %v311_v35 = vmul.f32 0.2, %v183_v30  ;;  %1037 = vst [vmem:[%s1506_s3 + $0x60] sm:$0xff] %v929_v32   ;;  %v374_v39 = vsel %vm246_vm10, %v182_v23, %v310_v33  ;;  %v117_v49 = vmul.f32 %v1086_v2, %v46_v38  ;;  %v56_v32 = vld [vmem:[%s1503_s0 + $0x150] sm:$0xff]  ;;  %v57_v33 = vld [vmem:[%s1503_s0 + $0x158] sm:$0xff] }
  0x2b   :  { %vm248_vm12 = vcmp.gt.f32.partialorder %v184_v34, 0.0  ;;  %v312_v40 = vmul.f32 0.2, %v184_v34  ;;  %vm249_vm13 = vcmp.gt.f32.partialorder %v185_v36, 0.0  ;;  %v313_v44 = vmul.f32 0.2, %v185_v36 }
  0x2c   :  { %v375_v43 = vsel %vm247_vm11, %v183_v30, %v311_v35  ;;  %v186_v45 = vadd.f32 %v1093_v5, %v115_v37  ;;  %v187_v48 = vadd.f32 %v1093_v5, %v116_v41  ;;  %v118_v54 = vmul.f32 %v1086_v2, %v47_v42  ;;  %v58_v37 = vld [vmem:[%s1503_s0 + $0x160] sm:$0xff] }
  0x2d   :  { %v934_v46 = vpack.c.bf16 %v375_v43, %v374_v39  ;;  %v376_v47 = vsel %vm248_vm12, %v184_v34, %v312_v40  ;;  %v377_v52 = vsel %vm249_vm13, %v185_v36, %v313_v44  ;;  %v188_v58 = vadd.f32 %v1093_v5, %v117_v49  ;;  %v60_v49 = vld [vmem:[%s1503_s0 + $0x170] sm:$0xff] }
  0x2e   :  { %vm250_vm14 = vcmp.gt.f32.partialorder %v186_v45, 0.0  ;;  %v314_v53 = vmul.f32 0.2, %v186_v45  ;;  %v939_v56 = vpack.c.bf16 %v377_v52, %v376_v47  ;;  %vm251_vm15 = vcmp.gt.f32.partialorder %v187_v48, 0.0 }
  0x2f   :  { %1038 = vst [vmem:[%s1506_s3 + $0x68] sm:$0xff] %v934_v46   ;;  %v315_v57 = vmul.f32 0.2, %v187_v48  ;;  %v189_v60 = vadd.f32 %v1093_v5, %v118_v54  ;;  %v119_v61 = vmul.f32 %v1086_v2, %v48_v50  ;;  %v120_v62 = vmul.f32 %v1086_v2, %v49_v51 }
  0x30   :  { %v378_v59 = vsel %vm250_vm14, %v186_v45, %v314_v53  ;;  %1039 = vst [vmem:[%s1506_s3 + $0x70] sm:$0xff] %v939_v56   ;;  %vm252_vm0 = vcmp.gt.f32.partialorder %v188_v58, 0.0  ;;  %v316_v1 = vmul.f32 0.2, %v188_v58  ;;  %v121_v3 = vmul.f32 %v1086_v2, %v50_v55  ;;  %v59_v45 = vld [vmem:[%s1503_s0 + $0x168] sm:$0xff] }
  0x31   :  { %v379_v0 = vsel %vm251_vm15, %v187_v48, %v315_v57  ;;  %vm253_vm1 = vcmp.gt.f32.partialorder %v189_v60, 0.0  ;;  %v317_v7 = vmul.f32 0.2, %v189_v60  ;;  %v190_v8 = vadd.f32 %v1093_v5, %v119_v61  ;;  %v61_v57 = vld [vmem:[%s1503_s0 + $0x178] sm:$0xff] }
  0x32   :  { %v944_v6 = vpack.c.bf16 %v379_v0, %v378_v59  ;;  %v380_v9 = vsel %vm252_vm0, %v188_v58, %v316_v1  ;;  %v191_v10 = vadd.f32 %v1093_v5, %v120_v62  ;;  %v122_v11 = vmul.f32 %v1086_v2, %v51_v63  ;;  %v62_v0 = vld [vmem:[%s1503_s0 + $0x180] sm:$0xff] }
  0x33   :  { %v192_v12 = vadd.f32 %v1093_v5, %v121_v3  ;;  %v381_v14 = vsel %vm253_vm1, %v189_v60, %v317_v7  ;;  %vm254_vm2 = vcmp.gt.f32.partialorder %v190_v8, 0.0  ;;  %v318_v15 = vmul.f32 0.2, %v190_v8 }
  0x34   :  { %1040 = vst [vmem:[%s1506_s3 + $0x78] sm:$0xff] %v944_v6   ;;  %v123_v16 = vmul.f32 %v1086_v2, %v52_v4  ;;  %v949_v17 = vpack.c.bf16 %v381_v14, %v380_v9  ;;  %vm255_vm3 = vcmp.gt.f32.partialorder %v191_v10, 0.0  ;;  %v319_v18 = vmul.f32 0.2, %v191_v10  ;;  %v63_v6 = vld [vmem:[%s1503_s0 + $0x188] sm:$0xff]  ;;  %v64_v14 = vld [vmem:[%s1503_s0 + $0x190] sm:$0xff] }
  0x35   :  { %v193_v19 = vadd.f32 %v1093_v5, %v122_v11  ;;  %v382_v21 = vsel %vm254_vm2, %v190_v8, %v318_v15  ;;  %vm256_vm4 = vcmp.gt.f32.partialorder %v192_v12, 0.0  ;;  %v320_v22 = vmul.f32 0.2, %v192_v12  ;;  %v65_v15 = vld [vmem:[%s1503_s0 + $0x198] sm:$0xff] }
  0x36   :  { %v124_v23 = vmul.f32 %v1086_v2, %v53_v13  ;;  %1041 = vst [vmem:[%s1506_s3 + $0x80] sm:$0xff] %v949_v17   ;;  %v383_v25 = vsel %vm255_vm3, %v191_v10, %v319_v18  ;;  %v194_v27 = vadd.f32 %v1093_v5, %v123_v16  ;;  %v125_v31 = vmul.f32 %v1086_v2, %v54_v20 }
  0x37   :  { %vm257_vm5 = vcmp.gt.f32.partialorder %v193_v19, 0.0  ;;  %v321_v26 = vmul.f32 0.2, %v193_v19  ;;  %v954_v28 = vpack.c.bf16 %v383_v25, %v382_v21  ;;  %v384_v29 = vsel %vm256_vm4, %v192_v12, %v320_v22 }
  0x38   :  { %v195_v30 = vadd.f32 %v1093_v5, %v124_v23  ;;  %vm258_vm6 = vcmp.gt.f32.partialorder %v194_v27, 0.0  ;;  %v322_v35 = vmul.f32 0.2, %v194_v27  ;;  %v126_v36 = vmul.f32 %v1086_v2, %v55_v24 }
  0x39   :  { %v385_v34 = vsel %vm257_vm5, %v193_v19, %v321_v26  ;;  %1042 = vst [vmem:[%s1506_s3 + $0x88] sm:$0xff] %v954_v28   ;;  %v196_v40 = vadd.f32 %v1093_v5, %v125_v31  ;;  %v127_v43 = vmul.f32 %v1086_v2, %v56_v32  ;;  %v128_v44 = vmul.f32 %v1086_v2, %v57_v33  ;;  %v66_v19 = vld [vmem:[%s1503_s0 + $0x1a0] sm:$0xff]  ;;  %v68_v31 = vld [vmem:[%s1503_s0 + $0x1b0] sm:$0xff] }
  0x3a   :  { %v959_v38 = vpack.c.bf16 %v385_v34, %v384_v29  ;;  %vm259_vm7 = vcmp.gt.f32.partialorder %v195_v30, 0.0  ;;  %v323_v39 = vmul.f32 0.2, %v195_v30  ;;  %v386_v41 = vsel %vm258_vm6, %v194_v27, %v322_v35  ;;  %v67_v27 = vld [vmem:[%s1503_s0 + $0x1a8] sm:$0xff] }
  0x3b   :  { %v197_v42 = vadd.f32 %v1093_v5, %v126_v36  ;;  %vm260_vm8 = vcmp.gt.f32.partialorder %v196_v40, 0.0  ;;  %v324_v47 = vmul.f32 0.2, %v196_v40  ;;  %v129_v48 = vmul.f32 %v1086_v2, %v58_v37 }
  0x3c   :  { %1043 = vst [vmem:[%s1506_s3 + $0x90] sm:$0xff] %v959_v38   ;;  %v387_v46 = vsel %vm259_vm7, %v195_v30, %v323_v39  ;;  %v198_v52 = vadd.f32 %v1093_v5, %v127_v43  ;;  %v199_v54 = vadd.f32 %v1093_v5, %v128_v44  ;;  %v130_v55 = vmul.f32 %v1086_v2, %v59_v45  ;;  %v69_v39 = vld [vmem:[%s1503_s0 + $0x1b8] sm:$0xff] }
  0x3d   :  { %v964_v50 = vpack.c.bf16 %v387_v46, %v386_v41  ;;  %vm261_vm9 = vcmp.gt.f32.partialorder %v197_v42, 0.0  ;;  %v325_v51 = vmul.f32 0.2, %v197_v42  ;;  %v388_v53 = vsel %vm260_vm8, %v196_v40, %v324_v47  ;;  %v70_v46 = vld [vmem:[%s1503_s0 + $0x1c0] sm:$0xff] }
  0x3e   :  { %v200_v56 = vadd.f32 %v1093_v5, %v129_v48  ;;  %vm262_vm10 = vcmp.gt.f32.partialorder %v198_v52, 0.0  ;;  %v326_v59 = vmul.f32 0.2, %v198_v52  ;;  %v131_v60 = vmul.f32 %v1086_v2, %v60_v49 }
  0x3f   :  { %1044 = vst [vmem:[%s1506_s3 + $0x98] sm:$0xff] %v964_v50   ;;  %v389_v58 = vsel %vm261_vm9, %v197_v42, %v325_v51  ;;  %vm263_vm11 = vcmp.gt.f32.partialorder %v199_v54, 0.0  ;;  %v327_v62 = vmul.f32 0.2, %v199_v54  ;;  %v201_v63 = vadd.f32 %v1093_v5, %v130_v55  ;;  %v71_v50 = vld [vmem:[%s1503_s0 + $0x1c8] sm:$0xff] }
  0x40   :  { %v969_v61 = vpack.c.bf16 %v389_v58, %v388_v53  ;;  %v390_v1 = vsel %vm262_vm10, %v198_v52, %v326_v59  ;;  %vm264_vm12 = vcmp.gt.f32.partialorder %v200_v56, 0.0  ;;  %v328_v3 = vmul.f32 0.2, %v200_v56  ;;  %v72_v58 = vld [vmem:[%s1503_s0 + $0x1d0] sm:$0xff]  ;;  %v73_v59 = vld [vmem:[%s1503_s0 + $0x1d8] sm:$0xff] }
  0x41   :  { %v132_v4 = vmul.f32 %v1086_v2, %v61_v57  ;;  %v391_v7 = vsel %vm263_vm11, %v199_v54, %v327_v62  ;;  %vm265_vm13 = vcmp.gt.f32.partialorder %v201_v63, 0.0  ;;  %v329_v8 = vmul.f32 0.2, %v201_v63 }
  0x42   :  { %1045 = vst [vmem:[%s1506_s3 + $0xa0] sm:$0xff] %v969_v61   ;;  %v202_v9 = vadd.f32 %v1093_v5, %v131_v60  ;;  %v974_v10 = vpack.c.bf16 %v391_v7, %v390_v1  ;;  %v392_v11 = vsel %vm264_vm12, %v200_v56, %v328_v3  ;;  %v133_v13 = vmul.f32 %v1086_v2, %v62_v0 }
  0x43   :  { %v203_v12 = vadd.f32 %v1093_v5, %v132_v4  ;;  %v393_v16 = vsel %vm265_vm13, %v201_v63, %v329_v8  ;;  %v134_v18 = vmul.f32 %v1086_v2, %v63_v6  ;;  %v135_v25 = vmul.f32 %v1086_v2, %v64_v14  ;;  %v74_v63 = vld [vmem:[%s1503_s0 + $0x1e0] sm:$0xff] }
  0x44   :  { %vm266_vm14 = vcmp.gt.f32.partialorder %v202_v9, 0.0  ;;  %v330_v17 = vmul.f32 0.2, %v202_v9  ;;  %1046 = vst [vmem:[%s1506_s3 + $0xa8] sm:$0xff] %v974_v10   ;;  %v979_v20 = vpack.c.bf16 %v393_v16, %v392_v11  ;;  %v204_v22 = vadd.f32 %v1093_v5, %v133_v13  ;;  %v76_v13 = vld [vmem:[%s1503_s0 + $0x1f0] sm:$0xff] }
  0x45   :  { %vm267_vm15 = vcmp.gt.f32.partialorder %v203_v12, 0.0  ;;  %v331_v21 = vmul.f32 0.2, %v203_v12  ;;  %v205_v24 = vadd.f32 %v1093_v5, %v134_v18  ;;  %v136_v26 = vmul.f32 %v1086_v2, %v65_v15 }
  0x46   :  { %v394_v23 = vsel %vm266_vm14, %v202_v9, %v330_v17  ;;  %1047 = vst [vmem:[%s1506_s3 + $0xb0] sm:$0xff] %v979_v20   ;;  %vm268_vm0 = vcmp.gt.f32.partialorder %v204_v22, 0.0  ;;  %v332_v29 = vmul.f32 0.2, %v204_v22  ;;  %v137_v30 = vmul.f32 %v1086_v2, %v66_v19  ;;  %v75_v9 = vld [vmem:[%s1503_s0 + $0x1e8] sm:$0xff] }
  0x47   :  { %v395_v28 = vsel %vm267_vm15, %v203_v12, %v331_v21  ;;  %vm269_vm1 = vcmp.gt.f32.partialorder %v205_v24, 0.0  ;;  %v333_v33 = vmul.f32 0.2, %v205_v24  ;;  %v206_v34 = vadd.f32 %v1093_v5, %v135_v25  ;;  %v77_v21 = vld [vmem:[%s1503_s0 + $0x1f8] sm:$0xff] }
  0x48   :  { %v984_v32 = vpack.c.bf16 %v395_v28, %v394_v23  ;;  %v396_v35 = vsel %vm268_vm0, %v204_v22, %v332_v29  ;;  %v207_v36 = vadd.f32 %v1093_v5, %v136_v26  ;;  %v138_v37 = vmul.f32 %v1086_v2, %v67_v27 }
  0x49   :  { %v208_v38 = vadd.f32 %v1093_v5, %v137_v30  ;;  %v397_v40 = vsel %vm269_vm1, %v205_v24, %v333_v33  ;;  %vm270_vm2 = vcmp.gt.f32.partialorder %v206_v34, 0.0  ;;  %v334_v41 = vmul.f32 0.2, %v206_v34 }
  0x4a   :  { %1048 = vst [vmem:[%s1506_s3 + $0xb8] sm:$0xff] %v984_v32   ;;  %v139_v42 = vmul.f32 %v1086_v2, %v68_v31  ;;  %v989_v43 = vpack.c.bf16 %v397_v40, %v396_v35  ;;  %vm271_vm3 = vcmp.gt.f32.partialorder %v207_v36, 0.0  ;;  %v335_v44 = vmul.f32 0.2, %v207_v36 }
  0x4b   :  { %v209_v45 = vadd.f32 %v1093_v5, %v138_v37  ;;  %v398_v47 = vsel %vm270_vm2, %v206_v34, %v334_v41  ;;  %vm272_vm4 = vcmp.gt.f32.partialorder %v208_v38, 0.0  ;;  %v336_v48 = vmul.f32 0.2, %v208_v38 }
  0x4c   :  { %v140_v49 = vmul.f32 %v1086_v2, %v69_v39  ;;  %1049 = vst [vmem:[%s1506_s3 + $0xc0] sm:$0xff] %v989_v43   ;;  %v399_v51 = vsel %vm271_vm3, %v207_v36, %v335_v44  ;;  %v210_v53 = vadd.f32 %v1093_v5, %v139_v42  ;;  %v141_v57 = vmul.f32 %v1086_v2, %v70_v46 }
  0x4d   :  { %vm273_vm5 = vcmp.gt.f32.partialorder %v209_v45, 0.0  ;;  %v337_v52 = vmul.f32 0.2, %v209_v45  ;;  %v994_v54 = vpack.c.bf16 %v399_v51, %v398_v47  ;;  %v400_v55 = vsel %vm272_vm4, %v208_v38, %v336_v48 }
  0x4e   :  { %v211_v56 = vadd.f32 %v1093_v5, %v140_v49  ;;  %vm274_vm6 = vcmp.gt.f32.partialorder %v210_v53, 0.0  ;;  %v338_v61 = vmul.f32 0.2, %v210_v53  ;;  %v142_v62 = vmul.f32 %v1086_v2, %v71_v50 }
  0x4f   :  { %v401_v60 = vsel %vm273_vm5, %v209_v45, %v337_v52  ;;  %1050 = vst [vmem:[%s1506_s3 + $0xc8] sm:$0xff] %v994_v54   ;;  %v212_v3 = vadd.f32 %v1093_v5, %v141_v57  ;;  %v143_v7 = vmul.f32 %v1086_v2, %v72_v58  ;;  %v144_v8 = vmul.f32 %v1086_v2, %v73_v59 }
  0x50   :  { %v999_v0 = vpack.c.bf16 %v401_v60, %v400_v55  ;;  %vm275_vm7 = vcmp.gt.f32.partialorder %v211_v56, 0.0  ;;  %v339_v1 = vmul.f32 0.2, %v211_v56  ;;  %v402_v4 = vsel %vm274_vm6, %v210_v53, %v338_v61 }
  0x51   :  { %v213_v6 = vadd.f32 %v1093_v5, %v142_v62  ;;  %vm276_vm8 = vcmp.gt.f32.partialorder %v212_v3, 0.0  ;;  %v340_v11 = vmul.f32 0.2, %v212_v3  ;;  %v145_v12 = vmul.f32 %v1086_v2, %v74_v63 }
  0x52   :  { %1051 = vst [vmem:[%s1506_s3 + $0xd0] sm:$0xff] %v999_v0   ;;  %v403_v10 = vsel %vm275_vm7, %v211_v56, %v339_v1  ;;  %v214_v16 = vadd.f32 %v1093_v5, %v143_v7  ;;  %v215_v18 = vadd.f32 %v1093_v5, %v144_v8  ;;  %v146_v19 = vmul.f32 %v1086_v2, %v75_v9 }
  0x53   :  { %v1004_v14 = vpack.c.bf16 %v403_v10, %v402_v4  ;;  %vm277_vm9 = vcmp.gt.f32.partialorder %v213_v6, 0.0  ;;  %v341_v15 = vmul.f32 0.2, %v213_v6  ;;  %v404_v17 = vsel %vm276_vm8, %v212_v3, %v340_v11 }
  0x54   :  { %v216_v20 = vadd.f32 %v1093_v5, %v145_v12  ;;  %vm278_vm10 = vcmp.gt.f32.partialorder %v214_v16, 0.0  ;;  %v342_v23 = vmul.f32 0.2, %v214_v16  ;;  %v147_v24 = vmul.f32 %v1086_v2, %v76_v13 }
  0x55   :  { %1052 = vst [vmem:[%s1506_s3 + $0xd8] sm:$0xff] %v1004_v14   ;;  %v405_v22 = vsel %vm277_vm9, %v213_v6, %v341_v15  ;;  %vm279_vm11 = vcmp.gt.f32.partialorder %v215_v18, 0.0  ;;  %v343_v26 = vmul.f32 0.2, %v215_v18  ;;  %v217_v27 = vadd.f32 %v1093_v5, %v146_v19 }
  0x56   :  { %v1009_v25 = vpack.c.bf16 %v405_v22, %v404_v17  ;;  %v406_v28 = vsel %vm278_vm10, %v214_v16, %v342_v23  ;;  %vm280_vm12 = vcmp.gt.f32.partialorder %v216_v20, 0.0  ;;  %v344_v29 = vmul.f32 0.2, %v216_v20 }
  0x57   :  { %v148_v30 = vmul.f32 %v1086_v2, %v77_v21  ;;  %v407_v31 = vsel %vm279_vm11, %v215_v18, %v343_v26  ;;  %vm281_vm13 = vcmp.gt.f32.partialorder %v217_v27, 0.0  ;;  %v345_v32 = vmul.f32 0.2, %v217_v27 }
  0x58   :  { %1053 = vst [vmem:[%s1506_s3 + $0xe0] sm:$0xff] %v1009_v25   ;;  %v218_v33 = vadd.f32 %v1093_v5, %v147_v24  ;;  %v1014_v34 = vpack.c.bf16 %v407_v31, %v406_v28  ;;  %v408_v35 = vsel %vm280_vm12, %v216_v20, %v344_v29 }
  0x59   :  { %v219_v36 = vadd.f32 %v1093_v5, %v148_v30  ;;  %v409_v37 = vsel %vm281_vm13, %v217_v27, %v345_v32 }
  0x5a   :  { %vm282_vm14 = vcmp.gt.f32.partialorder %v218_v33, 0.0  ;;  %v346_v38 = vmul.f32 0.2, %v218_v33  ;;  %1054 = vst [vmem:[%s1506_s3 + $0xe8] sm:$0xff] %v1014_v34   ;;  %v1019_v2 = vpack.c.bf16 %v409_v37, %v408_v35 }
  0x5b   :  { %vm283_vm15 = vcmp.gt.f32.partialorder %v219_v36, 0.0  ;;  %v347_v39 = vmul.f32 0.2, %v219_v36 }
  0x5c   :  { %v410_v40 = vsel %vm282_vm14, %v218_v33, %v346_v38  ;;  %1055 = vst [vmem:[%s1506_s3 + $0xf0] sm:$0xff] %v1019_v2  }
  0x5d   :  { %v411_v41 = vsel %vm283_vm15, %v219_v36, %v347_v39 }
  0x5e   :  { %v1024_v42 = vpack.c.bf16 %v411_v41, %v410_v40 }
  0x60   :  { %1056 = vst [vmem:[%s1506_s3 + $0xf8] sm:$0xff] %v1024_v42  }

// kernel: discriminator_forward.11
= control target key start
LH: loop header
LB: loop body
LE: loop exit
PB: predicated region body
PF: predicated region fallthrough
CT: control target
= control target key end

     0   :  { %v587_v32 = vmov 0.0   ;;  %s793_s1 = inlined_call_operand.vmem [shape: bf16[256,128], index: 1, kind: input, shape index: {}]   ;;  %s794_s0 = inlined_call_operand.vmem [shape: bf16[128,256], index: 0, kind: input, shape index: {}]   ;;  %s795_s3 = inlined_call_operand.vmem [shape: f32[1,128], index: 3, kind: output, shape index: {1}]   ;;  %s796_s4 = inlined_call_operand.vmem [shape: f32[1,128], index: 4, kind: output, shape index: {2}]   ;;  %s797_s2 = inlined_call_operand.vmem [shape: f32[128,128], index: 2, kind: output, shape index: {0}]  }
   0x1   :  { %v547_v0 = vld [vmem:[%s793_s1 + $0x40] sm:$0xff]   ;;  %v549_v2 = vld [vmem:[%s793_s1 + $0x48] sm:$0xff]   ;;  %v551_v4 = vld [vmem:[%s793_s1 + $0x50] sm:$0xff]   ;;  %356 = vst [vmem:[%s795_s3] sm:$0x1] %v587_v32 }
   0x2   :  { %v548_v1 = vld [vmem:[%s793_s1] sm:$0xff]   ;;  %466 = vmatprep.subr.bf16.mxu0 %v547_v0  ;;  %530 = vmatprep.subr.bf16.mxu1 %v547_v0  ;;  %v550_v3 = vld [vmem:[%s793_s1 + $0x8] sm:$0xff]   ;;  %v552_v5 = vld [vmem:[%s793_s1 + $0x10] sm:$0xff]   ;;  %357 = vst [vmem:[%s796_s4] sm:$0x1] %v587_v32 }
   0x3   :  { %467 = vmatpush3.bf16.msra.mxu0 %v548_v1  ;;  %538 = vmatpush3.bf16.msra.mxu1 %v548_v1  ;;  %v553_v6 = vld [vmem:[%s793_s1 + $0x58] sm:$0xff]   ;;  %v555_v8 = vld [vmem:[%s793_s1 + $0x60] sm:$0xff]   ;;  %v557_v10 = vld [vmem:[%s793_s1 + $0x68] sm:$0xff]  }
   0x4   :  { %468 = vmatprep.subr.bf16.mxu0 %v549_v2  ;;  %531 = vmatprep.subr.bf16.mxu1 %v549_v2  ;;  %v554_v7 = vld [vmem:[%s793_s1 + $0x18] sm:$0xff]   ;;  %v556_v9 = vld [vmem:[%s793_s1 + $0x20] sm:$0xff]   ;;  %v558_v12 = vld [vmem:[%s793_s1 + $0x28] sm:$0xff]  }
   0x5   :  { %v565_v11 = vld [vmem:[%s794_s0 + $0x4] ss:$8 sps:$4 sm:$0xff]   ;;  %v559_v14 = vld [vmem:[%s793_s1 + $0x70] sm:$0xff]   ;;  %v561_v16 = vld [vmem:[%s793_s1 + $0x78] sm:$0xff]  }
   0x6   :  { %v571_v13 = vld [vmem:[%s794_s0 + $0x44] ss:$8 sps:$4 sm:$0xff]   ;;  %271 = vmatprep.mubr.bf16.mxu0 %v565_v11  ;;  %v560_v15 = vld [vmem:[%s793_s1 + $0x30] sm:$0xff]   ;;  %v562_v17 = vld [vmem:[%s793_s1 + $0x38] sm:$0xff]  }
   0x7   :  { %469 = vmatpush3.bf16.msra.mxu0 %v550_v3  ;;  %539 = vmatpush3.bf16.msra.mxu1 %v550_v3  ;;  %v563_v18 = vld [vmem:[%s794_s0] ss:$8 sps:$4 sm:$0xff]   ;;  %v566_v20 = vld [vmem:[%s794_s0 + $0x14] ss:$8 sps:$4 sm:$0xff]   ;;  %v568_v22 = vld [vmem:[%s794_s0 + $0x10] ss:$8 sps:$4 sm:$0xff]  }
   0x8   :  { %470 = vmatprep.subr.bf16.mxu0 %v551_v4  ;;  %532 = vmatprep.subr.bf16.mxu1 %v551_v4  ;;  %v569_v19 = vld [vmem:[%s794_s0 + $0x40] ss:$8 sps:$4 sm:$0xff]   ;;  %v575_v21 = vld [vmem:[%s794_s0 + $0x54] ss:$8 sps:$4 sm:$0xff]   ;;  %v577_v23 = vld [vmem:[%s794_s0 + $0x50] ss:$8 sps:$4 sm:$0xff]  }
   0x9   :  { %303 = vmatprep.mubr.bf16.mxu1 %v571_v13  ;;  %v572_v24 = vld [vmem:[%s794_s0 + $0x24] ss:$8 sps:$4 sm:$0xff]   ;;  %v574_v26 = vld [vmem:[%s794_s0 + $0x20] ss:$8 sps:$4 sm:$0xff]   ;;  %v578_v28 = vld [vmem:[%s794_s0 + $0x34] ss:$8 sps:$4 sm:$0xff]  }
   0xa   :  { %v581_v25 = vld [vmem:[%s794_s0 + $0x64] ss:$8 sps:$4 sm:$0xff]   ;;  %v583_v27 = vld [vmem:[%s794_s0 + $0x60] ss:$8 sps:$4 sm:$0xff]   ;;  %v584_v29 = vld [vmem:[%s794_s0 + $0x74] ss:$8 sps:$4 sm:$0xff]  }
   0xb   :  { %471 = vmatpush3.bf16.msra.mxu0 %v552_v5  ;;  %540 = vmatpush3.bf16.msra.mxu1 %v552_v5  ;;  %v580_v30 = vld [vmem:[%s794_s0 + $0x30] ss:$8 sps:$4 sm:$0xff]  }
   0xc   :  { %472 = vmatprep.subr.bf16.mxu0 %v553_v6  ;;  %533 = vmatprep.subr.bf16.mxu1 %v553_v6  ;;  %v586_v31 = vld [vmem:[%s794_s0 + $0x70] ss:$8 sps:$4 sm:$0xff]  }
   0xf   :  { %473 = vmatpush3.bf16.msra.mxu0 %v554_v7  ;;  %541 = vmatpush3.bf16.msra.mxu1 %v554_v7 }
  0x10   :  { %474 = vmatprep.subr.bf16.mxu0 %v555_v8  ;;  %534 = vmatprep.subr.bf16.mxu1 %v555_v8 }
  0x13   :  { %475 = vmatpush3.bf16.msra.mxu0 %v556_v9  ;;  %542 = vmatpush3.bf16.msra.mxu1 %v556_v9 }
  0x14   :  { %476 = vmatprep.subr.bf16.mxu0 %v557_v10  ;;  %535 = vmatprep.subr.bf16.mxu1 %v557_v10 }
  0x17   :  { %477 = vmatpush3.bf16.msra.mxu0 %v558_v12  ;;  %543 = vmatpush3.bf16.msra.mxu1 %v558_v12 }
  0x18   :  { %478 = vmatprep.subr.bf16.mxu0 %v559_v14  ;;  %536 = vmatprep.subr.bf16.mxu1 %v559_v14 }
  0x1b   :  { %479 = vmatpush3.bf16.msra.mxu0 %v560_v15  ;;  %544 = vmatpush3.bf16.msra.mxu1 %v560_v15 }
  0x1c   :  { %480 = vmatprep.subr.bf16.mxu0 %v561_v16  ;;  %537 = vmatprep.subr.bf16.mxu1 %v561_v16 }
  0x1f   :  { %481 = vmatpush3.bf16.msra.mxu0 %v562_v17  ;;  %545 = vmatpush3.bf16.msra.mxu1 %v562_v17 }
  0x22   :  { %272 = vmatmul.mubr.bf16.vlgmr.msra.gmra.mrb[0].mxu0 %v563_v18  ;;  %304 = vmatmul.mubr.bf16.vlgmr.msra.gmra.mrb[0].mxu1 %v569_v19 }
  0x23   :  { %279 = vmatprep.mubr.bf16.mxu0 %v566_v20  ;;  %311 = vmatprep.mubr.bf16.mxu1 %v575_v21 }
  0x2a   :  { %280 = vmatmul.mubr.bf16.gmra.mrb[4].mxu0 %v568_v22  ;;  %312 = vmatmul.mubr.bf16.gmra.mrb[4].mxu1 %v577_v23 }
  0x2b   :  { %287 = vmatprep.mubr.bf16.mxu0 %v572_v24  ;;  %319 = vmatprep.mubr.bf16.mxu1 %v581_v25 }
  0x32   :  { %288 = vmatmul.mubr.bf16.gmra.mrb[8].mxu0 %v574_v26  ;;  %320 = vmatmul.mubr.bf16.gmra.mrb[8].mxu1 %v583_v27 }
  0x33   :  { %295 = vmatprep.mubr.bf16.mxu0 %v578_v28  ;;  %327 = vmatprep.mubr.bf16.mxu1 %v584_v29 }
  0x3a   :  { %296 = vmatmul.mubr.bf16.gmra.mrb[12].mxu0 %v580_v30  ;;  %328 = vmatmul.mubr.bf16.gmra.mrb[12].mxu1 %v586_v31 }
  0xf5   :  { %v482_v33 = vpop.f32.mrb[0].mxu0  ;;  %v506_v34 = vpop.f32.mrb[0].mxu1 }
  0xf6   :  { %v483_v35 = vpop.f32.mrb[1].mxu0  ;;  %v507_v36 = vpop.f32.mrb[1].mxu1 }
  0xf7   :  { %v484_v37 = vadd.f32 %v483_v35, %v482_v33  ;;  %v485_v38 = vpop.f32.mrb[2].mxu0  ;;  %v715_v39 = vadd.f32 %v507_v36, %v506_v34  ;;  %v509_v40 = vpop.f32.mrb[2].mxu1 }
  0xf8   :  { %v486_v41 = vpop.f32.mrb[3].mxu0  ;;  %v510_v42 = vpop.f32.mrb[3].mxu1 }
  0xf9   :  { %336 = vst [vmem:[%s797_s2] sm:$0xff] %v484_v37  ;;  %v487_v43 = vadd.f32 %v486_v41, %v485_v38  ;;  %344 = vst [vmem:[%s797_s2 + $0x40] sm:$0xff] %v715_v39  ;;  %v724_v44 = vadd.f32 %v510_v42, %v509_v40  ;;  %v383_v45 = vmul.f32 %v484_v37, %v484_v37 }
  0xfa   :  { %v391_v38 = vmul.f32 %v715_v39, %v715_v39 }
  0xfb   :  { %337 = vst [vmem:[%s797_s2 + $0x8] sm:$0xff] %v487_v43  ;;  %v359_v46 = vadd.f32 %v487_v43, %v484_v37  ;;  %v384_v47 = vmul.f32 %v487_v43, %v487_v43  ;;  %345 = vst [vmem:[%s797_s2 + $0x48] sm:$0xff] %v724_v44  ;;  %v392_v42 = vmul.f32 %v724_v44, %v724_v44 }
  0xfd   :  { %v399_v48 = vadd.f32 %v384_v47, %v383_v45  ;;  %v488_v49 = vpop.f32.mrb[4].mxu0  ;;  %v512_v50 = vpop.f32.mrb[4].mxu1 }
  0xfe   :  { %v489_v51 = vpop.f32.mrb[5].mxu0  ;;  %v513_v52 = vpop.f32.mrb[5].mxu1 }
  0xff   :  { %v490_v53 = vadd.f32 %v489_v51, %v488_v49  ;;  %v491_v54 = vpop.f32.mrb[6].mxu0  ;;  %v733_v55 = vadd.f32 %v513_v52, %v512_v50  ;;  %v515_v56 = vpop.f32.mrb[6].mxu1 }
 0x100   :  { %v492_v57 = vpop.f32.mrb[7].mxu0  ;;  %v516_v58 = vpop.f32.mrb[7].mxu1 }
 0x101   :  { %338 = vst [vmem:[%s797_s2 + $0x10] sm:$0xff] %v490_v53  ;;  %v360_v59 = vadd.f32 %v490_v53, %v359_v46  ;;  %v385_v60 = vmul.f32 %v490_v53, %v490_v53  ;;  %v493_v61 = vadd.f32 %v492_v57, %v491_v54  ;;  %346 = vst [vmem:[%s797_s2 + $0x50] sm:$0xff] %v733_v55 }
 0x102   :  { %v517_v62 = vadd.f32 %v516_v58, %v515_v56  ;;  %v393_v46 = vmul.f32 %v733_v55, %v733_v55 }
 0x103   :  { %v400_v63 = vadd.f32 %v399_v48, %v385_v60  ;;  %339 = vst [vmem:[%s797_s2 + $0x18] sm:$0xff] %v493_v61  ;;  %v361_v0 = vadd.f32 %v493_v61, %v360_v59  ;;  %v386_v1 = vmul.f32 %v493_v61, %v493_v61 }
 0x104   :  { %347 = vst [vmem:[%s797_s2 + $0x58] sm:$0xff] %v517_v62  ;;  %v394_v49 = vmul.f32 %v517_v62, %v517_v62 }
 0x105   :  { %v401_v2 = vadd.f32 %v400_v63, %v386_v1  ;;  %v494_v3 = vpop.f32.mrb[8].mxu0  ;;  %v518_v4 = vpop.f32.mrb[8].mxu1 }
 0x106   :  { %v495_v5 = vpop.f32.mrb[9].mxu0  ;;  %v519_v6 = vpop.f32.mrb[9].mxu1 }
 0x107   :  { %v496_v7 = vadd.f32 %v495_v5, %v494_v3  ;;  %v497_v8 = vpop.f32.mrb[10].mxu0  ;;  %v520_v9 = vadd.f32 %v519_v6, %v518_v4  ;;  %v521_v10 = vpop.f32.mrb[10].mxu1 }
 0x108   :  { %v498_v11 = vpop.f32.mrb[11].mxu0  ;;  %v522_v12 = vpop.f32.mrb[11].mxu1 }
 0x109   :  { %340 = vst [vmem:[%s797_s2 + $0x20] sm:$0xff] %v496_v7  ;;  %v362_v13 = vadd.f32 %v496_v7, %v361_v0  ;;  %v387_v14 = vmul.f32 %v496_v7, %v496_v7  ;;  %v499_v15 = vadd.f32 %v498_v11, %v497_v8  ;;  %348 = vst [vmem:[%s797_s2 + $0x60] sm:$0xff] %v520_v9  ;;  %v358_v8 = vld [vmem:[%s795_s3] sm:$0x1] }
 0x10a   :  { %v523_v16 = vadd.f32 %v522_v12, %v521_v10  ;;  %v395_v53 = vmul.f32 %v520_v9, %v520_v9  ;;  %v382_v11 = vld [vmem:[%s796_s4] sm:$0x1] }
 0x10b   :  { %v402_v17 = vadd.f32 %v401_v2, %v387_v14  ;;  %341 = vst [vmem:[%s797_s2 + $0x28] sm:$0xff] %v499_v15  ;;  %v363_v18 = vadd.f32 %v499_v15, %v362_v13  ;;  %v388_v19 = vmul.f32 %v499_v15, %v499_v15 }
 0x10c   :  { %349 = vst [vmem:[%s797_s2 + $0x68] sm:$0xff] %v523_v16  ;;  %v396_v57 = vmul.f32 %v523_v16, %v523_v16 }
 0x10d   :  { %v403_v20 = vadd.f32 %v402_v17, %v388_v19  ;;  %v500_v21 = vpop.f32.mrb[12].mxu0  ;;  %v524_v22 = vpop.f32.mrb[12].mxu1 }
 0x10e   :  { %v501_v23 = vpop.f32.mrb[13].mxu0  ;;  %v525_v24 = vpop.f32.mrb[13].mxu1 }
 0x10f   :  { %v502_v25 = vadd.f32 %v501_v23, %v500_v21  ;;  %v503_v26 = vpop.f32.mrb[14].mxu0  ;;  %v526_v27 = vadd.f32 %v525_v24, %v524_v22  ;;  %v527_v28 = vpop.f32.mrb[14].mxu1 }
 0x110   :  { %v504_v29 = vpop.f32.mrb[15].mxu0  ;;  %v528_v30 = vpop.f32.mrb[15].mxu1 }
 0x111   :  { %342 = vst [vmem:[%s797_s2 + $0x30] sm:$0xff] %v502_v25  ;;  %v364_v31 = vadd.f32 %v502_v25, %v363_v18  ;;  %v389_v32 = vmul.f32 %v502_v25, %v502_v25  ;;  %v505_v33 = vadd.f32 %v504_v29, %v503_v26  ;;  %350 = vst [vmem:[%s797_s2 + $0x70] sm:$0xff] %v526_v27 }
 0x112   :  { %v529_v34 = vadd.f32 %v528_v30, %v527_v28  ;;  %v397_v58 = vmul.f32 %v526_v27, %v526_v27 }
 0x113   :  { %v404_v35 = vadd.f32 %v403_v20, %v389_v32  ;;  %343 = vst [vmem:[%s797_s2 + $0x38] sm:$0xff] %v505_v33  ;;  %v365_v36 = vadd.f32 %v505_v33, %v364_v31  ;;  %v390_v37 = vmul.f32 %v505_v33, %v505_v33 }
 0x114   :  { %351 = vst [vmem:[%s797_s2 + $0x78] sm:$0xff] %v529_v34  ;;  %v398_v63 = vmul.f32 %v529_v34, %v529_v34 }
 0x115   :  { %v366_v40 = vadd.f32 %v715_v39, %v365_v36  ;;  %v405_v41 = vadd.f32 %v404_v35, %v390_v37 }
 0x117   :  { %v367_v43 = vadd.f32 %v724_v44, %v366_v40  ;;  %v406_v45 = vadd.f32 %v405_v41, %v391_v38 }
 0x119   :  { %v407_v47 = vadd.f32 %v406_v45, %v392_v42  ;;  %v368_v48 = vadd.f32 %v733_v55, %v367_v43 }
 0x11b   :  { %v369_v50 = vadd.f32 %v517_v62, %v368_v48  ;;  %v408_v51 = vadd.f32 %v407_v47, %v393_v46 }
 0x11d   :  { %v370_v52 = vadd.f32 %v520_v9, %v369_v50  ;;  %v409_v54 = vadd.f32 %v408_v51, %v394_v49 }
 0x11f   :  { %v410_v39 = vadd.f32 %v409_v54, %v395_v53  ;;  %v371_v56 = vadd.f32 %v523_v16, %v370_v52 }
 0x121   :  { %v411_v59 = vadd.f32 %v410_v39, %v396_v57  ;;  %v372_v60 = vadd.f32 %v526_v27, %v371_v56 }
 0x123   :  { %v412_v44 = vadd.f32 %v411_v59, %v397_v58  ;;  %v373_v61 = vadd.f32 %v529_v34, %v372_v60 }
 0x125   :  { %v374_v0 = vrot.slane %v373_v61, 4  ;;  %v413_v1 = vadd.f32 %v412_v44, %v398_v63 }
 0x127   :  { %v375_v2 = vadd.f32 %v374_v0, %v373_v61  ;;  %v414_v3 = vrot.slane %v413_v1, 4 }
 0x129   :  { %v376_v55 = vrot.slane %v375_v2, 2  ;;  %v415_v4 = vadd.f32 %v414_v3, %v413_v1 }
 0x12b   :  { %v377_v62 = vadd.f32 %v376_v55, %v375_v2  ;;  %v416_v5 = vrot.slane %v415_v4, 2 }
 0x12d   :  { %v378_v6 = vrot.slane %v377_v62, 1  ;;  %v417_v7 = vadd.f32 %v416_v5, %v415_v4 }
 0x12f   :  { %v379_v9 = vadd.f32 %v378_v6, %v377_v62  ;;  %v418_v10 = vrot.slane %v417_v7, 1 }
 0x131   :  { %v380_v12 = vadd.f32 %v379_v9, %v358_v8  ;;  %v419_v13 = vadd.f32 %v418_v10, %v417_v7 }
 0x133   :  { %381 = vst [vmem:[%s795_s3] sm:$0x1] %v380_v12  ;;  %v420_v14 = vadd.f32 %v419_v13, %v382_v11 }
 0x135   :  { %421 = vst [vmem:[%s796_s4] sm:$0x1] %v420_v14 }

// kernel: discriminator_forward.12
= control target key start
LH: loop header
LB: loop body
LE: loop exit
PB: predicated region body
PF: predicated region fallthrough
CT: control target
= control target key end

     0   :  { %s423_s0 = inlined_call_operand.vmem [shape: f32[128,128], index: 0, kind: input, shape index: {}]   ;;  %s424_s1 = inlined_call_operand.vmem [shape: f32[1,128], index: 1, kind: input, shape index: {}]   ;;  %s425_s2 = inlined_call_operand.vmem [shape: f32[1,128], index: 2, kind: input, shape index: {}]   ;;  %s426_s3 = inlined_call_operand.vmem [shape: bf16[128,128], index: 3, kind: output, shape index: {}]  }
   0x1   :  { %v14_v0 = vld [vmem:[%s423_s0] sm:$0xff]  ;;  %v15_v1 = vld [vmem:[%s423_s0 + $0x8] sm:$0xff]  ;;  %v16_v6 = vld [vmem:[%s423_s0 + $0x10] sm:$0xff] }
   0x2   :  { %v318_v2 = vld [vmem:[%s424_s1] ss:$0 sm:$0xff]  ;;  %v17_v7 = vld [vmem:[%s423_s0 + $0x18] sm:$0xff]  ;;  %v19_v11 = vld [vmem:[%s423_s0 + $0x28] sm:$0xff] }
   0x3   :  { %v37_v3 = vmul.f32 %v318_v2, %v14_v0  ;;  %v38_v4 = vmul.f32 %v318_v2, %v15_v1  ;;  %v325_v5 = vld [vmem:[%s425_s2] ss:$0 sm:$0xff]  ;;  %v39_v8 = vmul.f32 %v318_v2, %v16_v6  ;;  %v40_v9 = vmul.f32 %v318_v2, %v17_v7  ;;  %v20_v12 = vld [vmem:[%s423_s0 + $0x30] sm:$0xff]  ;;  %v21_v17 = vld [vmem:[%s423_s0 + $0x38] sm:$0xff] }
   0x4   :  { %v18_v10 = vld [vmem:[%s423_s0 + $0x20] sm:$0xff]  ;;  %v42_v16 = vmul.f32 %v318_v2, %v19_v11  ;;  %v43_v20 = vmul.f32 %v318_v2, %v20_v12  ;;  %v44_v21 = vmul.f32 %v318_v2, %v21_v17  ;;  %v23_v35 = vld [vmem:[%s423_s0 + $0x48] sm:$0xff]  ;;  %v24_v36 = vld [vmem:[%s423_s0 + $0x50] sm:$0xff] }
   0x5   :  { %v60_v13 = vadd.f32 %v325_v5, %v37_v3  ;;  %v61_v14 = vadd.f32 %v325_v5, %v38_v4  ;;  %v41_v15 = vmul.f32 %v318_v2, %v18_v10  ;;  %v62_v18 = vadd.f32 %v325_v5, %v39_v8  ;;  %v22_v34 = vld [vmem:[%s423_s0 + $0x40] sm:$0xff]  ;;  %v25_v42 = vld [vmem:[%s423_s0 + $0x58] sm:$0xff]  ;;  %v27_v48 = vld [vmem:[%s423_s0 + $0x68] sm:$0xff] }
   0x6   :  { %v63_v19 = vadd.f32 %v325_v5, %v40_v9  ;;  %v65_v29 = vadd.f32 %v325_v5, %v42_v16  ;;  %v66_v33 = vadd.f32 %v325_v5, %v43_v20  ;;  %v67_v40 = vadd.f32 %v325_v5, %v44_v21  ;;  %v26_v47 = vld [vmem:[%s423_s0 + $0x60] sm:$0xff]  ;;  %v28_v60 = vld [vmem:[%s423_s0 + $0x70] sm:$0xff]  ;;  %v29_v7 = vld [vmem:[%s423_s0 + $0x78] sm:$0xff] }
   0x7   :  { %vm76_vm0 = vcmp.gt.f32.partialorder %v60_v13, 0.0  ;;  %vm77_vm1 = vcmp.gt.f32.partialorder %v61_v14, 0.0  ;;  %v92_v22 = vmul.f32 0.2, %v60_v13  ;;  %v93_v23 = vmul.f32 0.2, %v61_v14 }
   0x8   :  { %vm78_vm2 = vcmp.gt.f32.partialorder %v62_v18, 0.0  ;;  %vm79_vm3 = vcmp.gt.f32.partialorder %v63_v19, 0.0  ;;  %v94_v24 = vmul.f32 0.2, %v62_v18  ;;  %v95_v25 = vmul.f32 0.2, %v63_v19 }
   0x9   :  { %v108_v26 = vsel %vm76_vm0, %v60_v13, %v92_v22  ;;  %v109_v27 = vsel %vm77_vm1, %v61_v14, %v93_v23  ;;  %v64_v28 = vadd.f32 %v325_v5, %v41_v15  ;;  %vm81_vm5 = vcmp.gt.f32.partialorder %v65_v29, 0.0 }
   0xa   :  { %v245_v30 = vpack.c.bf16 %v109_v27, %v108_v26  ;;  %v110_v31 = vsel %vm78_vm2, %v62_v18, %v94_v24  ;;  %v111_v32 = vsel %vm79_vm3, %v63_v19, %v95_v25  ;;  %v97_v39 = vmul.f32 0.2, %v65_v29 }
   0xb   :  { %v250_v37 = vpack.c.bf16 %v111_v32, %v110_v31  ;;  %vm80_vm4 = vcmp.gt.f32.partialorder %v64_v28, 0.0  ;;  %v96_v38 = vmul.f32 0.2, %v64_v28  ;;  %vm82_vm6 = vcmp.gt.f32.partialorder %v66_v33, 0.0 }
   0xc   :  { %246 = vst [vmem:[%s426_s3] sm:$0xff] %v245_v30   ;;  %v98_v41 = vmul.f32 0.2, %v66_v33  ;;  %v45_v44 = vmul.f32 %v318_v2, %v22_v34  ;;  %v46_v45 = vmul.f32 %v318_v2, %v23_v35  ;;  %v47_v46 = vmul.f32 %v318_v2, %v24_v36 }
   0xd   :  { %282 = vst [vmem:[%s426_s3 + $0x8] sm:$0xff] %v250_v37   ;;  %v112_v43 = vsel %vm80_vm4, %v64_v28, %v96_v38  ;;  %v113_v49 = vsel %vm81_vm5, %v65_v29, %v97_v39  ;;  %vm83_vm7 = vcmp.gt.f32.partialorder %v67_v40, 0.0  ;;  %v99_v50 = vmul.f32 0.2, %v67_v40 }
   0xe   :  { %v114_v51 = vsel %vm82_vm6, %v66_v33, %v98_v41  ;;  %v255_v52 = vpack.c.bf16 %v113_v49, %v112_v43  ;;  %v68_v53 = vadd.f32 %v325_v5, %v45_v44  ;;  %v69_v54 = vadd.f32 %v325_v5, %v46_v45 }
   0xf   :  { %v48_v55 = vmul.f32 %v318_v2, %v25_v42  ;;  %v115_v56 = vsel %vm83_vm7, %v67_v40, %v99_v50  ;;  %v70_v57 = vadd.f32 %v325_v5, %v47_v46  ;;  %v49_v58 = vmul.f32 %v318_v2, %v26_v47 }
  0x10   :  { %v50_v59 = vmul.f32 %v318_v2, %v27_v48  ;;  %283 = vst [vmem:[%s426_s3 + $0x10] sm:$0xff] %v255_v52   ;;  %v260_v61 = vpack.c.bf16 %v115_v56, %v114_v51  ;;  %vm84_vm8 = vcmp.gt.f32.partialorder %v68_v53, 0.0  ;;  %vm85_vm9 = vcmp.gt.f32.partialorder %v69_v54, 0.0 }
  0x11   :  { %v100_v62 = vmul.f32 0.2, %v68_v53  ;;  %v101_v63 = vmul.f32 0.2, %v69_v54  ;;  %v71_v0 = vadd.f32 %v325_v5, %v48_v55  ;;  %vm86_vm10 = vcmp.gt.f32.partialorder %v70_v57, 0.0 }
  0x12   :  { %v102_v1 = vmul.f32 0.2, %v70_v57  ;;  %284 = vst [vmem:[%s426_s3 + $0x18] sm:$0xff] %v260_v61   ;;  %v72_v4 = vadd.f32 %v325_v5, %v49_v58  ;;  %v73_v6 = vadd.f32 %v325_v5, %v50_v59  ;;  %v51_v8 = vmul.f32 %v318_v2, %v28_v60 }
  0x13   :  { %v116_v3 = vsel %vm84_vm8, %v68_v53, %v100_v62  ;;  %v117_v9 = vsel %vm85_vm9, %v69_v54, %v101_v63  ;;  %vm87_vm11 = vcmp.gt.f32.partialorder %v71_v0, 0.0  ;;  %v103_v10 = vmul.f32 0.2, %v71_v0 }
  0x14   :  { %v118_v11 = vsel %vm86_vm10, %v70_v57, %v102_v1  ;;  %v265_v12 = vpack.c.bf16 %v117_v9, %v116_v3  ;;  %vm88_vm12 = vcmp.gt.f32.partialorder %v72_v4, 0.0  ;;  %vm89_vm13 = vcmp.gt.f32.partialorder %v73_v6, 0.0 }
  0x15   :  { %v104_v13 = vmul.f32 0.2, %v72_v4  ;;  %v119_v14 = vsel %vm87_vm11, %v71_v0, %v103_v10  ;;  %v105_v15 = vmul.f32 0.2, %v73_v6  ;;  %v52_v16 = vmul.f32 %v318_v2, %v29_v7 }
  0x16   :  { %v74_v17 = vadd.f32 %v325_v5, %v51_v8  ;;  %285 = vst [vmem:[%s426_s3 + $0x20] sm:$0xff] %v265_v12   ;;  %v270_v18 = vpack.c.bf16 %v119_v14, %v118_v11 }
  0x17   :  { %v120_v19 = vsel %vm88_vm12, %v72_v4, %v104_v13  ;;  %v121_v20 = vsel %vm89_vm13, %v73_v6, %v105_v15  ;;  %v75_v21 = vadd.f32 %v325_v5, %v52_v16 }
  0x18   :  { %vm90_vm14 = vcmp.gt.f32.partialorder %v74_v17, 0.0  ;;  %v106_v22 = vmul.f32 0.2, %v74_v17  ;;  %286 = vst [vmem:[%s426_s3 + $0x28] sm:$0xff] %v270_v18   ;;  %v275_v23 = vpack.c.bf16 %v121_v20, %v120_v19 }
  0x19   :  { %vm91_vm15 = vcmp.gt.f32.partialorder %v75_v21, 0.0  ;;  %v107_v2 = vmul.f32 0.2, %v75_v21 }
  0x1a   :  { %v122_v24 = vsel %vm90_vm14, %v74_v17, %v106_v22  ;;  %287 = vst [vmem:[%s426_s3 + $0x30] sm:$0xff] %v275_v23  }
  0x1b   :  { %v123_v25 = vsel %vm91_vm15, %v75_v21, %v107_v2 }
  0x1c   :  { %v280_v26 = vpack.c.bf16 %v123_v25, %v122_v24 }
  0x1e   :  { %288 = vst [vmem:[%s426_s3 + $0x38] sm:$0xff] %v280_v26  }

// kernel: discriminator_forward.13
= control target key start
LH: loop header
LB: loop body
LE: loop exit
PB: predicated region body
PF: predicated region fallthrough
CT: control target
= control target key end

     0   :  { %v608_v40 = vmov 0.0   ;;  %s784_s1 = inlined_call_operand.vmem [shape: bf16[512,128], index: 1, kind: input, shape index: {}]   ;;  %s785_s0 = inlined_call_operand.vmem [shape: bf16[32,512], index: 0, kind: input, shape index: {}]   ;;  %s786_s3 = inlined_call_operand.vmem [shape: f32[1,128], index: 3, kind: output, shape index: {1}]   ;;  %s787_s4 = inlined_call_operand.vmem [shape: f32[1,128], index: 4, kind: output, shape index: {2}]   ;;  %s788_s2 = inlined_call_operand.vmem [shape: f32[32,128], index: 2, kind: output, shape index: {0}]  }
   0x1   :  { %v564_v0 = vld [vmem:[%s784_s1 + $0x40] sm:$0xff]   ;;  %v568_v4 = vld [vmem:[%s784_s1 + $0x48] sm:$0xff]   ;;  %v572_v8 = vld [vmem:[%s784_s1 + $0x50] sm:$0xff]   ;;  %425 = vst [vmem:[%s786_s3] sm:$0x1] %v608_v40 }
   0x2   :  { %v565_v1 = vld [vmem:[%s784_s1 + $0xc0] sm:$0xff]   ;;  %507 = vmatprep.subr.bf16.mxu0 %v564_v0  ;;  %v569_v5 = vld [vmem:[%s784_s1 + $0xc8] sm:$0xff]   ;;  %v573_v9 = vld [vmem:[%s784_s1 + $0xd0] sm:$0xff]   ;;  %426 = vst [vmem:[%s787_s4] sm:$0x1] %v608_v40 }
   0x3   :  { %v566_v2 = vld [vmem:[%s784_s1] sm:$0xff]   ;;  %535 = vmatprep.subr.bf16.mxu1 %v565_v1  ;;  %v570_v6 = vld [vmem:[%s784_s1 + $0x8] sm:$0xff]   ;;  %v574_v10 = vld [vmem:[%s784_s1 + $0x10] sm:$0xff]  }
   0x4   :  { %v567_v3 = vld [vmem:[%s784_s1 + $0x80] sm:$0xff]   ;;  %508 = vmatpush3.bf16.msra.mxu0 %v566_v2  ;;  %v571_v7 = vld [vmem:[%s784_s1 + $0x88] sm:$0xff]   ;;  %v575_v11 = vld [vmem:[%s784_s1 + $0x90] sm:$0xff]  }
   0x5   :  { %536 = vmatpush3.bf16.msra.mxu1 %v567_v3  ;;  %509 = vmatprep.subr.bf16.mxu0 %v568_v4  ;;  %v576_v12 = vld [vmem:[%s784_s1 + $0x58] sm:$0xff]   ;;  %v580_v16 = vld [vmem:[%s784_s1 + $0x60] sm:$0xff]   ;;  %v584_v20 = vld [vmem:[%s784_s1 + $0x68] sm:$0xff]  }
   0x6   :  { %537 = vmatprep.subr.bf16.mxu1 %v569_v5  ;;  %v577_v13 = vld [vmem:[%s784_s1 + $0xd8] sm:$0xff]   ;;  %v581_v17 = vld [vmem:[%s784_s1 + $0xe0] sm:$0xff]   ;;  %v585_v21 = vld [vmem:[%s784_s1 + $0xe8] sm:$0xff]  }
   0x7   :  { %v578_v14 = vld [vmem:[%s784_s1 + $0x18] sm:$0xff]   ;;  %v582_v18 = vld [vmem:[%s784_s1 + $0x20] sm:$0xff]   ;;  %v586_v22 = vld [vmem:[%s784_s1 + $0x28] sm:$0xff]  }
   0x8   :  { %510 = vmatpush3.bf16.msra.mxu0 %v570_v6  ;;  %v579_v15 = vld [vmem:[%s784_s1 + $0x98] sm:$0xff]   ;;  %v583_v19 = vld [vmem:[%s784_s1 + $0xa0] sm:$0xff]   ;;  %v587_v23 = vld [vmem:[%s784_s1 + $0xa8] sm:$0xff]  }
   0x9   :  { %538 = vmatpush3.bf16.msra.mxu1 %v571_v7  ;;  %511 = vmatprep.subr.bf16.mxu0 %v572_v8  ;;  %v588_v24 = vld [vmem:[%s784_s1 + $0x70] sm:$0xff]   ;;  %v592_v28 = vld [vmem:[%s784_s1 + $0x78] sm:$0xff]  }
   0xa   :  { %539 = vmatprep.subr.bf16.mxu1 %v573_v9  ;;  %v589_v25 = vld [vmem:[%s784_s1 + $0xf0] sm:$0xff]   ;;  %v593_v29 = vld [vmem:[%s784_s1 + $0xf8] sm:$0xff]  }
   0xb   :  { %v590_v26 = vld [vmem:[%s784_s1 + $0x30] sm:$0xff]   ;;  %v594_v30 = vld [vmem:[%s784_s1 + $0x38] sm:$0xff]  }
   0xc   :  { %512 = vmatpush3.bf16.msra.mxu0 %v574_v10  ;;  %v591_v27 = vld [vmem:[%s784_s1 + $0xb0] sm:$0xff]   ;;  %v595_v31 = vld [vmem:[%s784_s1 + $0xb8] sm:$0xff]  }
   0xd   :  { %540 = vmatpush3.bf16.msra.mxu1 %v575_v11  ;;  %513 = vmatprep.subr.bf16.mxu0 %v576_v12  ;;  %v596_v32 = vld [vmem:[%s785_s0] ss:$16 sps:$4 sm:$0xff]   ;;  %v598_v33 = vld [vmem:[%s785_s0 + $0x4] ss:$16 sps:$4 sm:$0xff]   ;;  %v599_v34 = vld [vmem:[%s785_s0 + $0x8] ss:$16 sps:$4 sm:$0xff]  }
   0xe   :  { %541 = vmatprep.subr.bf16.mxu1 %v577_v13  ;;  %v601_v35 = vld [vmem:[%s785_s0 + $0xc] ss:$16 sps:$4 sm:$0xff]   ;;  %351 = vmatprep.mubr.bf16.mxu0 %v598_v33  ;;  %v602_v36 = vld [vmem:[%s785_s0 + $0x24] ss:$16 sps:$4 sm:$0xff]   ;;  %v606_v38 = vld [vmem:[%s785_s0 + $0x20] ss:$16 sps:$4 sm:$0xff]  }
   0xf   :  { %400 = vmatprep.mubr.bf16.mxu1 %v601_v35  ;;  %v604_v37 = vld [vmem:[%s785_s0 + $0x2c] ss:$16 sps:$4 sm:$0xff]   ;;  %v607_v39 = vld [vmem:[%s785_s0 + $0x28] ss:$16 sps:$4 sm:$0xff]  }
  0x10   :  { %514 = vmatpush3.bf16.msra.mxu0 %v578_v14 }
  0x11   :  { %542 = vmatpush3.bf16.msra.mxu1 %v579_v15  ;;  %515 = vmatprep.subr.bf16.mxu0 %v580_v16 }
  0x12   :  { %543 = vmatprep.subr.bf16.mxu1 %v581_v17 }
  0x14   :  { %516 = vmatpush3.bf16.msra.mxu0 %v582_v18 }
  0x15   :  { %544 = vmatpush3.bf16.msra.mxu1 %v583_v19  ;;  %517 = vmatprep.subr.bf16.mxu0 %v584_v20 }
  0x16   :  { %545 = vmatprep.subr.bf16.mxu1 %v585_v21 }
  0x18   :  { %518 = vmatpush3.bf16.msra.mxu0 %v586_v22 }
  0x19   :  { %546 = vmatpush3.bf16.msra.mxu1 %v587_v23  ;;  %519 = vmatprep.subr.bf16.mxu0 %v588_v24  ;;  %v427_v24 = vld [vmem:[%s786_s3] sm:$0x1] }
  0x1a   :  { %547 = vmatprep.subr.bf16.mxu1 %v589_v25 }
  0x1c   :  { %520 = vmatpush3.bf16.msra.mxu0 %v590_v26 }
  0x1d   :  { %548 = vmatpush3.bf16.msra.mxu1 %v591_v27  ;;  %521 = vmatprep.subr.bf16.mxu0 %v592_v28  ;;  %v439_v27 = vld [vmem:[%s787_s4] sm:$0x1] }
  0x1e   :  { %549 = vmatprep.subr.bf16.mxu1 %v593_v29 }
  0x20   :  { %522 = vmatpush3.bf16.msra.mxu0 %v594_v30 }
  0x21   :  { %550 = vmatpush3.bf16.msra.mxu1 %v595_v31 }
  0x23   :  { %352 = vmatmul.mubr.bf16.vlgmr.msra.gmra.mrb[0].mxu0 %v596_v32 }
  0x24   :  { %401 = vmatmul.mubr.bf16.vlgmr.msra.gmra.mrb[0].mxu1 %v599_v34  ;;  %359 = vmatprep.mubr.bf16.mxu0 %v602_v36 }
  0x25   :  { %408 = vmatprep.mubr.bf16.mxu1 %v604_v37 }
  0x2b   :  { %360 = vmatmul.mubr.bf16.gmra.mrb[4].mxu0 %v606_v38 }
  0x2c   :  { %409 = vmatmul.mubr.bf16.gmra.mrb[4].mxu1 %v607_v39 }
  0xf6   :  { %v523_v41 = vpop.f32.mrb[0].mxu0 }
  0xf7   :  { %v551_v42 = vpop.f32.mrb[0].mxu1  ;;  %v524_v43 = vpop.f32.mrb[1].mxu0 }
  0xf8   :  { %v525_v44 = vadd.f32 %v524_v43, %v523_v41  ;;  %v552_v45 = vpop.f32.mrb[1].mxu1  ;;  %v526_v46 = vpop.f32.mrb[2].mxu0 }
  0xf9   :  { %v553_v47 = vadd.f32 %v552_v45, %v551_v42  ;;  %v554_v48 = vpop.f32.mrb[2].mxu1  ;;  %v527_v49 = vpop.f32.mrb[3].mxu0 }
  0xfa   :  { %v528_v50 = vadd.f32 %v527_v49, %v526_v46  ;;  %v555_v51 = vpop.f32.mrb[3].mxu1 }
  0xfb   :  { %v403_v52 = vadd.f32 %v553_v47, %v525_v44  ;;  %v556_v53 = vadd.f32 %v555_v51, %v554_v48 }
  0xfd   :  { %417 = vst [vmem:[%s788_s2] sm:$0xff] %v403_v52  ;;  %v406_v54 = vadd.f32 %v556_v53, %v528_v50  ;;  %v440_v56 = vmul.f32 %v403_v52, %v403_v52 }
  0xfe   :  { %v529_v55 = vpop.f32.mrb[4].mxu0 }
  0xff   :  { %418 = vst [vmem:[%s788_s2 + $0x8] sm:$0xff] %v406_v54  ;;  %v428_v57 = vadd.f32 %v406_v54, %v403_v52  ;;  %v441_v58 = vmul.f32 %v406_v54, %v406_v54  ;;  %v557_v59 = vpop.f32.mrb[4].mxu1  ;;  %v530_v60 = vpop.f32.mrb[5].mxu0 }
 0x100   :  { %v531_v61 = vadd.f32 %v530_v60, %v529_v55  ;;  %v558_v62 = vpop.f32.mrb[5].mxu1  ;;  %v532_v63 = vpop.f32.mrb[6].mxu0 }
 0x101   :  { %v444_v0 = vadd.f32 %v441_v58, %v440_v56  ;;  %v559_v1 = vadd.f32 %v558_v62, %v557_v59  ;;  %v560_v2 = vpop.f32.mrb[6].mxu1  ;;  %v533_v3 = vpop.f32.mrb[7].mxu0 }
 0x102   :  { %v534_v4 = vadd.f32 %v533_v3, %v532_v63  ;;  %v561_v5 = vpop.f32.mrb[7].mxu1 }
 0x103   :  { %v411_v6 = vadd.f32 %v559_v1, %v531_v61  ;;  %v562_v7 = vadd.f32 %v561_v5, %v560_v2 }
 0x105   :  { %419 = vst [vmem:[%s788_s2 + $0x10] sm:$0xff] %v411_v6  ;;  %v429_v8 = vadd.f32 %v428_v57, %v411_v6  ;;  %v442_v9 = vmul.f32 %v411_v6, %v411_v6  ;;  %v414_v10 = vadd.f32 %v562_v7, %v534_v4 }
 0x107   :  { %v445_v11 = vadd.f32 %v444_v0, %v442_v9  ;;  %420 = vst [vmem:[%s788_s2 + $0x18] sm:$0xff] %v414_v10  ;;  %v430_v12 = vadd.f32 %v429_v8, %v414_v10  ;;  %v443_v13 = vmul.f32 %v414_v10, %v414_v10 }
 0x109   :  { %v431_v14 = vrot.slane %v430_v12, 4  ;;  %v446_v15 = vadd.f32 %v445_v11, %v443_v13 }
 0x10b   :  { %v432_v16 = vadd.f32 %v431_v14, %v430_v12  ;;  %v447_v17 = vrot.slane %v446_v15, 4 }
 0x10d   :  { %v433_v18 = vrot.slane %v432_v16, 2  ;;  %v448_v19 = vadd.f32 %v447_v17, %v446_v15 }
 0x10f   :  { %v434_v20 = vadd.f32 %v433_v18, %v432_v16  ;;  %v449_v21 = vrot.slane %v448_v19, 2 }
 0x111   :  { %v435_v22 = vrot.slane %v434_v20, 1  ;;  %v450_v23 = vadd.f32 %v449_v21, %v448_v19 }
 0x113   :  { %v436_v25 = vadd.f32 %v435_v22, %v434_v20  ;;  %v451_v26 = vrot.slane %v450_v23, 1 }
 0x115   :  { %v437_v28 = vadd.f32 %v436_v25, %v427_v24  ;;  %v452_v29 = vadd.f32 %v451_v26, %v450_v23 }
 0x117   :  { %438 = vst [vmem:[%s786_s3] sm:$0x1] %v437_v28  ;;  %v453_v30 = vadd.f32 %v452_v29, %v439_v27 }
 0x119   :  { %454 = vst [vmem:[%s787_s4] sm:$0x1] %v453_v30 }

// kernel: discriminator_forward.14
= control target key start
LH: loop header
LB: loop body
LE: loop exit
PB: predicated region body
PF: predicated region fallthrough
CT: control target
= control target key end

     0   :  { %s141_s0 = inlined_call_operand.vmem [shape: f32[32,128], index: 0, kind: input, shape index: {}]   ;;  %s142_s1 = inlined_call_operand.vmem [shape: f32[1,128], index: 1, kind: input, shape index: {}]   ;;  %s143_s2 = inlined_call_operand.vmem [shape: f32[1,128], index: 2, kind: input, shape index: {}]   ;;  %s144_s3 = inlined_call_operand.vmem [shape: bf16[32,128], index: 3, kind: output, shape index: {}]  }
   0x1   :  { %v14_v0 = vld [vmem:[%s141_s0] sm:$0xff]  ;;  %v15_v1 = vld [vmem:[%s141_s0 + $0x8] sm:$0xff]  ;;  %v16_v6 = vld [vmem:[%s141_s0 + $0x10] sm:$0xff] }
   0x2   :  { %v76_v2 = vld [vmem:[%s142_s1] ss:$0 sm:$0xff]  ;;  %v17_v7 = vld [vmem:[%s141_s0 + $0x18] sm:$0xff] }
   0x3   :  { %v25_v3 = vmul.f32 %v76_v2, %v14_v0  ;;  %v26_v4 = vmul.f32 %v76_v2, %v15_v1  ;;  %v77_v5 = vld [vmem:[%s143_s2] ss:$0 sm:$0xff]  ;;  %v27_v8 = vmul.f32 %v76_v2, %v16_v6  ;;  %v28_v9 = vmul.f32 %v76_v2, %v17_v7 }
   0x5   :  { %v36_v10 = vadd.f32 %v77_v5, %v25_v3  ;;  %v37_v11 = vadd.f32 %v77_v5, %v26_v4  ;;  %v38_v12 = vadd.f32 %v77_v5, %v27_v8  ;;  %v39_v13 = vadd.f32 %v77_v5, %v28_v9 }
   0x7   :  { %vm40_vm0 = vcmp.gt.f32.partialorder %v36_v10, 0.0  ;;  %vm41_vm1 = vcmp.gt.f32.partialorder %v37_v11, 0.0  ;;  %v44_v14 = vmul.f32 0.2, %v36_v10  ;;  %v45_v15 = vmul.f32 0.2, %v37_v11 }
   0x8   :  { %vm42_vm2 = vcmp.gt.f32.partialorder %v38_v12, 0.0  ;;  %vm43_vm3 = vcmp.gt.f32.partialorder %v39_v13, 0.0  ;;  %v46_v16 = vmul.f32 0.2, %v38_v12  ;;  %v47_v17 = vmul.f32 0.2, %v39_v13 }
   0x9   :  { %v48_v18 = vsel %vm40_vm0, %v36_v10, %v44_v14  ;;  %v49_v19 = vsel %vm41_vm1, %v37_v11, %v45_v15 }
   0xa   :  { %v89_v20 = vpack.c.bf16 %v49_v19, %v48_v18  ;;  %v50_v21 = vsel %vm42_vm2, %v38_v12, %v46_v16  ;;  %v51_v22 = vsel %vm43_vm3, %v39_v13, %v47_v17 }
   0xb   :  { %v94_v23 = vpack.c.bf16 %v51_v22, %v50_v21 }
   0xc   :  { %90 = vst [vmem:[%s144_s3] sm:$0xff] %v89_v20  }
   0xd   :  { %96 = vst [vmem:[%s144_s3 + $0x8] sm:$0xff] %v94_v23  }

// kernel: discriminator_forward.15
= control target key start
LH: loop header
LB: loop body
LE: loop exit
PB: predicated region body
PF: predicated region fallthrough
CT: control target
= control target key end

     0   :  { %s1190_s1 = inlined_call_operand.vmem [shape: bf16[1024,128], index: 1, kind: input, shape index: {}]   ;;  %s1191_s0 = inlined_call_operand.vmem [shape: bf16[8,1024], index: 0, kind: input, shape index: {}]   ;;  %s1192_s2 = inlined_call_operand.vmem [shape: f32[8,128], index: 2, kind: output, shape index: {}]  }
   0x1   :  { %v892_v0 = vld [vmem:[%s1190_s1 + $0x40] sm:$0xff]   ;;  %v896_v4 = vld [vmem:[%s1190_s1 + $0x48] sm:$0xff]   ;;  %v900_v8 = vld [vmem:[%s1190_s1 + $0x50] sm:$0xff]  }
   0x2   :  { %v893_v1 = vld [vmem:[%s1190_s1 + $0xc0] sm:$0xff]   ;;  %804 = vmatprep.subr.bf16.mxu0 %v892_v0  ;;  %v897_v5 = vld [vmem:[%s1190_s1 + $0xc8] sm:$0xff]   ;;  %v901_v9 = vld [vmem:[%s1190_s1 + $0xd0] sm:$0xff]  }
   0x3   :  { %v894_v2 = vld [vmem:[%s1190_s1] sm:$0xff]   ;;  %826 = vmatprep.subr.bf16.mxu1 %v893_v1  ;;  %v898_v6 = vld [vmem:[%s1190_s1 + $0x8] sm:$0xff]   ;;  %v902_v10 = vld [vmem:[%s1190_s1 + $0x10] sm:$0xff]  }
   0x4   :  { %v895_v3 = vld [vmem:[%s1190_s1 + $0x80] sm:$0xff]   ;;  %805 = vmatpush3.bf16.msra.mxu0 %v894_v2  ;;  %v899_v7 = vld [vmem:[%s1190_s1 + $0x88] sm:$0xff]   ;;  %v903_v11 = vld [vmem:[%s1190_s1 + $0x90] sm:$0xff]  }
   0x5   :  { %827 = vmatpush3.bf16.msra.mxu1 %v895_v3  ;;  %806 = vmatprep.subr.bf16.mxu0 %v896_v4  ;;  %v904_v12 = vld [vmem:[%s1190_s1 + $0x58] sm:$0xff]   ;;  %v908_v16 = vld [vmem:[%s1190_s1 + $0x60] sm:$0xff]   ;;  %v912_v20 = vld [vmem:[%s1190_s1 + $0x68] sm:$0xff]  }
   0x6   :  { %828 = vmatprep.subr.bf16.mxu1 %v897_v5  ;;  %v905_v13 = vld [vmem:[%s1190_s1 + $0xd8] sm:$0xff]   ;;  %v909_v17 = vld [vmem:[%s1190_s1 + $0xe0] sm:$0xff]   ;;  %v913_v21 = vld [vmem:[%s1190_s1 + $0xe8] sm:$0xff]  }
   0x7   :  { %v906_v14 = vld [vmem:[%s1190_s1 + $0x18] sm:$0xff]   ;;  %v910_v18 = vld [vmem:[%s1190_s1 + $0x20] sm:$0xff]   ;;  %v914_v22 = vld [vmem:[%s1190_s1 + $0x28] sm:$0xff]  }
   0x8   :  { %807 = vmatpush3.bf16.msra.mxu0 %v898_v6  ;;  %v907_v15 = vld [vmem:[%s1190_s1 + $0x98] sm:$0xff]   ;;  %v911_v19 = vld [vmem:[%s1190_s1 + $0xa0] sm:$0xff]   ;;  %v915_v23 = vld [vmem:[%s1190_s1 + $0xa8] sm:$0xff]  }
   0x9   :  { %829 = vmatpush3.bf16.msra.mxu1 %v899_v7  ;;  %808 = vmatprep.subr.bf16.mxu0 %v900_v8  ;;  %v916_v24 = vld [vmem:[%s1190_s1 + $0x70] sm:$0xff]   ;;  %v920_v28 = vld [vmem:[%s1190_s1 + $0x78] sm:$0xff]   ;;  %v12_v32 = vld [vmem:[%s1191_s0] sm:$0xff] }
   0xa   :  { %830 = vmatprep.subr.bf16.mxu1 %v901_v9  ;;  %v917_v25 = vld [vmem:[%s1190_s1 + $0xf0] sm:$0xff]   ;;  %v921_v29 = vld [vmem:[%s1190_s1 + $0xf8] sm:$0xff]   ;;  %v13_v33 = vld [vmem:[%s1191_s0 + $0x8] sm:$0xff]  ;;  %v732_v34 = vcombine.low %v12_v32, %v12_v32  ;;  %v733_v35 = vcombine.high %v12_v32, %v12_v32 }
   0xb   :  { %v918_v26 = vld [vmem:[%s1190_s1 + $0x30] sm:$0xff]   ;;  %v922_v30 = vld [vmem:[%s1190_s1 + $0x38] sm:$0xff]   ;;  %v734_v36 = vcombine.low %v13_v33, %v13_v33  ;;  %v735_v37 = vcombine.high %v13_v33, %v13_v33  ;;  %v928_v38 = vld [vmem:[%s1190_s1 + $0x140] sm:$0xff]  }
   0xc   :  { %809 = vmatpush3.bf16.msra.mxu0 %v902_v10  ;;  %v919_v27 = vld [vmem:[%s1190_s1 + $0xb0] sm:$0xff]   ;;  %v923_v31 = vld [vmem:[%s1190_s1 + $0xb8] sm:$0xff]   ;;  %v929_v39 = vld [vmem:[%s1190_s1 + $0x1c0] sm:$0xff]   ;;  %588 = vmatprep.mubr.bf16.mxu0 %v733_v35 }
   0xd   :  { %831 = vmatpush3.bf16.msra.mxu1 %v903_v11  ;;  %810 = vmatprep.subr.bf16.mxu0 %v904_v12  ;;  %v930_v40 = vld [vmem:[%s1190_s1 + $0x100] sm:$0xff]   ;;  %v932_v42 = vld [vmem:[%s1190_s1 + $0x148] sm:$0xff]   ;;  %v936_v46 = vld [vmem:[%s1190_s1 + $0x150] sm:$0xff]  }
   0xe   :  { %832 = vmatprep.subr.bf16.mxu1 %v905_v13  ;;  %628 = vmatprep.mubr.bf16.mxu1 %v735_v37  ;;  %v931_v41 = vld [vmem:[%s1190_s1 + $0x180] sm:$0xff]   ;;  %v933_v43 = vld [vmem:[%s1190_s1 + $0x1c8] sm:$0xff]   ;;  %v937_v47 = vld [vmem:[%s1190_s1 + $0x1d0] sm:$0xff]  }
   0xf   :  { %v934_v44 = vld [vmem:[%s1190_s1 + $0x108] sm:$0xff]   ;;  %v938_v48 = vld [vmem:[%s1190_s1 + $0x110] sm:$0xff]   ;;  %v940_v50 = vld [vmem:[%s1190_s1 + $0x158] sm:$0xff]  }
  0x10   :  { %811 = vmatpush3.bf16.msra.mxu0 %v906_v14  ;;  %v935_v45 = vld [vmem:[%s1190_s1 + $0x188] sm:$0xff]   ;;  %v939_v49 = vld [vmem:[%s1190_s1 + $0x190] sm:$0xff]   ;;  %v941_v51 = vld [vmem:[%s1190_s1 + $0x1d8] sm:$0xff]  }
  0x11   :  { %833 = vmatpush3.bf16.msra.mxu1 %v907_v15  ;;  %812 = vmatprep.subr.bf16.mxu0 %v908_v16  ;;  %v942_v52 = vld [vmem:[%s1190_s1 + $0x118] sm:$0xff]   ;;  %v944_v54 = vld [vmem:[%s1190_s1 + $0x160] sm:$0xff]   ;;  %v948_v58 = vld [vmem:[%s1190_s1 + $0x168] sm:$0xff]  }
  0x12   :  { %834 = vmatprep.subr.bf16.mxu1 %v909_v17  ;;  %v943_v53 = vld [vmem:[%s1190_s1 + $0x198] sm:$0xff]   ;;  %v945_v55 = vld [vmem:[%s1190_s1 + $0x1e0] sm:$0xff]   ;;  %v949_v59 = vld [vmem:[%s1190_s1 + $0x1e8] sm:$0xff]  }
  0x13   :  { %v946_v56 = vld [vmem:[%s1190_s1 + $0x120] sm:$0xff]   ;;  %v950_v60 = vld [vmem:[%s1190_s1 + $0x128] sm:$0xff]   ;;  %v952_v62 = vld [vmem:[%s1190_s1 + $0x170] sm:$0xff]  }
  0x14   :  { %813 = vmatpush3.bf16.msra.mxu0 %v910_v18  ;;  %v947_v57 = vld [vmem:[%s1190_s1 + $0x1a0] sm:$0xff]   ;;  %v951_v61 = vld [vmem:[%s1190_s1 + $0x1a8] sm:$0xff]   ;;  %v953_v63 = vld [vmem:[%s1190_s1 + $0x1f0] sm:$0xff]  }
  0x15   :  { %835 = vmatpush3.bf16.msra.mxu1 %v911_v19  ;;  %814 = vmatprep.subr.bf16.mxu0 %v912_v20  ;;  %v954_v0 = vld [vmem:[%s1190_s1 + $0x130] sm:$0xff]   ;;  %v956_v2 = vld [vmem:[%s1190_s1 + $0x178] sm:$0xff]  }
  0x16   :  { %836 = vmatprep.subr.bf16.mxu1 %v913_v21  ;;  %v955_v1 = vld [vmem:[%s1190_s1 + $0x1b0] sm:$0xff]   ;;  %v957_v3 = vld [vmem:[%s1190_s1 + $0x1f8] sm:$0xff]  }
  0x17   :  { %v958_v4 = vld [vmem:[%s1190_s1 + $0x138] sm:$0xff]   ;;  %v14_v6 = vld [vmem:[%s1191_s0 + $0x10] sm:$0xff] }
  0x18   :  { %815 = vmatpush3.bf16.msra.mxu0 %v914_v22  ;;  %v959_v5 = vld [vmem:[%s1190_s1 + $0x1b8] sm:$0xff]   ;;  %v736_v7 = vcombine.low %v14_v6, %v14_v6  ;;  %v737_v8 = vcombine.high %v14_v6, %v14_v6 }
  0x19   :  { %837 = vmatpush3.bf16.msra.mxu1 %v915_v23  ;;  %816 = vmatprep.subr.bf16.mxu0 %v916_v24  ;;  %v15_v9 = vld [vmem:[%s1191_s0 + $0x18] sm:$0xff] }
  0x1a   :  { %838 = vmatprep.subr.bf16.mxu1 %v917_v25  ;;  %v738_v10 = vcombine.low %v15_v9, %v15_v9  ;;  %v739_v11 = vcombine.high %v15_v9, %v15_v9 }
  0x1c   :  { %817 = vmatpush3.bf16.msra.mxu0 %v918_v26 }
  0x1d   :  { %839 = vmatpush3.bf16.msra.mxu1 %v919_v27  ;;  %818 = vmatprep.subr.bf16.mxu0 %v920_v28 }
  0x1e   :  { %840 = vmatprep.subr.bf16.mxu1 %v921_v29 }
  0x20   :  { %819 = vmatpush3.bf16.msra.mxu0 %v922_v30 }
  0x21   :  { %841 = vmatpush3.bf16.msra.mxu1 %v923_v31  ;;  %848 = vmatprep.subr.bf16.mxu0 %v928_v38 }
  0x22   :  { %870 = vmatprep.subr.bf16.mxu1 %v929_v39 }
  0x23   :  { %589 = vmatmul.mubr.bf16.vlgmr.msra.gmra.mrb[0].mxu0 %v732_v34 }
  0x24   :  { %629 = vmatmul.mubr.bf16.vlgmr.msra.gmra.mrb[0].mxu1 %v734_v36  ;;  %849 = vmatpush3.bf16.msra.mxu0 %v930_v40 }
  0x25   :  { %871 = vmatpush3.bf16.msra.mxu1 %v931_v41  ;;  %850 = vmatprep.subr.bf16.mxu0 %v932_v42 }
  0x26   :  { %872 = vmatprep.subr.bf16.mxu1 %v933_v43  ;;  %668 = vmatprep.mubr.bf16.mxu0 %v737_v8 }
  0x27   :  { %708 = vmatprep.mubr.bf16.mxu1 %v739_v11 }
  0x28   :  { %851 = vmatpush3.bf16.msra.mxu0 %v934_v44 }
  0x29   :  { %873 = vmatpush3.bf16.msra.mxu1 %v935_v45  ;;  %852 = vmatprep.subr.bf16.mxu0 %v936_v46 }
  0x2a   :  { %874 = vmatprep.subr.bf16.mxu1 %v937_v47 }
  0x2c   :  { %853 = vmatpush3.bf16.msra.mxu0 %v938_v48 }
  0x2d   :  { %875 = vmatpush3.bf16.msra.mxu1 %v939_v49  ;;  %854 = vmatprep.subr.bf16.mxu0 %v940_v50 }
  0x2e   :  { %876 = vmatprep.subr.bf16.mxu1 %v941_v51 }
  0x30   :  { %855 = vmatpush3.bf16.msra.mxu0 %v942_v52 }
  0x31   :  { %877 = vmatpush3.bf16.msra.mxu1 %v943_v53  ;;  %856 = vmatprep.subr.bf16.mxu0 %v944_v54 }
  0x32   :  { %878 = vmatprep.subr.bf16.mxu1 %v945_v55 }
  0x34   :  { %857 = vmatpush3.bf16.msra.mxu0 %v946_v56 }
  0x35   :  { %879 = vmatpush3.bf16.msra.mxu1 %v947_v57  ;;  %858 = vmatprep.subr.bf16.mxu0 %v948_v58 }
  0x36   :  { %880 = vmatprep.subr.bf16.mxu1 %v949_v59 }
  0x38   :  { %859 = vmatpush3.bf16.msra.mxu0 %v950_v60 }
  0x39   :  { %881 = vmatpush3.bf16.msra.mxu1 %v951_v61  ;;  %860 = vmatprep.subr.bf16.mxu0 %v952_v62 }
  0x3a   :  { %882 = vmatprep.subr.bf16.mxu1 %v953_v63 }
  0x3c   :  { %861 = vmatpush3.bf16.msra.mxu0 %v954_v0 }
  0x3d   :  { %883 = vmatpush3.bf16.msra.mxu1 %v955_v1  ;;  %862 = vmatprep.subr.bf16.mxu0 %v956_v2 }
  0x3e   :  { %884 = vmatprep.subr.bf16.mxu1 %v957_v3 }
  0x40   :  { %863 = vmatpush3.bf16.msra.mxu0 %v958_v4 }
  0x41   :  { %885 = vmatpush3.bf16.msra.mxu1 %v959_v5 }
  0x43   :  { %669 = vmatmul.mubr.bf16.vlgmr.msra.gmra.mrb[4].mxu0 %v736_v7 }
  0x44   :  { %709 = vmatmul.mubr.bf16.vlgmr.msra.gmra.mrb[4].mxu1 %v738_v10 }
  0xf6   :  { %v820_v12 = vpop.f32.mrb[0].mxu0 }
  0xf7   :  { %v842_v13 = vpop.f32.mrb[0].mxu1  ;;  %v821_v14 = vpop.f32.mrb[1].mxu0 }
  0xf8   :  { %v843_v15 = vpop.f32.mrb[1].mxu1  ;;  %v822_v16 = vadd.f32 %v821_v14, %v820_v12  ;;  %v823_v18 = vpop.f32.mrb[2].mxu0 }
  0xf9   :  { %v844_v17 = vadd.f32 %v843_v15, %v842_v13  ;;  %v845_v19 = vpop.f32.mrb[2].mxu1  ;;  %v824_v20 = vpop.f32.mrb[3].mxu0 }
  0xfa   :  { %v846_v21 = vpop.f32.mrb[3].mxu1 }
  0xfb   :  { %v631_v22 = vadd.f32 %v844_v17, %v822_v16 }
 0x116   :  { %v864_v23 = vpop.f32.mrb[4].mxu0 }
 0x117   :  { %v886_v24 = vpop.f32.mrb[4].mxu1  ;;  %v865_v25 = vpop.f32.mrb[5].mxu0 }
 0x118   :  { %v887_v26 = vpop.f32.mrb[5].mxu1  ;;  %v866_v27 = vadd.f32 %v865_v25, %v864_v23  ;;  %v867_v29 = vpop.f32.mrb[6].mxu0 }
 0x119   :  { %v888_v28 = vadd.f32 %v887_v26, %v886_v24  ;;  %v889_v30 = vpop.f32.mrb[6].mxu1  ;;  %v868_v31 = vpop.f32.mrb[7].mxu0 }
 0x11a   :  { %v890_v32 = vpop.f32.mrb[7].mxu1  ;;  %v671_v33 = vadd.f32 %v866_v27, %v631_v22 }
 0x11c   :  { %v711_v34 = vadd.f32 %v888_v28, %v671_v33 }
 0x11e   :  { %v716_v35 = vand.u32 2147483647, %v711_v34  ;;  %vm722_vm0 = vcmp.ge.f32.partialorder %v711_v34, 0.0 }
 0x120   :  { %v717_v36 = vsub.f32 0.0, %v716_v35 }
 0x122   :  { %v718_v37 = vmul.f32 1.442695, %v717_v36 }
 0x124   :  { %964 = vpow2.f32 %v718_v37 }
 0x12e   :  { %v965_v38 = vpop.eup %964 }
 0x12f   :  { %v720_v39 = vadd.f32 1.0, %v965_v38 }
 0x131   :  { %966 = vrcp.f32 %v720_v39 }
 0x13b   :  { %v967_v40 = vpop.eup %966 }
 0x13c   :  { %v723_v41 = vsub.f32 1.0, %v967_v40 }
 0x13e   :  { %v724_v42 = vsel %vm722_vm0, %v967_v40, %v723_v41 }
 0x13f   :  { %v725_v43 = vmax.f32 %v724_v42, 0.0 }
 0x141   :  { %v726_v44 = vmin.f32 %v725_v43, 1.0 }
 0x143   :  { %727 = vst [vmem:[%s1192_s2] sm:$0xff] %v726_v44 }

</bundles_post_ra>
